<compile_context>
chip_gen: v7x
topology: tpu7x:2x2x1
jax: 0.10.0
libtpu: 0.0.40
codegen_flags: <defaults>
</compile_context>

<pallas_src>
import functools

import jax
import jax.numpy as jnp
from jax import lax
from jax.experimental import pallas as pl
from jax.experimental.pallas import tpu as pltpu


def _num_tensorcores():
    """Best-effort TensorCore-per-chip detection; default 1 (v5e/v6e)."""
    try:
        info = pltpu.get_tpu_info()
        for name in ("num_cores", "core_count", "num_tensorcores", "tensorcore_count"):
            v = getattr(info, name, None)
            if isinstance(v, int) and v >= 1:
                return v
    except Exception:
        pass
    try:
        kind = jax.local_devices()[0].device_kind.lower()
        if "v7" in kind:
            return 2
    except Exception:
        pass
    return 1


def _vmem_capacity_bytes():
    try:
        v = getattr(pltpu.get_tpu_info(), "vmem_capacity_bytes", None)
        if isinstance(v, int) and v > 0:
            return v
    except Exception:
        pass
    return 64 << 20  # conservative: v7x physical VMEM


def _pick_pos_tile(s_len, batch, bpad, te, itemsize, slab_budget, rows_cap=512):
    """Largest divisor of s_len whose gathered block fits the row cap and the
    per-slab VMEM budget.  ts=1 is always legal, so no pathological fallback."""
    bytes_per_pos = max(bpad * te * itemsize, 1)
    max_ts = max(1, min(s_len, rows_cap // max(batch, 1),
                        slab_budget // bytes_per_pos))
    best = 1
    for t in range(1, max_ts + 1):
        if s_len % t == 0:
            best = t
    return best


def _mean_encoder_kernel(src_ref, inv_ref, table_ref, mem_ref, mean_ref,
                         gbuf, acc_ref, sem, *, ts, batch, te, unrolled):
    """One grid step == (emb tile e, block of ts sequence positions p).

    src_ref:   SMEM int32 [s_len*batch]    flat token ids (scalar prefetch)
    inv_ref:   VMEM f32   [batch, 1]       1/length per batch row
    table_ref: HBM (ANY)  [vocab, emb_dim] embedding table (never resident)
    mem_ref:   VMEM out   [ts, batch, te]  memory-bank block
    mean_ref:  VMEM out   [batch, te]      pooled mean (written at finalize)
    gbuf:      VMEM       [2, ts, batch, te] double-buffered gather buffer
    acc_ref:   VMEM f32   [batch, te]      running-sum accumulator
    sem:       DMA sems   [2]              one per gather slot
    """
    e = pl.program_id(0)
    p = pl.program_id(1)
    n_pos = pl.num_programs(1)

    col0 = e * te
    if te % 128 == 0:
        col0 = pl.multiple_of(col0, 128)

    def issue_gather(p_idx, slot):
        # One contiguous row-slice DMA per token of position block p_idx.
        def issue_pos(s):
            row = p_idx * (ts * batch) + s * batch
            for b in range(batch):
                tok = src_ref[row + b]          # ids pre-clamped in wrapper
                pltpu.make_async_copy(
                    table_ref.at[pl.ds(tok, 1), pl.ds(col0, te)],
                    gbuf.at[slot, s, pl.ds(b, 1), :],
                    sem.at[slot],
                ).start()
        if unrolled:
            for s in range(ts):
                issue_pos(s)
        else:
            def body(s, carry):
                issue_pos(s)
                return carry
            lax.fori_loop(0, ts, body, 0)

    def wait_gather(slot):
        # Wait descriptors only need matching shapes/semaphore.
        def wait_pos(s):
            for b in range(batch):
                pltpu.make_async_copy(
                    table_ref.at[pl.ds(0, 1), pl.ds(col0, te)],
                    gbuf.at[slot, s, pl.ds(b, 1), :],
                    sem.at[slot],
                ).wait()
        if unrolled:
            for s in range(ts):
                wait_pos(s)
        else:
            def body(s, carry):
                wait_pos(s)
                return carry
            lax.fori_loop(0, ts, body, 0)

    cur = p % 2
    nxt = (p + 1) % 2

    @pl.when(p == 0)
    def _prime():
        issue_gather(0, 0)                       # prime slot 0
        acc_ref[...] = jnp.zeros_like(acc_ref)

    @pl.when(p + 1 < n_pos)
    def _prefetch_next():
        issue_gather(p + 1, nxt)                 # overlap next block's HBM latency

    wait_gather(cur)

    block = gbuf[cur]                            # (ts, batch, te)
    mem_ref[...] = block.astype(mem_ref.dtype)   # dense slab store
    acc_ref[...] += block.astype(jnp.float32).sum(axis=0)

    @pl.when(p == n_pos - 1)
    def _finalize():
        # single broadcast VPU multiply by 1/length, cast once.
        mean_ref[...] = (acc_ref[...] * inv_ref[...]).astype(mean_ref.dtype)


def mean_encoder_forward(src, table, num_layers, lengths=None):
    """Pallas implementation of MeanEncoder.forward.

    Args:
      src:     int   [src_len, batch] token indices.
      table:   float [vocab, emb_dim] embedding weights.
      num_layers: int, number of replicated layers.
      lengths: optional int [batch] sequence lengths.

    Returns:
      ((mean, mean), memory_bank) with
        mean:        [num_layers, batch, emb_dim]
        memory_bank: [src_len, batch, emb_dim]
    """
    s_len, batch = src.shape
    vocab, emb_dim = table.shape
    itemsize = table.dtype.itemsize

    # Emb-axis split: one full-row DMA per token on 1-TC chips; 2 tiles on
    # 2-TC chips (v7x) so both cores get a "parallel" axis to shard.
    n_cores = _num_tensorcores()
    te = emb_dim // 2 if (n_cores >= 2 and emb_dim % 256 == 0) else emb_dim
    n_emb = emb_dim // te

    # Position-block sizing, budgeted against (conservative) physical VMEM.
    vmem_cap = _vmem_capacity_bytes()
    budget = min(vmem_cap // 3, 24 << 20)
    slab_budget = max(budget // 5, 256 << 10)
    bpad = ((batch + 7) // 8) * 8                # sublane padding in VMEM
    ts = _pick_pos_tile(s_len, batch, bpad, te, itemsize, slab_budget, rows_cap=512)
    n_pos = s_len // ts
    rows = ts * batch

    # Hoist OOB clamp out of the kernel (off the DMA-address critical path).
    src_flat = jnp.clip(src.astype(jnp.int32), 0, vocab - 1).reshape(s_len * batch)
    if lengths is None:
        inv = jnp.full((batch, 1), 1.0 / s_len, dtype=jnp.float32)
    else:
        inv = (1.0 / lengths.astype(jnp.float32)).reshape(batch, 1)

    kernel = functools.partial(_mean_encoder_kernel, ts=ts, batch=batch, te=te,
                               unrolled=(rows <= 64))

    slab = ts * bpad * te * itemsize             # one gather/mem slab (padded)
    vmem_limit = int(min(max(6 * slab + (4 << 20), 8 << 20), 48 << 20))

    mem, mean = pl.pallas_call(
        kernel,
        out_shape=(
            jax.ShapeDtypeStruct((s_len, batch, emb_dim), table.dtype),
            jax.ShapeDtypeStruct((batch, emb_dim), table.dtype),
        ),
        grid_spec=pltpu.PrefetchScalarGridSpec(
            num_scalar_prefetch=1,                      # token ids -> SMEM
            grid=(n_emb, n_pos),                        # reduction axis last
            in_specs=[
                pl.BlockSpec((batch, 1), lambda e, p, *_: (0, 0)),   # 1/length
                pl.BlockSpec(memory_space=pl.ANY),                   # table in HBM
            ],
            out_specs=(
                pl.BlockSpec((ts, batch, te), lambda e, p, *_: (p, 0, e)),
                pl.BlockSpec((batch, te), lambda e, p, *_: (0, e)),
            ),
            scratch_shapes=[
                pltpu.VMEM((2, ts, batch, te), table.dtype),   # double-buffered gather
                pltpu.VMEM((batch, te), jnp.float32),          # f32 accumulator
                pltpu.SemaphoreType.DMA((2,)),                 # one sem per slot
            ],
        ),
        compiler_params=pltpu.CompilerParams(
            dimension_semantics=("parallel", "arbitrary"),
            vmem_limit_bytes=vmem_limit,
        ),
    )(src_flat, inv, table)

    mean_exp = jnp.broadcast_to(mean, (num_layers, batch, emb_dim))
    encoder_final = (mean_exp, mean_exp)
    return encoder_final, mem


def _reference(src, table, num_layers, lengths=None):
    emb = table[src]                                  # [s_len, batch, emb_dim]
    if lengths is None:
        m = emb.mean(0)
    else:
        m = emb.sum(0) / lengths.astype(jnp.float32)[:, None]
    m = jnp.broadcast_to(m, (num_layers,) + m.shape)
    return m, emb


if __name__ == "__main__":
    key = jax.random.PRNGKey(0)
    k_tab, k_src, k_len, k_src2, k_len2 = jax.random.split(key, 5)

    num_layers = 2
    vocab = 64
    emb_dim = 128

    table = jax.random.normal(k_tab, (vocab, emb_dim), dtype=jnp.float32)

    # --- small config (single position block, fully-unrolled gather path) ---
    s_len, batch = 8, 4
    src = jax.random.randint(k_src, (s_len, batch), 0, vocab, dtype=jnp.int32)
    lengths = jax.random.randint(k_len, (batch,), 1, s_len + 1, dtype=jnp.int32)

    (fa, fb), mem = mean_encoder_forward(src, table, num_layers)
    jax.block_until_ready((fa, fb, mem))
    (fla, flb), mem_l = mean_encoder_forward(src, table, num_layers, lengths)
    jax.block_until_ready((fla, flb, mem_l))

    mref, eref = _reference(src, table, num_layers)
    mref_l, _ = _reference(src, table, num_layers, lengths)
    assert jnp.allclose(mem, eref, atol=1e-5, rtol=1e-5)
    assert jnp.allclose(fa, mref, atol=1e-5, rtol=1e-5)
    assert jnp.allclose(fb, mref, atol=1e-5, rtol=1e-5)
    assert jnp.allclose(mem_l, eref, atol=1e-5, rtol=1e-5)
    assert jnp.allclose(fla, mref_l, atol=1e-5, rtol=1e-5)
    assert jnp.allclose(flb, mref_l, atol=1e-5, rtol=1e-5)

    # --- larger config (multiple position blocks -> exercises the manual
    #     double-buffering and the fori_loop DMA issue/wait path) ---
    s_len2, batch2 = 48, 16
    src2 = jax.random.randint(k_src2, (s_len2, batch2), 0, vocab, dtype=jnp.int32)
    lengths2 = jax.random.randint(k_len2, (batch2,), 1, s_len2 + 1, dtype=jnp.int32)

    (f2a, f2b), mem2 = mean_encoder_forward(src2, table, num_layers, lengths2)
    jax.block_until_ready((f2a, f2b, mem2))

    mref2, eref2 = _reference(src2, table, num_layers, lengths2)
    assert jnp.allclose(mem2, eref2, atol=1e-5, rtol=1e-5)
    assert jnp.allclose(f2a, mref2, atol=1e-4, rtol=1e-5)
    assert jnp.allclose(f2b, mref2, atol=1e-4, rtol=1e-5)

    print("KERNEL_OK")
</pallas_src>

<mosaic_0001>
module attributes {stable_mosaic.version = 11 : i64} {
  func.func @_mean_encoder_kernel(%arg0: i32, %arg1: i32, %arg2: memref<32xi32, #tpu.memory_space<smem>>, %arg3: memref<4x1xf32, #tpu.memory_space<vmem>>, %arg4: memref<64x128xf32, #tpu.memory_space<any>>, %arg5: memref<8x4x128xf32, #tpu.memory_space<vmem>>, %arg6: memref<4x128xf32, #tpu.memory_space<vmem>>, %arg7: memref<2x8x4x128xf32, #tpu.memory_space<vmem>>, %arg8: memref<4x128xf32, #tpu.memory_space<vmem>>, %arg9: memref<2x!tpu.dma_semaphore, #tpu.memory_space<semaphore_mem>>) attributes {dimension_semantics = [#tpu.dimension_semantics<parallel>, #tpu.dimension_semantics<arbitrary>], iteration_bounds = array<i64: 1, 1>, scalar_prefetch = 1 : i64, scratch_operands = 3 : i64, tpu.core_type = #tpu.core_type<tc>, window_params = [{pipeline_mode = #tpu.pipeline_mode<synchronous>, transform_indices = @transform_0, window_bounds = array<i64: 4, 1>}, {}, {transform_indices = @transform_2, window_bounds = array<i64: 8, 4, 128>}, {transform_indices = @transform_3, window_bounds = array<i64: 4, 128>}]} {
    %c128_i32 = arith.constant 128 : i32
    %0 = arith.muli %arg0, %c128_i32 : i32
    %1 = tpu.assume_multiple %0, 128 : i32
    %c2_i32 = arith.constant 2 : i32
    %c0_i32 = arith.constant 0 : i32
    %2 = arith.cmpi eq, %c2_i32, %c0_i32 : i32
    %c1_i32 = arith.constant 1 : i32
    %3 = arith.select %2, %c1_i32, %c2_i32 : i32
    %4 = arith.remsi %arg1, %3 : i32
    %c0_i32_0 = arith.constant 0 : i32
    %5 = arith.cmpi ne, %4, %c0_i32_0 : i32
    %c0_i32_1 = arith.constant 0 : i32
    %6 = arith.cmpi slt, %4, %c0_i32_1 : i32
    %c0_i32_2 = arith.constant 0 : i32
    %7 = arith.cmpi slt, %3, %c0_i32_2 : i32
    %8 = arith.xori %6, %7 : i1
    %9 = arith.andi %8, %5 : i1
    %10 = arith.addi %4, %3 : i32
    %11 = arith.select %9, %10, %4 : i32
    %c1_i32_3 = arith.constant 1 : i32
    %12 = arith.addi %arg1, %c1_i32_3 : i32
    %c2_i32_4 = arith.constant 2 : i32
    %c0_i32_5 = arith.constant 0 : i32
    %13 = arith.cmpi eq, %c2_i32_4, %c0_i32_5 : i32
    %c1_i32_6 = arith.constant 1 : i32
    %14 = arith.select %13, %c1_i32_6, %c2_i32_4 : i32
    %15 = arith.remsi %12, %14 : i32
    %c0_i32_7 = arith.constant 0 : i32
    %16 = arith.cmpi ne, %15, %c0_i32_7 : i32
    %c0_i32_8 = arith.constant 0 : i32
    %17 = arith.cmpi slt, %15, %c0_i32_8 : i32
    %c0_i32_9 = arith.constant 0 : i32
    %18 = arith.cmpi slt, %14, %c0_i32_9 : i32
    %19 = arith.xori %17, %18 : i1
    %20 = arith.andi %19, %16 : i1
    %21 = arith.addi %15, %14 : i32
    %22 = arith.select %20, %21, %15 : i32
    %c0_i32_10 = arith.constant 0 : i32
    %23 = arith.cmpi eq, %arg1, %c0_i32_10 : i32
    %24 = arith.extui %23 : i1 to i32
    %c0_i32_11 = arith.constant 0 : i32
    %25 = arith.cmpi ne, %24, %c0_i32_11 : i32
    scf.if %25 {
      %c0_149 = arith.constant 0 : index
      %201 = memref.load %arg2[%c0_149] : memref<32xi32, #tpu.memory_space<smem>>
      %c0_i32_150 = arith.constant 0 : i32
      %c0_i32_151 = arith.constant 0 : i32
      %c0_i32_152 = arith.constant 0 : i32
      %202 = tpu.memref_slice %arg4[%201, %1] : memref<64x128xf32, #tpu.memory_space<any>> -> memref<1x128xf32, #tpu.memory_space<any>>
      %c0_i32_153 = arith.constant 0 : i32
      %c0_i32_154 = arith.constant 0 : i32
      %203 = tpu.memref_slice %arg7[%c0_i32_150, %c0_i32_151, %c0_i32_153, %c0_i32_154] : memref<2x8x4x128xf32, #tpu.memory_space<vmem>> -> memref<1x1x1x128xf32, #tpu.memory_space<vmem>>
      %204 = tpu.memref_squeeze %203 : memref<1x1x1x128xf32, #tpu.memory_space<vmem>> -> memref<1x128xf32, #tpu.memory_space<vmem>>
      %205 = tpu.memref_slice %arg9[%c0_i32_152] : memref<2x!tpu.dma_semaphore, #tpu.memory_space<semaphore_mem>> -> memref<1x!tpu.dma_semaphore, #tpu.memory_space<semaphore_mem>>
      %206 = tpu.memref_squeeze %205 : memref<1x!tpu.dma_semaphore, #tpu.memory_space<semaphore_mem>> -> memref<!tpu.dma_semaphore, #tpu.memory_space<semaphore_mem>>
      tpu.enqueue_dma source(%202 : memref<1x128xf32, #tpu.memory_space<any>>) target(%204 : memref<1x128xf32, #tpu.memory_space<vmem>>) target_semaphore(%206 : memref<!tpu.dma_semaphore, #tpu.memory_space<semaphore_mem>>)
      %c1 = arith.constant 1 : index
      %207 = memref.load %arg2[%c1] : memref<32xi32, #tpu.memory_space<smem>>
      %c0_i32_155 = arith.constant 0 : i32
      %c0_i32_156 = arith.constant 0 : i32
      %c0_i32_157 = arith.constant 0 : i32
      %208 = tpu.memref_slice %arg4[%207, %1] : memref<64x128xf32, #tpu.memory_space<any>> -> memref<1x128xf32, #tpu.memory_space<any>>
      %c1_i32_158 = arith.constant 1 : i32
      %c0_i32_159 = arith.constant 0 : i32
      %209 = tpu.memref_slice %arg7[%c0_i32_155, %c0_i32_156, %c1_i32_158, %c0_i32_159] : memref<2x8x4x128xf32, #tpu.memory_space<vmem>> -> memref<1x1x1x128xf32, #tpu.memory_space<vmem>>
      %210 = tpu.memref_squeeze %209 : memref<1x1x1x128xf32, #tpu.memory_space<vmem>> -> memref<1x128xf32, #tpu.memory_space<vmem>>
      %211 = tpu.memref_slice %arg9[%c0_i32_157] : memref<2x!tpu.dma_semaphore, #tpu.memory_space<semaphore_mem>> -> memref<1x!tpu.dma_semaphore, #tpu.memory_space<semaphore_mem>>
      %212 = tpu.memref_squeeze %211 : memref<1x!tpu.dma_semaphore, #tpu.memory_space<semaphore_mem>> -> memref<!tpu.dma_semaphore, #tpu.memory_space<semaphore_mem>>
      tpu.enqueue_dma source(%208 : memref<1x128xf32, #tpu.memory_space<any>>) target(%210 : memref<1x128xf32, #tpu.memory_space<vmem>>) target_semaphore(%212 : memref<!tpu.dma_semaphore, #tpu.memory_space<semaphore_mem>>)
      %c2 = arith.constant 2 : index
      %213 = memref.load %arg2[%c2] : memref<32xi32, #tpu.memory_space<smem>>
      %c0_i32_160 = arith.constant 0 : i32
      %c0_i32_161 = arith.constant 0 : i32
      %c0_i32_162 = arith.constant 0 : i32
      %214 = tpu.memref_slice %arg4[%213, %1] : memref<64x128xf32, #tpu.memory_space<any>> -> memref<1x128xf32, #tpu.memory_space<any>>
      %c2_i32_163 = arith.constant 2 : i32
      %c0_i32_164 = arith.constant 0 : i32
      %215 = tpu.memref_slice %arg7[%c0_i32_160, %c0_i32_161, %c2_i32_163, %c0_i32_164] : memref<2x8x4x128xf32, #tpu.memory_space<vmem>> -> memref<1x1x1x128xf32, #tpu.memory_space<vmem>>
      %216 = tpu.memref_squeeze %215 : memref<1x1x1x128xf32, #tpu.memory_space<vmem>> -> memref<1x128xf32, #tpu.memory_space<vmem>>
      %217 = tpu.memref_slice %arg9[%c0_i32_162] : memref<2x!tpu.dma_semaphore, #tpu.memory_space<semaphore_mem>> -> memref<1x!tpu.dma_semaphore, #tpu.memory_space<semaphore_mem>>
      %218 = tpu.memref_squeeze %217 : memref<1x!tpu.dma_semaphore, #tpu.memory_space<semaphore_mem>> -> memref<!tpu.dma_semaphore, #tpu.memory_space<semaphore_mem>>
      tpu.enqueue_dma source(%214 : memref<1x128xf32, #tpu.memory_space<any>>) target(%216 : memref<1x128xf32, #tpu.memory_space<vmem>>) target_semaphore(%218 : memref<!tpu.dma_semaphore, #tpu.memory_space<semaphore_mem>>)
      %c3 = arith.constant 3 : index
      %219 = memref.load %arg2[%c3] : memref<32xi32, #tpu.memory_space<smem>>
      %c0_i32_165 = arith.constant 0 : i32
      %c0_i32_166 = arith.constant 0 : i32
      %c0_i32_167 = arith.constant 0 : i32
      %220 = tpu.memref_slice %arg4[%219, %1] : memref<64x128xf32, #tpu.memory_space<any>> -> memref<1x128xf32, #tpu.memory_space<any>>
      %c3_i32_168 = arith.constant 3 : i32
      %c0_i32_169 = arith.constant 0 : i32
      %221 = tpu.memref_slice %arg7[%c0_i32_165, %c0_i32_166, %c3_i32_168, %c0_i32_169] : memref<2x8x4x128xf32, #tpu.memory_space<vmem>> -> memref<1x1x1x128xf32, #tpu.memory_space<vmem>>
      %222 = tpu.memref_squeeze %221 : memref<1x1x1x128xf32, #tpu.memory_space<vmem>> -> memref<1x128xf32, #tpu.memory_space<vmem>>
      %223 = tpu.memref_slice %arg9[%c0_i32_167] : memref<2x!tpu.dma_semaphore, #tpu.memory_space<semaphore_mem>> -> memref<1x!tpu.dma_semaphore, #tpu.memory_space<semaphore_mem>>
      %224 = tpu.memref_squeeze %223 : memref<1x!tpu.dma_semaphore, #tpu.memory_space<semaphore_mem>> -> memref<!tpu.dma_semaphore, #tpu.memory_space<semaphore_mem>>
      tpu.enqueue_dma source(%220 : memref<1x128xf32, #tpu.memory_space<any>>) target(%222 : memref<1x128xf32, #tpu.memory_space<vmem>>) target_semaphore(%224 : memref<!tpu.dma_semaphore, #tpu.memory_space<semaphore_mem>>)
      %c4 = arith.constant 4 : index
      %225 = memref.load %arg2[%c4] : memref<32xi32, #tpu.memory_space<smem>>
      %c0_i32_170 = arith.constant 0 : i32
      %c1_i32_171 = arith.constant 1 : i32
      %c0_i32_172 = arith.constant 0 : i32
      %226 = tpu.memref_slice %arg4[%225, %1] : memref<64x128xf32, #tpu.memory_space<any>> -> memref<1x128xf32, #tpu.memory_space<any>>
      %c0_i32_173 = arith.constant 0 : i32
      %c0_i32_174 = arith.constant 0 : i32
      %227 = tpu.memref_slice %arg7[%c0_i32_170, %c1_i32_171, %c0_i32_173, %c0_i32_174] : memref<2x8x4x128xf32, #tpu.memory_space<vmem>> -> memref<1x1x1x128xf32, #tpu.memory_space<vmem>>
      %228 = tpu.memref_squeeze %227 : memref<1x1x1x128xf32, #tpu.memory_space<vmem>> -> memref<1x128xf32, #tpu.memory_space<vmem>>
      %229 = tpu.memref_slice %arg9[%c0_i32_172] : memref<2x!tpu.dma_semaphore, #tpu.memory_space<semaphore_mem>> -> memref<1x!tpu.dma_semaphore, #tpu.memory_space<semaphore_mem>>
      %230 = tpu.memref_squeeze %229 : memref<1x!tpu.dma_semaphore, #tpu.memory_space<semaphore_mem>> -> memref<!tpu.dma_semaphore, #tpu.memory_space<semaphore_mem>>
      tpu.enqueue_dma source(%226 : memref<1x128xf32, #tpu.memory_space<any>>) target(%228 : memref<1x128xf32, #tpu.memory_space<vmem>>) target_semaphore(%230 : memref<!tpu.dma_semaphore, #tpu.memory_space<semaphore_mem>>)
      %c5 = arith.constant 5 : index
      %231 = memref.load %arg2[%c5] : memref<32xi32, #tpu.memory_space<smem>>
      %c0_i32_175 = arith.constant 0 : i32
      %c1_i32_176 = arith.constant 1 : i32
      %c0_i32_177 = arith.constant 0 : i32
      %232 = tpu.memref_slice %arg4[%231, %1] : memref<64x128xf32, #tpu.memory_space<any>> -> memref<1x128xf32, #tpu.memory_space<any>>
      %c1_i32_178 = arith.constant 1 : i32
      %c0_i32_179 = arith.constant 0 : i32
      %233 = tpu.memref_slice %arg7[%c0_i32_175, %c1_i32_176, %c1_i32_178, %c0_i32_179] : memref<2x8x4x128xf32, #tpu.memory_space<vmem>> -> memref<1x1x1x128xf32, #tpu.memory_space<vmem>>
      %234 = tpu.memref_squeeze %233 : memref<1x1x1x128xf32, #tpu.memory_space<vmem>> -> memref<1x128xf32, #tpu.memory_space<vmem>>
      %235 = tpu.memref_slice %arg9[%c0_i32_177] : memref<2x!tpu.dma_semaphore, #tpu.memory_space<semaphore_mem>> -> memref<1x!tpu.dma_semaphore, #tpu.memory_space<semaphore_mem>>
      %236 = tpu.memref_squeeze %235 : memref<1x!tpu.dma_semaphore, #tpu.memory_space<semaphore_mem>> -> memref<!tpu.dma_semaphore, #tpu.memory_space<semaphore_mem>>
      tpu.enqueue_dma source(%232 : memref<1x128xf32, #tpu.memory_space<any>>) target(%234 : memref<1x128xf32, #tpu.memory_space<vmem>>) target_semaphore(%236 : memref<!tpu.dma_semaphore, #tpu.memory_space<semaphore_mem>>)
      %c6 = arith.constant 6 : index
      %237 = memref.load %arg2[%c6] : memref<32xi32, #tpu.memory_space<smem>>
      %c0_i32_180 = arith.constant 0 : i32
      %c1_i32_181 = arith.constant 1 : i32
      %c0_i32_182 = arith.constant 0 : i32
      %238 = tpu.memref_slice %arg4[%237, %1] : memref<64x128xf32, #tpu.memory_space<any>> -> memref<1x128xf32, #tpu.memory_space<any>>
      %c2_i32_183 = arith.constant 2 : i32
      %c0_i32_184 = arith.constant 0 : i32
      %239 = tpu.memref_slice %arg7[%c0_i32_180, %c1_i32_181, %c2_i32_183, %c0_i32_184] : memref<2x8x4x128xf32, #tpu.memory_space<vmem>> -> memref<1x1x1x128xf32, #tpu.memory_space<vmem>>
      %240 = tpu.memref_squeeze %239 : memref<1x1x1x128xf32, #tpu.memory_space<vmem>> -> memref<1x128xf32, #tpu.memory_space<vmem>>
      %241 = tpu.memref_slice %arg9[%c0_i32_182] : memref<2x!tpu.dma_semaphore, #tpu.memory_space<semaphore_mem>> -> memref<1x!tpu.dma_semaphore, #tpu.memory_space<semaphore_mem>>
      %242 = tpu.memref_squeeze %241 : memref<1x!tpu.dma_semaphore, #tpu.memory_space<semaphore_mem>> -> memref<!tpu.dma_semaphore, #tpu.memory_space<semaphore_mem>>
      tpu.enqueue_dma source(%238 : memref<1x128xf32, #tpu.memory_space<any>>) target(%240 : memref<1x128xf32, #tpu.memory_space<vmem>>) target_semaphore(%242 : memref<!tpu.dma_semaphore, #tpu.memory_space<semaphore_mem>>)
      %c7 = arith.constant 7 : index
      %243 = memref.load %arg2[%c7] : memref<32xi32, #tpu.memory_space<smem>>
      %c0_i32_185 = arith.constant 0 : i32
      %c1_i32_186 = arith.constant 1 : i32
      %c0_i32_187 = arith.constant 0 : i32
      %244 = tpu.memref_slice %arg4[%243, %1] : memref<64x128xf32, #tpu.memory_space<any>> -> memref<1x128xf32, #tpu.memory_space<any>>
      %c3_i32_188 = arith.constant 3 : i32
      %c0_i32_189 = arith.constant 0 : i32
      %245 = tpu.memref_slice %arg7[%c0_i32_185, %c1_i32_186, %c3_i32_188, %c0_i32_189] : memref<2x8x4x128xf32, #tpu.memory_space<vmem>> -> memref<1x1x1x128xf32, #tpu.memory_space<vmem>>
      %246 = tpu.memref_squeeze %245 : memref<1x1x1x128xf32, #tpu.memory_space<vmem>> -> memref<1x128xf32, #tpu.memory_space<vmem>>
      %247 = tpu.memref_slice %arg9[%c0_i32_187] : memref<2x!tpu.dma_semaphore, #tpu.memory_space<semaphore_mem>> -> memref<1x!tpu.dma_semaphore, #tpu.memory_space<semaphore_mem>>
      %248 = tpu.memref_squeeze %247 : memref<1x!tpu.dma_semaphore, #tpu.memory_space<semaphore_mem>> -> memref<!tpu.dma_semaphore, #tpu.memory_space<semaphore_mem>>
      tpu.enqueue_dma source(%244 : memref<1x128xf32, #tpu.memory_space<any>>) target(%246 : memref<1x128xf32, #tpu.memory_space<vmem>>) target_semaphore(%248 : memref<!tpu.dma_semaphore, #tpu.memory_space<semaphore_mem>>)
      %c8 = arith.constant 8 : index
      %249 = memref.load %arg2[%c8] : memref<32xi32, #tpu.memory_space<smem>>
      %c0_i32_190 = arith.constant 0 : i32
      %c2_i32_191 = arith.constant 2 : i32
      %c0_i32_192 = arith.constant 0 : i32
      %250 = tpu.memref_slice %arg4[%249, %1] : memref<64x128xf32, #tpu.memory_space<any>> -> memref<1x128xf32, #tpu.memory_space<any>>
      %c0_i32_193 = arith.constant 0 : i32
      %c0_i32_194 = arith.constant 0 : i32
      %251 = tpu.memref_slice %arg7[%c0_i32_190, %c2_i32_191, %c0_i32_193, %c0_i32_194] : memref<2x8x4x128xf32, #tpu.memory_space<vmem>> -> memref<1x1x1x128xf32, #tpu.memory_space<vmem>>
      %252 = tpu.memref_squeeze %251 : memref<1x1x1x128xf32, #tpu.memory_space<vmem>> -> memref<1x128xf32, #tpu.memory_space<vmem>>
      %253 = tpu.memref_slice %arg9[%c0_i32_192] : memref<2x!tpu.dma_semaphore, #tpu.memory_space<semaphore_mem>> -> memref<1x!tpu.dma_semaphore, #tpu.memory_space<semaphore_mem>>
      %254 = tpu.memref_squeeze %253 : memref<1x!tpu.dma_semaphore, #tpu.memory_space<semaphore_mem>> -> memref<!tpu.dma_semaphore, #tpu.memory_space<semaphore_mem>>
      tpu.enqueue_dma source(%250 : memref<1x128xf32, #tpu.memory_space<any>>) target(%252 : memref<1x128xf32, #tpu.memory_space<vmem>>) target_semaphore(%254 : memref<!tpu.dma_semaphore, #tpu.memory_space<semaphore_mem>>)
      %c9 = arith.constant 9 : index
      %255 = memref.load %arg2[%c9] : memref<32xi32, #tpu.memory_space<smem>>
      %c0_i32_195 = arith.constant 0 : i32
      %c2_i32_196 = arith.constant 2 : i32
      %c0_i32_197 = arith.constant 0 : i32
      %256 = tpu.memref_slice %arg4[%255, %1] : memref<64x128xf32, #tpu.memory_space<any>> -> memref<1x128xf32, #tpu.memory_space<any>>
      %c1_i32_198 = arith.constant 1 : i32
      %c0_i32_199 = arith.constant 0 : i32
      %257 = tpu.memref_slice %arg7[%c0_i32_195, %c2_i32_196, %c1_i32_198, %c0_i32_199] : memref<2x8x4x128xf32, #tpu.memory_space<vmem>> -> memref<1x1x1x128xf32, #tpu.memory_space<vmem>>
      %258 = tpu.memref_squeeze %257 : memref<1x1x1x128xf32, #tpu.memory_space<vmem>> -> memref<1x128xf32, #tpu.memory_space<vmem>>
      %259 = tpu.memref_slice %arg9[%c0_i32_197] : memref<2x!tpu.dma_semaphore, #tpu.memory_space<semaphore_mem>> -> memref<1x!tpu.dma_semaphore, #tpu.memory_space<semaphore_mem>>
      %260 = tpu.memref_squeeze %259 : memref<1x!tpu.dma_semaphore, #tpu.memory_space<semaphore_mem>> -> memref<!tpu.dma_semaphore, #tpu.memory_space<semaphore_mem>>
      tpu.enqueue_dma source(%256 : memref<1x128xf32, #tpu.memory_space<any>>) target(%258 : memref<1x128xf32, #tpu.memory_space<vmem>>) target_semaphore(%260 : memref<!tpu.dma_semaphore, #tpu.memory_space<semaphore_mem>>)
      %c10 = arith.constant 10 : index
      %261 = memref.load %arg2[%c10] : memref<32xi32, #tpu.memory_space<smem>>
      %c0_i32_200 = arith.constant 0 : i32
      %c2_i32_201 = arith.constant 2 : i32
      %c0_i32_202 = arith.constant 0 : i32
      %262 = tpu.memref_slice %arg4[%261, %1] : memref<64x128xf32, #tpu.memory_space<any>> -> memref<1x128xf32, #tpu.memory_space<any>>
      %c2_i32_203 = arith.constant 2 : i32
      %c0_i32_204 = arith.constant 0 : i32
      %263 = tpu.memref_slice %arg7[%c0_i32_200, %c2_i32_201, %c2_i32_203, %c0_i32_204] : memref<2x8x4x128xf32, #tpu.memory_space<vmem>> -> memref<1x1x1x128xf32, #tpu.memory_space<vmem>>
      %264 = tpu.memref_squeeze %263 : memref<1x1x1x128xf32, #tpu.memory_space<vmem>> -> memref<1x128xf32, #tpu.memory_space<vmem>>
      %265 = tpu.memref_slice %arg9[%c0_i32_202] : memref<2x!tpu.dma_semaphore, #tpu.memory_space<semaphore_mem>> -> memref<1x!tpu.dma_semaphore, #tpu.memory_space<semaphore_mem>>
      %266 = tpu.memref_squeeze %265 : memref<1x!tpu.dma_semaphore, #tpu.memory_space<semaphore_mem>> -> memref<!tpu.dma_semaphore, #tpu.memory_space<semaphore_mem>>
      tpu.enqueue_dma source(%262 : memref<1x128xf32, #tpu.memory_space<any>>) target(%264 : memref<1x128xf32, #tpu.memory_space<vmem>>) target_semaphore(%266 : memref<!tpu.dma_semaphore, #tpu.memory_space<semaphore_mem>>)
      %c11 = arith.constant 11 : index
      %267 = memref.load %arg2[%c11] : memref<32xi32, #tpu.memory_space<smem>>
      %c0_i32_205 = arith.constant 0 : i32
      %c2_i32_206 = arith.constant 2 : i32
      %c0_i32_207 = arith.constant 0 : i32
      %268 = tpu.memref_slice %arg4[%267, %1] : memref<64x128xf32, #tpu.memory_space<any>> -> memref<1x128xf32, #tpu.memory_space<any>>
      %c3_i32_208 = arith.constant 3 : i32
      %c0_i32_209 = arith.constant 0 : i32
      %269 = tpu.memref_slice %arg7[%c0_i32_205, %c2_i32_206, %c3_i32_208, %c0_i32_209] : memref<2x8x4x128xf32, #tpu.memory_space<vmem>> -> memref<1x1x1x128xf32, #tpu.memory_space<vmem>>
      %270 = tpu.memref_squeeze %269 : memref<1x1x1x128xf32, #tpu.memory_space<vmem>> -> memref<1x128xf32, #tpu.memory_space<vmem>>
      %271 = tpu.memref_slice %arg9[%c0_i32_207] : memref<2x!tpu.dma_semaphore, #tpu.memory_space<semaphore_mem>> -> memref<1x!tpu.dma_semaphore, #tpu.memory_space<semaphore_mem>>
      %272 = tpu.memref_squeeze %271 : memref<1x!tpu.dma_semaphore, #tpu.memory_space<semaphore_mem>> -> memref<!tpu.dma_semaphore, #tpu.memory_space<semaphore_mem>>
      tpu.enqueue_dma source(%268 : memref<1x128xf32, #tpu.memory_space<any>>) target(%270 : memref<1x128xf32, #tpu.memory_space<vmem>>) target_semaphore(%272 : memref<!tpu.dma_semaphore, #tpu.memory_space<semaphore_mem>>)
      %c12 = arith.constant 12 : index
      %273 = memref.load %arg2[%c12] : memref<32xi32, #tpu.memory_space<smem>>
      %c0_i32_210 = arith.constant 0 : i32
      %c3_i32_211 = arith.constant 3 : i32
      %c0_i32_212 = arith.constant 0 : i32
      %274 = tpu.memref_slice %arg4[%273, %1] : memref<64x128xf32, #tpu.memory_space<any>> -> memref<1x128xf32, #tpu.memory_space<any>>
      %c0_i32_213 = arith.constant 0 : i32
      %c0_i32_214 = arith.constant 0 : i32
      %275 = tpu.memref_slice %arg7[%c0_i32_210, %c3_i32_211, %c0_i32_213, %c0_i32_214] : memref<2x8x4x128xf32, #tpu.memory_space<vmem>> -> memref<1x1x1x128xf32, #tpu.memory_space<vmem>>
      %276 = tpu.memref_squeeze %275 : memref<1x1x1x128xf32, #tpu.memory_space<vmem>> -> memref<1x128xf32, #tpu.memory_space<vmem>>
      %277 = tpu.memref_slice %arg9[%c0_i32_212] : memref<2x!tpu.dma_semaphore, #tpu.memory_space<semaphore_mem>> -> memref<1x!tpu.dma_semaphore, #tpu.memory_space<semaphore_mem>>
      %278 = tpu.memref_squeeze %277 : memref<1x!tpu.dma_semaphore, #tpu.memory_space<semaphore_mem>> -> memref<!tpu.dma_semaphore, #tpu.memory_space<semaphore_mem>>
      tpu.enqueue_dma source(%274 : memref<1x128xf32, #tpu.memory_space<any>>) target(%276 : memref<1x128xf32, #tpu.memory_space<vmem>>) target_semaphore(%278 : memref<!tpu.dma_semaphore, #tpu.memory_space<semaphore_mem>>)
      %c13 = arith.constant 13 : index
      %279 = memref.load %arg2[%c13] : memref<32xi32, #tpu.memory_space<smem>>
      %c0_i32_215 = arith.constant 0 : i32
      %c3_i32_216 = arith.constant 3 : i32
      %c0_i32_217 = arith.constant 0 : i32
      %280 = tpu.memref_slice %arg4[%279, %1] : memref<64x128xf32, #tpu.memory_space<any>> -> memref<1x128xf32, #tpu.memory_space<any>>
      %c1_i32_218 = arith.constant 1 : i32
      %c0_i32_219 = arith.constant 0 : i32
      %281 = tpu.memref_slice %arg7[%c0_i32_215, %c3_i32_216, %c1_i32_218, %c0_i32_219] : memref<2x8x4x128xf32, #tpu.memory_space<vmem>> -> memref<1x1x1x128xf32, #tpu.memory_space<vmem>>
      %282 = tpu.memref_squeeze %281 : memref<1x1x1x128xf32, #tpu.memory_space<vmem>> -> memref<1x128xf32, #tpu.memory_space<vmem>>
      %283 = tpu.memref_slice %arg9[%c0_i32_217] : memref<2x!tpu.dma_semaphore, #tpu.memory_space<semaphore_mem>> -> memref<1x!tpu.dma_semaphore, #tpu.memory_space<semaphore_mem>>
      %284 = tpu.memref_squeeze %283 : memref<1x!tpu.dma_semaphore, #tpu.memory_space<semaphore_mem>> -> memref<!tpu.dma_semaphore, #tpu.memory_space<semaphore_mem>>
      tpu.enqueue_dma source(%280 : memref<1x128xf32, #tpu.memory_space<any>>) target(%282 : memref<1x128xf32, #tpu.memory_space<vmem>>) target_semaphore(%284 : memref<!tpu.dma_semaphore, #tpu.memory_space<semaphore_mem>>)
      %c14 = arith.constant 14 : index
      %285 = memref.load %arg2[%c14] : memref<32xi32, #tpu.memory_space<smem>>
      %c0_i32_220 = arith.constant 0 : i32
      %c3_i32_221 = arith.constant 3 : i32
      %c0_i32_222 = arith.constant 0 : i32
      %286 = tpu.memref_slice %arg4[%285, %1] : memref<64x128xf32, #tpu.memory_space<any>> -> memref<1x128xf32, #tpu.memory_space<any>>
      %c2_i32_223 = arith.constant 2 : i32
      %c0_i32_224 = arith.constant 0 : i32
      %287 = tpu.memref_slice %arg7[%c0_i32_220, %c3_i32_221, %c2_i32_223, %c0_i32_224] : memref<2x8x4x128xf32, #tpu.memory_space<vmem>> -> memref<1x1x1x128xf32, #tpu.memory_space<vmem>>
      %288 = tpu.memref_squeeze %287 : memref<1x1x1x128xf32, #tpu.memory_space<vmem>> -> memref<1x128xf32, #tpu.memory_space<vmem>>
      %289 = tpu.memref_slice %arg9[%c0_i32_222] : memref<2x!tpu.dma_semaphore, #tpu.memory_space<semaphore_mem>> -> memref<1x!tpu.dma_semaphore, #tpu.memory_space<semaphore_mem>>
      %290 = tpu.memref_squeeze %289 : memref<1x!tpu.dma_semaphore, #tpu.memory_space<semaphore_mem>> -> memref<!tpu.dma_semaphore, #tpu.memory_space<semaphore_mem>>
      tpu.enqueue_dma source(%286 : memref<1x128xf32, #tpu.memory_space<any>>) target(%288 : memref<1x128xf32, #tpu.memory_space<vmem>>) target_semaphore(%290 : memref<!tpu.dma_semaphore, #tpu.memory_space<semaphore_mem>>)
      %c15 = arith.constant 15 : index
      %291 = memref.load %arg2[%c15] : memref<32xi32, #tpu.memory_space<smem>>
      %c0_i32_225 = arith.constant 0 : i32
      %c3_i32_226 = arith.constant 3 : i32
      %c0_i32_227 = arith.constant 0 : i32
      %292 = tpu.memref_slice %arg4[%291, %1] : memref<64x128xf32, #tpu.memory_space<any>> -> memref<1x128xf32, #tpu.memory_space<any>>
      %c3_i32_228 = arith.constant 3 : i32
      %c0_i32_229 = arith.constant 0 : i32
      %293 = tpu.memref_slice %arg7[%c0_i32_225, %c3_i32_226, %c3_i32_228, %c0_i32_229] : memref<2x8x4x128xf32, #tpu.memory_space<vmem>> -> memref<1x1x1x128xf32, #tpu.memory_space<vmem>>
      %294 = tpu.memref_squeeze %293 : memref<1x1x1x128xf32, #tpu.memory_space<vmem>> -> memref<1x128xf32, #tpu.memory_space<vmem>>
      %295 = tpu.memref_slice %arg9[%c0_i32_227] : memref<2x!tpu.dma_semaphore, #tpu.memory_space<semaphore_mem>> -> memref<1x!tpu.dma_semaphore, #tpu.memory_space<semaphore_mem>>
      %296 = tpu.memref_squeeze %295 : memref<1x!tpu.dma_semaphore, #tpu.memory_space<semaphore_mem>> -> memref<!tpu.dma_semaphore, #tpu.memory_space<semaphore_mem>>
      tpu.enqueue_dma source(%292 : memref<1x128xf32, #tpu.memory_space<any>>) target(%294 : memref<1x128xf32, #tpu.memory_space<vmem>>) target_semaphore(%296 : memref<!tpu.dma_semaphore, #tpu.memory_space<semaphore_mem>>)
      %c16 = arith.constant 16 : index
      %297 = memref.load %arg2[%c16] : memref<32xi32, #tpu.memory_space<smem>>
      %c0_i32_230 = arith.constant 0 : i32
      %c4_i32_231 = arith.constant 4 : i32
      %c0_i32_232 = arith.constant 0 : i32
      %298 = tpu.memref_slice %arg4[%297, %1] : memref<64x128xf32, #tpu.memory_space<any>> -> memref<1x128xf32, #tpu.memory_space<any>>
      %c0_i32_233 = arith.constant 0 : i32
      %c0_i32_234 = arith.constant 0 : i32
      %299 = tpu.memref_slice %arg7[%c0_i32_230, %c4_i32_231, %c0_i32_233, %c0_i32_234] : memref<2x8x4x128xf32, #tpu.memory_space<vmem>> -> memref<1x1x1x128xf32, #tpu.memory_space<vmem>>
      %300 = tpu.memref_squeeze %299 : memref<1x1x1x128xf32, #tpu.memory_space<vmem>> -> memref<1x128xf32, #tpu.memory_space<vmem>>
      %301 = tpu.memref_slice %arg9[%c0_i32_232] : memref<2x!tpu.dma_semaphore, #tpu.memory_space<semaphore_mem>> -> memref<1x!tpu.dma_semaphore, #tpu.memory_space<semaphore_mem>>
      %302 = tpu.memref_squeeze %301 : memref<1x!tpu.dma_semaphore, #tpu.memory_space<semaphore_mem>> -> memref<!tpu.dma_semaphore, #tpu.memory_space<semaphore_mem>>
      tpu.enqueue_dma source(%298 : memref<1x128xf32, #tpu.memory_space<any>>) target(%300 : memref<1x128xf32, #tpu.memory_space<vmem>>) target_semaphore(%302 : memref<!tpu.dma_semaphore, #tpu.memory_space<semaphore_mem>>)
      %c17 = arith.constant 17 : index
      %303 = memref.load %arg2[%c17] : memref<32xi32, #tpu.memory_space<smem>>
      %c0_i32_235 = arith.constant 0 : i32
      %c4_i32_236 = arith.constant 4 : i32
      %c0_i32_237 = arith.constant 0 : i32
      %304 = tpu.memref_slice %arg4[%303, %1] : memref<64x128xf32, #tpu.memory_space<any>> -> memref<1x128xf32, #tpu.memory_space<any>>
      %c1_i32_238 = arith.constant 1 : i32
      %c0_i32_239 = arith.constant 0 : i32
      %305 = tpu.memref_slice %arg7[%c0_i32_235, %c4_i32_236, %c1_i32_238, %c0_i32_239] : memref<2x8x4x128xf32, #tpu.memory_space<vmem>> -> memref<1x1x1x128xf32, #tpu.memory_space<vmem>>
      %306 = tpu.memref_squeeze %305 : memref<1x1x1x128xf32, #tpu.memory_space<vmem>> -> memref<1x128xf32, #tpu.memory_space<vmem>>
      %307 = tpu.memref_slice %arg9[%c0_i32_237] : memref<2x!tpu.dma_semaphore, #tpu.memory_space<semaphore_mem>> -> memref<1x!tpu.dma_semaphore, #tpu.memory_space<semaphore_mem>>
      %308 = tpu.memref_squeeze %307 : memref<1x!tpu.dma_semaphore, #tpu.memory_space<semaphore_mem>> -> memref<!tpu.dma_semaphore, #tpu.memory_space<semaphore_mem>>
      tpu.enqueue_dma source(%304 : memref<1x128xf32, #tpu.memory_space<any>>) target(%306 : memref<1x128xf32, #tpu.memory_space<vmem>>) target_semaphore(%308 : memref<!tpu.dma_semaphore, #tpu.memory_space<semaphore_mem>>)
      %c18 = arith.constant 18 : index
      %309 = memref.load %arg2[%c18] : memref<32xi32, #tpu.memory_space<smem>>
      %c0_i32_240 = arith.constant 0 : i32
      %c4_i32_241 = arith.constant 4 : i32
      %c0_i32_242 = arith.constant 0 : i32
      %310 = tpu.memref_slice %arg4[%309, %1] : memref<64x128xf32, #tpu.memory_space<any>> -> memref<1x128xf32, #tpu.memory_space<any>>
      %c2_i32_243 = arith.constant 2 : i32
      %c0_i32_244 = arith.constant 0 : i32
      %311 = tpu.memref_slice %arg7[%c0_i32_240, %c4_i32_241, %c2_i32_243, %c0_i32_244] : memref<2x8x4x128xf32, #tpu.memory_space<vmem>> -> memref<1x1x1x128xf32, #tpu.memory_space<vmem>>
      %312 = tpu.memref_squeeze %311 : memref<1x1x1x128xf32, #tpu.memory_space<vmem>> -> memref<1x128xf32, #tpu.memory_space<vmem>>
      %313 = tpu.memref_slice %arg9[%c0_i32_242] : memref<2x!tpu.dma_semaphore, #tpu.memory_space<semaphore_mem>> -> memref<1x!tpu.dma_semaphore, #tpu.memory_space<semaphore_mem>>
      %314 = tpu.memref_squeeze %313 : memref<1x!tpu.dma_semaphore, #tpu.memory_space<semaphore_mem>> -> memref<!tpu.dma_semaphore, #tpu.memory_space<semaphore_mem>>
      tpu.enqueue_dma source(%310 : memref<1x128xf32, #tpu.memory_space<any>>) target(%312 : memref<1x128xf32, #tpu.memory_space<vmem>>) target_semaphore(%314 : memref<!tpu.dma_semaphore, #tpu.memory_space<semaphore_mem>>)
      %c19 = arith.constant 19 : index
      %315 = memref.load %arg2[%c19] : memref<32xi32, #tpu.memory_space<smem>>
      %c0_i32_245 = arith.constant 0 : i32
      %c4_i32_246 = arith.constant 4 : i32
      %c0_i32_247 = arith.constant 0 : i32
      %316 = tpu.memref_slice %arg4[%315, %1] : memref<64x128xf32, #tpu.memory_space<any>> -> memref<1x128xf32, #tpu.memory_space<any>>
      %c3_i32_248 = arith.constant 3 : i32
      %c0_i32_249 = arith.constant 0 : i32
      %317 = tpu.memref_slice %arg7[%c0_i32_245, %c4_i32_246, %c3_i32_248, %c0_i32_249] : memref<2x8x4x128xf32, #tpu.memory_space<vmem>> -> memref<1x1x1x128xf32, #tpu.memory_space<vmem>>
      %318 = tpu.memref_squeeze %317 : memref<1x1x1x128xf32, #tpu.memory_space<vmem>> -> memref<1x128xf32, #tpu.memory_space<vmem>>
      %319 = tpu.memref_slice %arg9[%c0_i32_247] : memref<2x!tpu.dma_semaphore, #tpu.memory_space<semaphore_mem>> -> memref<1x!tpu.dma_semaphore, #tpu.memory_space<semaphore_mem>>
      %320 = tpu.memref_squeeze %319 : memref<1x!tpu.dma_semaphore, #tpu.memory_space<semaphore_mem>> -> memref<!tpu.dma_semaphore, #tpu.memory_space<semaphore_mem>>
      tpu.enqueue_dma source(%316 : memref<1x128xf32, #tpu.memory_space<any>>) target(%318 : memref<1x128xf32, #tpu.memory_space<vmem>>) target_semaphore(%320 : memref<!tpu.dma_semaphore, #tpu.memory_space<semaphore_mem>>)
      %c20 = arith.constant 20 : index
      %321 = memref.load %arg2[%c20] : memref<32xi32, #tpu.memory_space<smem>>
      %c0_i32_250 = arith.constant 0 : i32
      %c5_i32_251 = arith.constant 5 : i32
      %c0_i32_252 = arith.constant 0 : i32
      %322 = tpu.memref_slice %arg4[%321, %1] : memref<64x128xf32, #tpu.memory_space<any>> -> memref<1x128xf32, #tpu.memory_space<any>>
      %c0_i32_253 = arith.constant 0 : i32
      %c0_i32_254 = arith.constant 0 : i32
      %323 = tpu.memref_slice %arg7[%c0_i32_250, %c5_i32_251, %c0_i32_253, %c0_i32_254] : memref<2x8x4x128xf32, #tpu.memory_space<vmem>> -> memref<1x1x1x128xf32, #tpu.memory_space<vmem>>
      %324 = tpu.memref_squeeze %323 : memref<1x1x1x128xf32, #tpu.memory_space<vmem>> -> memref<1x128xf32, #tpu.memory_space<vmem>>
      %325 = tpu.memref_slice %arg9[%c0_i32_252] : memref<2x!tpu.dma_semaphore, #tpu.memory_space<semaphore_mem>> -> memref<1x!tpu.dma_semaphore, #tpu.memory_space<semaphore_mem>>
      %326 = tpu.memref_squeeze %325 : memref<1x!tpu.dma_semaphore, #tpu.memory_space<semaphore_mem>> -> memref<!tpu.dma_semaphore, #tpu.memory_space<semaphore_mem>>
      tpu.enqueue_dma source(%322 : memref<1x128xf32, #tpu.memory_space<any>>) target(%324 : memref<1x128xf32, #tpu.memory_space<vmem>>) target_semaphore(%326 : memref<!tpu.dma_semaphore, #tpu.memory_space<semaphore_mem>>)
      %c21 = arith.constant 21 : index
      %327 = memref.load %arg2[%c21] : memref<32xi32, #tpu.memory_space<smem>>
      %c0_i32_255 = arith.constant 0 : i32
      %c5_i32_256 = arith.constant 5 : i32
      %c0_i32_257 = arith.constant 0 : i32
      %328 = tpu.memref_slice %arg4[%327, %1] : memref<64x128xf32, #tpu.memory_space<any>> -> memref<1x128xf32, #tpu.memory_space<any>>
      %c1_i32_258 = arith.constant 1 : i32
      %c0_i32_259 = arith.constant 0 : i32
      %329 = tpu.memref_slice %arg7[%c0_i32_255, %c5_i32_256, %c1_i32_258, %c0_i32_259] : memref<2x8x4x128xf32, #tpu.memory_space<vmem>> -> memref<1x1x1x128xf32, #tpu.memory_space<vmem>>
      %330 = tpu.memref_squeeze %329 : memref<1x1x1x128xf32, #tpu.memory_space<vmem>> -> memref<1x128xf32, #tpu.memory_space<vmem>>
      %331 = tpu.memref_slice %arg9[%c0_i32_257] : memref<2x!tpu.dma_semaphore, #tpu.memory_space<semaphore_mem>> -> memref<1x!tpu.dma_semaphore, #tpu.memory_space<semaphore_mem>>
      %332 = tpu.memref_squeeze %331 : memref<1x!tpu.dma_semaphore, #tpu.memory_space<semaphore_mem>> -> memref<!tpu.dma_semaphore, #tpu.memory_space<semaphore_mem>>
      tpu.enqueue_dma source(%328 : memref<1x128xf32, #tpu.memory_space<any>>) target(%330 : memref<1x128xf32, #tpu.memory_space<vmem>>) target_semaphore(%332 : memref<!tpu.dma_semaphore, #tpu.memory_space<semaphore_mem>>)
      %c22 = arith.constant 22 : index
      %333 = memref.load %arg2[%c22] : memref<32xi32, #tpu.memory_space<smem>>
      %c0_i32_260 = arith.constant 0 : i32
      %c5_i32_261 = arith.constant 5 : i32
      %c0_i32_262 = arith.constant 0 : i32
      %334 = tpu.memref_slice %arg4[%333, %1] : memref<64x128xf32, #tpu.memory_space<any>> -> memref<1x128xf32, #tpu.memory_space<any>>
      %c2_i32_263 = arith.constant 2 : i32
      %c0_i32_264 = arith.constant 0 : i32
      %335 = tpu.memref_slice %arg7[%c0_i32_260, %c5_i32_261, %c2_i32_263, %c0_i32_264] : memref<2x8x4x128xf32, #tpu.memory_space<vmem>> -> memref<1x1x1x128xf32, #tpu.memory_space<vmem>>
      %336 = tpu.memref_squeeze %335 : memref<1x1x1x128xf32, #tpu.memory_space<vmem>> -> memref<1x128xf32, #tpu.memory_space<vmem>>
      %337 = tpu.memref_slice %arg9[%c0_i32_262] : memref<2x!tpu.dma_semaphore, #tpu.memory_space<semaphore_mem>> -> memref<1x!tpu.dma_semaphore, #tpu.memory_space<semaphore_mem>>
      %338 = tpu.memref_squeeze %337 : memref<1x!tpu.dma_semaphore, #tpu.memory_space<semaphore_mem>> -> memref<!tpu.dma_semaphore, #tpu.memory_space<semaphore_mem>>
      tpu.enqueue_dma source(%334 : memref<1x128xf32, #tpu.memory_space<any>>) target(%336 : memref<1x128xf32, #tpu.memory_space<vmem>>) target_semaphore(%338 : memref<!tpu.dma_semaphore, #tpu.memory_space<semaphore_mem>>)
      %c23 = arith.constant 23 : index
      %339 = memref.load %arg2[%c23] : memref<32xi32, #tpu.memory_space<smem>>
      %c0_i32_265 = arith.constant 0 : i32
      %c5_i32_266 = arith.constant 5 : i32
      %c0_i32_267 = arith.constant 0 : i32
      %340 = tpu.memref_slice %arg4[%339, %1] : memref<64x128xf32, #tpu.memory_space<any>> -> memref<1x128xf32, #tpu.memory_space<any>>
      %c3_i32_268 = arith.constant 3 : i32
      %c0_i32_269 = arith.constant 0 : i32
      %341 = tpu.memref_slice %arg7[%c0_i32_265, %c5_i32_266, %c3_i32_268, %c0_i32_269] : memref<2x8x4x128xf32, #tpu.memory_space<vmem>> -> memref<1x1x1x128xf32, #tpu.memory_space<vmem>>
      %342 = tpu.memref_squeeze %341 : memref<1x1x1x128xf32, #tpu.memory_space<vmem>> -> memref<1x128xf32, #tpu.memory_space<vmem>>
      %343 = tpu.memref_slice %arg9[%c0_i32_267] : memref<2x!tpu.dma_semaphore, #tpu.memory_space<semaphore_mem>> -> memref<1x!tpu.dma_semaphore, #tpu.memory_space<semaphore_mem>>
      %344 = tpu.memref_squeeze %343 : memref<1x!tpu.dma_semaphore, #tpu.memory_space<semaphore_mem>> -> memref<!tpu.dma_semaphore, #tpu.memory_space<semaphore_mem>>
      tpu.enqueue_dma source(%340 : memref<1x128xf32, #tpu.memory_space<any>>) target(%342 : memref<1x128xf32, #tpu.memory_space<vmem>>) target_semaphore(%344 : memref<!tpu.dma_semaphore, #tpu.memory_space<semaphore_mem>>)
      %c24 = arith.constant 24 : index
      %345 = memref.load %arg2[%c24] : memref<32xi32, #tpu.memory_space<smem>>
      %c0_i32_270 = arith.constant 0 : i32
      %c6_i32_271 = arith.constant 6 : i32
      %c0_i32_272 = arith.constant 0 : i32
      %346 = tpu.memref_slice %arg4[%345, %1] : memref<64x128xf32, #tpu.memory_space<any>> -> memref<1x128xf32, #tpu.memory_space<any>>
      %c0_i32_273 = arith.constant 0 : i32
      %c0_i32_274 = arith.constant 0 : i32
      %347 = tpu.memref_slice %arg7[%c0_i32_270, %c6_i32_271, %c0_i32_273, %c0_i32_274] : memref<2x8x4x128xf32, #tpu.memory_space<vmem>> -> memref<1x1x1x128xf32, #tpu.memory_space<vmem>>
      %348 = tpu.memref_squeeze %347 : memref<1x1x1x128xf32, #tpu.memory_space<vmem>> -> memref<1x128xf32, #tpu.memory_space<vmem>>
      %349 = tpu.memref_slice %arg9[%c0_i32_272] : memref<2x!tpu.dma_semaphore, #tpu.memory_space<semaphore_mem>> -> memref<1x!tpu.dma_semaphore, #tpu.memory_space<semaphore_mem>>
      %350 = tpu.memref_squeeze %349 : memref<1x!tpu.dma_semaphore, #tpu.memory_space<semaphore_mem>> -> memref<!tpu.dma_semaphore, #tpu.memory_space<semaphore_mem>>
      tpu.enqueue_dma source(%346 : memref<1x128xf32, #tpu.memory_space<any>>) target(%348 : memref<1x128xf32, #tpu.memory_space<vmem>>) target_semaphore(%350 : memref<!tpu.dma_semaphore, #tpu.memory_space<semaphore_mem>>)
      %c25 = arith.constant 25 : index
      %351 = memref.load %arg2[%c25] : memref<32xi32, #tpu.memory_space<smem>>
      %c0_i32_275 = arith.constant 0 : i32
      %c6_i32_276 = arith.constant 6 : i32
      %c0_i32_277 = arith.constant 0 : i32
      %352 = tpu.memref_slice %arg4[%351, %1] : memref<64x128xf32, #tpu.memory_space<any>> -> memref<1x128xf32, #tpu.memory_space<any>>
      %c1_i32_278 = arith.constant 1 : i32
      %c0_i32_279 = arith.constant 0 : i32
      %353 = tpu.memref_slice %arg7[%c0_i32_275, %c6_i32_276, %c1_i32_278, %c0_i32_279] : memref<2x8x4x128xf32, #tpu.memory_space<vmem>> -> memref<1x1x1x128xf32, #tpu.memory_space<vmem>>
      %354 = tpu.memref_squeeze %353 : memref<1x1x1x128xf32, #tpu.memory_space<vmem>> -> memref<1x128xf32, #tpu.memory_space<vmem>>
      %355 = tpu.memref_slice %arg9[%c0_i32_277] : memref<2x!tpu.dma_semaphore, #tpu.memory_space<semaphore_mem>> -> memref<1x!tpu.dma_semaphore, #tpu.memory_space<semaphore_mem>>
      %356 = tpu.memref_squeeze %355 : memref<1x!tpu.dma_semaphore, #tpu.memory_space<semaphore_mem>> -> memref<!tpu.dma_semaphore, #tpu.memory_space<semaphore_mem>>
      tpu.enqueue_dma source(%352 : memref<1x128xf32, #tpu.memory_space<any>>) target(%354 : memref<1x128xf32, #tpu.memory_space<vmem>>) target_semaphore(%356 : memref<!tpu.dma_semaphore, #tpu.memory_space<semaphore_mem>>)
      %c26 = arith.constant 26 : index
      %357 = memref.load %arg2[%c26] : memref<32xi32, #tpu.memory_space<smem>>
      %c0_i32_280 = arith.constant 0 : i32
      %c6_i32_281 = arith.constant 6 : i32
      %c0_i32_282 = arith.constant 0 : i32
      %358 = tpu.memref_slice %arg4[%357, %1] : memref<64x128xf32, #tpu.memory_space<any>> -> memref<1x128xf32, #tpu.memory_space<any>>
      %c2_i32_283 = arith.constant 2 : i32
      %c0_i32_284 = arith.constant 0 : i32
      %359 = tpu.memref_slice %arg7[%c0_i32_280, %c6_i32_281, %c2_i32_283, %c0_i32_284] : memref<2x8x4x128xf32, #tpu.memory_space<vmem>> -> memref<1x1x1x128xf32, #tpu.memory_space<vmem>>
      %360 = tpu.memref_squeeze %359 : memref<1x1x1x128xf32, #tpu.memory_space<vmem>> -> memref<1x128xf32, #tpu.memory_space<vmem>>
      %361 = tpu.memref_slice %arg9[%c0_i32_282] : memref<2x!tpu.dma_semaphore, #tpu.memory_space<semaphore_mem>> -> memref<1x!tpu.dma_semaphore, #tpu.memory_space<semaphore_mem>>
      %362 = tpu.memref_squeeze %361 : memref<1x!tpu.dma_semaphore, #tpu.memory_space<semaphore_mem>> -> memref<!tpu.dma_semaphore, #tpu.memory_space<semaphore_mem>>
      tpu.enqueue_dma source(%358 : memref<1x128xf32, #tpu.memory_space<any>>) target(%360 : memref<1x128xf32, #tpu.memory_space<vmem>>) target_semaphore(%362 : memref<!tpu.dma_semaphore, #tpu.memory_space<semaphore_mem>>)
      %c27 = arith.constant 27 : index
      %363 = memref.load %arg2[%c27] : memref<32xi32, #tpu.memory_space<smem>>
      %c0_i32_285 = arith.constant 0 : i32
      %c6_i32_286 = arith.constant 6 : i32
      %c0_i32_287 = arith.constant 0 : i32
      %364 = tpu.memref_slice %arg4[%363, %1] : memref<64x128xf32, #tpu.memory_space<any>> -> memref<1x128xf32, #tpu.memory_space<any>>
      %c3_i32_288 = arith.constant 3 : i32
      %c0_i32_289 = arith.constant 0 : i32
      %365 = tpu.memref_slice %arg7[%c0_i32_285, %c6_i32_286, %c3_i32_288, %c0_i32_289] : memref<2x8x4x128xf32, #tpu.memory_space<vmem>> -> memref<1x1x1x128xf32, #tpu.memory_space<vmem>>
      %366 = tpu.memref_squeeze %365 : memref<1x1x1x128xf32, #tpu.memory_space<vmem>> -> memref<1x128xf32, #tpu.memory_space<vmem>>
      %367 = tpu.memref_slice %arg9[%c0_i32_287] : memref<2x!tpu.dma_semaphore, #tpu.memory_space<semaphore_mem>> -> memref<1x!tpu.dma_semaphore, #tpu.memory_space<semaphore_mem>>
      %368 = tpu.memref_squeeze %367 : memref<1x!tpu.dma_semaphore, #tpu.memory_space<semaphore_mem>> -> memref<!tpu.dma_semaphore, #tpu.memory_space<semaphore_mem>>
      tpu.enqueue_dma source(%364 : memref<1x128xf32, #tpu.memory_space<any>>) target(%366 : memref<1x128xf32, #tpu.memory_space<vmem>>) target_semaphore(%368 : memref<!tpu.dma_semaphore, #tpu.memory_space<semaphore_mem>>)
      %c28 = arith.constant 28 : index
      %369 = memref.load %arg2[%c28] : memref<32xi32, #tpu.memory_space<smem>>
      %c0_i32_290 = arith.constant 0 : i32
      %c7_i32_291 = arith.constant 7 : i32
      %c0_i32_292 = arith.constant 0 : i32
      %370 = tpu.memref_slice %arg4[%369, %1] : memref<64x128xf32, #tpu.memory_space<any>> -> memref<1x128xf32, #tpu.memory_space<any>>
      %c0_i32_293 = arith.constant 0 : i32
      %c0_i32_294 = arith.constant 0 : i32
      %371 = tpu.memref_slice %arg7[%c0_i32_290, %c7_i32_291, %c0_i32_293, %c0_i32_294] : memref<2x8x4x128xf32, #tpu.memory_space<vmem>> -> memref<1x1x1x128xf32, #tpu.memory_space<vmem>>
      %372 = tpu.memref_squeeze %371 : memref<1x1x1x128xf32, #tpu.memory_space<vmem>> -> memref<1x128xf32, #tpu.memory_space<vmem>>
      %373 = tpu.memref_slice %arg9[%c0_i32_292] : memref<2x!tpu.dma_semaphore, #tpu.memory_space<semaphore_mem>> -> memref<1x!tpu.dma_semaphore, #tpu.memory_space<semaphore_mem>>
      %374 = tpu.memref_squeeze %373 : memref<1x!tpu.dma_semaphore, #tpu.memory_space<semaphore_mem>> -> memref<!tpu.dma_semaphore, #tpu.memory_space<semaphore_mem>>
      tpu.enqueue_dma source(%370 : memref<1x128xf32, #tpu.memory_space<any>>) target(%372 : memref<1x128xf32, #tpu.memory_space<vmem>>) target_semaphore(%374 : memref<!tpu.dma_semaphore, #tpu.memory_space<semaphore_mem>>)
      %c29 = arith.constant 29 : index
      %375 = memref.load %arg2[%c29] : memref<32xi32, #tpu.memory_space<smem>>
      %c0_i32_295 = arith.constant 0 : i32
      %c7_i32_296 = arith.constant 7 : i32
      %c0_i32_297 = arith.constant 0 : i32
      %376 = tpu.memref_slice %arg4[%375, %1] : memref<64x128xf32, #tpu.memory_space<any>> -> memref<1x128xf32, #tpu.memory_space<any>>
      %c1_i32_298 = arith.constant 1 : i32
      %c0_i32_299 = arith.constant 0 : i32
      %377 = tpu.memref_slice %arg7[%c0_i32_295, %c7_i32_296, %c1_i32_298, %c0_i32_299] : memref<2x8x4x128xf32, #tpu.memory_space<vmem>> -> memref<1x1x1x128xf32, #tpu.memory_space<vmem>>
      %378 = tpu.memref_squeeze %377 : memref<1x1x1x128xf32, #tpu.memory_space<vmem>> -> memref<1x128xf32, #tpu.memory_space<vmem>>
      %379 = tpu.memref_slice %arg9[%c0_i32_297] : memref<2x!tpu.dma_semaphore, #tpu.memory_space<semaphore_mem>> -> memref<1x!tpu.dma_semaphore, #tpu.memory_space<semaphore_mem>>
      %380 = tpu.memref_squeeze %379 : memref<1x!tpu.dma_semaphore, #tpu.memory_space<semaphore_mem>> -> memref<!tpu.dma_semaphore, #tpu.memory_space<semaphore_mem>>
      tpu.enqueue_dma source(%376 : memref<1x128xf32, #tpu.memory_space<any>>) target(%378 : memref<1x128xf32, #tpu.memory_space<vmem>>) target_semaphore(%380 : memref<!tpu.dma_semaphore, #tpu.memory_space<semaphore_mem>>)
      %c30 = arith.constant 30 : index
      %381 = memref.load %arg2[%c30] : memref<32xi32, #tpu.memory_space<smem>>
      %c0_i32_300 = arith.constant 0 : i32
      %c7_i32_301 = arith.constant 7 : i32
      %c0_i32_302 = arith.constant 0 : i32
      %382 = tpu.memref_slice %arg4[%381, %1] : memref<64x128xf32, #tpu.memory_space<any>> -> memref<1x128xf32, #tpu.memory_space<any>>
      %c2_i32_303 = arith.constant 2 : i32
      %c0_i32_304 = arith.constant 0 : i32
      %383 = tpu.memref_slice %arg7[%c0_i32_300, %c7_i32_301, %c2_i32_303, %c0_i32_304] : memref<2x8x4x128xf32, #tpu.memory_space<vmem>> -> memref<1x1x1x128xf32, #tpu.memory_space<vmem>>
      %384 = tpu.memref_squeeze %383 : memref<1x1x1x128xf32, #tpu.memory_space<vmem>> -> memref<1x128xf32, #tpu.memory_space<vmem>>
      %385 = tpu.memref_slice %arg9[%c0_i32_302] : memref<2x!tpu.dma_semaphore, #tpu.memory_space<semaphore_mem>> -> memref<1x!tpu.dma_semaphore, #tpu.memory_space<semaphore_mem>>
      %386 = tpu.memref_squeeze %385 : memref<1x!tpu.dma_semaphore, #tpu.memory_space<semaphore_mem>> -> memref<!tpu.dma_semaphore, #tpu.memory_space<semaphore_mem>>
      tpu.enqueue_dma source(%382 : memref<1x128xf32, #tpu.memory_space<any>>) target(%384 : memref<1x128xf32, #tpu.memory_space<vmem>>) target_semaphore(%386 : memref<!tpu.dma_semaphore, #tpu.memory_space<semaphore_mem>>)
      %c31 = arith.constant 31 : index
      %387 = memref.load %arg2[%c31] : memref<32xi32, #tpu.memory_space<smem>>
      %c0_i32_305 = arith.constant 0 : i32
      %c7_i32_306 = arith.constant 7 : i32
      %c0_i32_307 = arith.constant 0 : i32
      %388 = tpu.memref_slice %arg4[%387, %1] : memref<64x128xf32, #tpu.memory_space<any>> -> memref<1x128xf32, #tpu.memory_space<any>>
      %c3_i32_308 = arith.constant 3 : i32
      %c0_i32_309 = arith.constant 0 : i32
      %389 = tpu.memref_slice %arg7[%c0_i32_305, %c7_i32_306, %c3_i32_308, %c0_i32_309] : memref<2x8x4x128xf32, #tpu.memory_space<vmem>> -> memref<1x1x1x128xf32, #tpu.memory_space<vmem>>
      %390 = tpu.memref_squeeze %389 : memref<1x1x1x128xf32, #tpu.memory_space<vmem>> -> memref<1x128xf32, #tpu.memory_space<vmem>>
      %391 = tpu.memref_slice %arg9[%c0_i32_307] : memref<2x!tpu.dma_semaphore, #tpu.memory_space<semaphore_mem>> -> memref<1x!tpu.dma_semaphore, #tpu.memory_space<semaphore_mem>>
      %392 = tpu.memref_squeeze %391 : memref<1x!tpu.dma_semaphore, #tpu.memory_space<semaphore_mem>> -> memref<!tpu.dma_semaphore, #tpu.memory_space<semaphore_mem>>
      tpu.enqueue_dma source(%388 : memref<1x128xf32, #tpu.memory_space<any>>) target(%390 : memref<1x128xf32, #tpu.memory_space<vmem>>) target_semaphore(%392 : memref<!tpu.dma_semaphore, #tpu.memory_space<semaphore_mem>>)
      %cst_310 = arith.constant 0.000000e+00 : f32
      %393 = vector.broadcast %cst_310 : f32 to vector<4x128xf32>
      %c0_311 = arith.constant 0 : index
      %c0_312 = arith.constant 0 : index
      %394 = vector.load %arg8[%c0_311, %c0_312] : memref<4x128xf32, #tpu.memory_space<vmem>>, vector<4x128xf32>
      tpu.vector_store %arg8[%c0_311, %c0_312], %393 {strides = array<i32>} : memref<4x128xf32, #tpu.memory_space<vmem>>, vector<4x128xf32>,
    } else {
    }
    %c1_i32_12 = arith.constant 1 : i32
    %26 = arith.addi %arg1, %c1_i32_12 : i32
    %c1_i32_13 = arith.constant 1 : i32
    %27 = arith.cmpi slt, %26, %c1_i32_13 : i32
    %28 = arith.extui %27 : i1 to i32
    %c0_i32_14 = arith.constant 0 : i32
    %29 = arith.cmpi ne, %28, %c0_i32_14 : i32
    scf.if %29 {
      %c1_i32_149 = arith.constant 1 : i32
      %201 = arith.addi %arg1, %c1_i32_149 : i32
      %c32_i32 = arith.constant 32 : i32
      %202 = arith.muli %201, %c32_i32 : i32
      %c0_i32_150 = arith.constant 0 : i32
      %203 = arith.addi %202, %c0_i32_150 : i32
      %c0_i32_151 = arith.constant 0 : i32
      %204 = arith.addi %203, %c0_i32_151 : i32
      %205 = arith.index_cast %204 : i32 to index
      %206 = memref.load %arg2[%205] : memref<32xi32, #tpu.memory_space<smem>>
      %c0_i32_152 = arith.constant 0 : i32
      %207 = tpu.memref_slice %arg4[%206, %1] : memref<64x128xf32, #tpu.memory_space<any>> -> memref<1x128xf32, #tpu.memory_space<any>>
      %c0_i32_153 = arith.constant 0 : i32
      %c0_i32_154 = arith.constant 0 : i32
      %208 = tpu.memref_slice %arg7[%22, %c0_i32_152, %c0_i32_153, %c0_i32_154] : memref<2x8x4x128xf32, #tpu.memory_space<vmem>> -> memref<1x1x1x128xf32, #tpu.memory_space<vmem>>
      %209 = tpu.memref_squeeze %208 : memref<1x1x1x128xf32, #tpu.memory_space<vmem>> -> memref<1x128xf32, #tpu.memory_space<vmem>>
      %210 = tpu.memref_slice %arg9[%22] : memref<2x!tpu.dma_semaphore, #tpu.memory_space<semaphore_mem>> -> memref<1x!tpu.dma_semaphore, #tpu.memory_space<semaphore_mem>>
      %211 = tpu.memref_squeeze %210 : memref<1x!tpu.dma_semaphore, #tpu.memory_space<semaphore_mem>> -> memref<!tpu.dma_semaphore, #tpu.memory_space<semaphore_mem>>
      tpu.enqueue_dma source(%207 : memref<1x128xf32, #tpu.memory_space<any>>) target(%209 : memref<1x128xf32, #tpu.memory_space<vmem>>) target_semaphore(%211 : memref<!tpu.dma_semaphore, #tpu.memory_space<semaphore_mem>>)
      %c1_i32_155 = arith.constant 1 : i32
      %212 = arith.addi %203, %c1_i32_155 : i32
      %213 = arith.index_cast %212 : i32 to index
      %214 = memref.load %arg2[%213] : memref<32xi32, #tpu.memory_space<smem>>
      %c0_i32_156 = arith.constant 0 : i32
      %215 = tpu.memref_slice %arg4[%214, %1] : memref<64x128xf32, #tpu.memory_space<any>> -> memref<1x128xf32, #tpu.memory_space<any>>
      %c1_i32_157 = arith.constant 1 : i32
      %c0_i32_158 = arith.constant 0 : i32
      %216 = tpu.memref_slice %arg7[%22, %c0_i32_156, %c1_i32_157, %c0_i32_158] : memref<2x8x4x128xf32, #tpu.memory_space<vmem>> -> memref<1x1x1x128xf32, #tpu.memory_space<vmem>>
      %217 = tpu.memref_squeeze %216 : memref<1x1x1x128xf32, #tpu.memory_space<vmem>> -> memref<1x128xf32, #tpu.memory_space<vmem>>
      %218 = tpu.memref_slice %arg9[%22] : memref<2x!tpu.dma_semaphore, #tpu.memory_space<semaphore_mem>> -> memref<1x!tpu.dma_semaphore, #tpu.memory_space<semaphore_mem>>
      %219 = tpu.memref_squeeze %218 : memref<1x!tpu.dma_semaphore, #tpu.memory_space<semaphore_mem>> -> memref<!tpu.dma_semaphore, #tpu.memory_space<semaphore_mem>>
      tpu.enqueue_dma source(%215 : memref<1x128xf32, #tpu.memory_space<any>>) target(%217 : memref<1x128xf32, #tpu.memory_space<vmem>>) target_semaphore(%219 : memref<!tpu.dma_semaphore, #tpu.memory_space<semaphore_mem>>)
      %c2_i32_159 = arith.constant 2 : i32
      %220 = arith.addi %203, %c2_i32_159 : i32
      %221 = arith.index_cast %220 : i32 to index
      %222 = memref.load %arg2[%221] : memref<32xi32, #tpu.memory_space<smem>>
      %c0_i32_160 = arith.constant 0 : i32
      %223 = tpu.memref_slice %arg4[%222, %1] : memref<64x128xf32, #tpu.memory_space<any>> -> memref<1x128xf32, #tpu.memory_space<any>>
      %c2_i32_161 = arith.constant 2 : i32
      %c0_i32_162 = arith.constant 0 : i32
      %224 = tpu.memref_slice %arg7[%22, %c0_i32_160, %c2_i32_161, %c0_i32_162] : memref<2x8x4x128xf32, #tpu.memory_space<vmem>> -> memref<1x1x1x128xf32, #tpu.memory_space<vmem>>
      %225 = tpu.memref_squeeze %224 : memref<1x1x1x128xf32, #tpu.memory_space<vmem>> -> memref<1x128xf32, #tpu.memory_space<vmem>>
      %226 = tpu.memref_slice %arg9[%22] : memref<2x!tpu.dma_semaphore, #tpu.memory_space<semaphore_mem>> -> memref<1x!tpu.dma_semaphore, #tpu.memory_space<semaphore_mem>>
      %227 = tpu.memref_squeeze %226 : memref<1x!tpu.dma_semaphore, #tpu.memory_space<semaphore_mem>> -> memref<!tpu.dma_semaphore, #tpu.memory_space<semaphore_mem>>
      tpu.enqueue_dma source(%223 : memref<1x128xf32, #tpu.memory_space<any>>) target(%225 : memref<1x128xf32, #tpu.memory_space<vmem>>) target_semaphore(%227 : memref<!tpu.dma_semaphore, #tpu.memory_space<semaphore_mem>>)
      %c3_i32_163 = arith.constant 3 : i32
      %228 = arith.addi %203, %c3_i32_163 : i32
      %229 = arith.index_cast %228 : i32 to index
      %230 = memref.load %arg2[%229] : memref<32xi32, #tpu.memory_space<smem>>
      %c0_i32_164 = arith.constant 0 : i32
      %231 = tpu.memref_slice %arg4[%230, %1] : memref<64x128xf32, #tpu.memory_space<any>> -> memref<1x128xf32, #tpu.memory_space<any>>
      %c3_i32_165 = arith.constant 3 : i32
      %c0_i32_166 = arith.constant 0 : i32
      %232 = tpu.memref_slice %arg7[%22, %c0_i32_164, %c3_i32_165, %c0_i32_166] : memref<2x8x4x128xf32, #tpu.memory_space<vmem>> -> memref<1x1x1x128xf32, #tpu.memory_space<vmem>>
      %233 = tpu.memref_squeeze %232 : memref<1x1x1x128xf32, #tpu.memory_space<vmem>> -> memref<1x128xf32, #tpu.memory_space<vmem>>
      %234 = tpu.memref_slice %arg9[%22] : memref<2x!tpu.dma_semaphore, #tpu.memory_space<semaphore_mem>> -> memref<1x!tpu.dma_semaphore, #tpu.memory_space<semaphore_mem>>
      %235 = tpu.memref_squeeze %234 : memref<1x!tpu.dma_semaphore, #tpu.memory_space<semaphore_mem>> -> memref<!tpu.dma_semaphore, #tpu.memory_space<semaphore_mem>>
      tpu.enqueue_dma source(%231 : memref<1x128xf32, #tpu.memory_space<any>>) target(%233 : memref<1x128xf32, #tpu.memory_space<vmem>>) target_semaphore(%235 : memref<!tpu.dma_semaphore, #tpu.memory_space<semaphore_mem>>)
      %c32_i32_167 = arith.constant 32 : i32
      %236 = arith.muli %201, %c32_i32_167 : i32
      %c4_i32_168 = arith.constant 4 : i32
      %237 = arith.addi %236, %c4_i32_168 : i32
      %c0_i32_169 = arith.constant 0 : i32
      %238 = arith.addi %237, %c0_i32_169 : i32
      %239 = arith.index_cast %238 : i32 to index
      %240 = memref.load %arg2[%239] : memref<32xi32, #tpu.memory_space<smem>>
      %c1_i32_170 = arith.constant 1 : i32
      %241 = tpu.memref_slice %arg4[%240, %1] : memref<64x128xf32, #tpu.memory_space<any>> -> memref<1x128xf32, #tpu.memory_space<any>>
      %c0_i32_171 = arith.constant 0 : i32
      %c0_i32_172 = arith.constant 0 : i32
      %242 = tpu.memref_slice %arg7[%22, %c1_i32_170, %c0_i32_171, %c0_i32_172] : memref<2x8x4x128xf32, #tpu.memory_space<vmem>> -> memref<1x1x1x128xf32, #tpu.memory_space<vmem>>
      %243 = tpu.memref_squeeze %242 : memref<1x1x1x128xf32, #tpu.memory_space<vmem>> -> memref<1x128xf32, #tpu.memory_space<vmem>>
      %244 = tpu.memref_slice %arg9[%22] : memref<2x!tpu.dma_semaphore, #tpu.memory_space<semaphore_mem>> -> memref<1x!tpu.dma_semaphore, #tpu.memory_space<semaphore_mem>>
      %245 = tpu.memref_squeeze %244 : memref<1x!tpu.dma_semaphore, #tpu.memory_space<semaphore_mem>> -> memref<!tpu.dma_semaphore, #tpu.memory_space<semaphore_mem>>
      tpu.enqueue_dma source(%241 : memref<1x128xf32, #tpu.memory_space<any>>) target(%243 : memref<1x128xf32, #tpu.memory_space<vmem>>) target_semaphore(%245 : memref<!tpu.dma_semaphore, #tpu.memory_space<semaphore_mem>>)
      %c1_i32_173 = arith.constant 1 : i32
      %246 = arith.addi %237, %c1_i32_173 : i32
      %247 = arith.index_cast %246 : i32 to index
      %248 = memref.load %arg2[%247] : memref<32xi32, #tpu.memory_space<smem>>
      %c1_i32_174 = arith.constant 1 : i32
      %249 = tpu.memref_slice %arg4[%248, %1] : memref<64x128xf32, #tpu.memory_space<any>> -> memref<1x128xf32, #tpu.memory_space<any>>
      %c1_i32_175 = arith.constant 1 : i32
      %c0_i32_176 = arith.constant 0 : i32
      %250 = tpu.memref_slice %arg7[%22, %c1_i32_174, %c1_i32_175, %c0_i32_176] : memref<2x8x4x128xf32, #tpu.memory_space<vmem>> -> memref<1x1x1x128xf32, #tpu.memory_space<vmem>>
      %251 = tpu.memref_squeeze %250 : memref<1x1x1x128xf32, #tpu.memory_space<vmem>> -> memref<1x128xf32, #tpu.memory_space<vmem>>
      %252 = tpu.memref_slice %arg9[%22] : memref<2x!tpu.dma_semaphore, #tpu.memory_space<semaphore_mem>> -> memref<1x!tpu.dma_semaphore, #tpu.memory_space<semaphore_mem>>
      %253 = tpu.memref_squeeze %252 : memref<1x!tpu.dma_semaphore, #tpu.memory_space<semaphore_mem>> -> memref<!tpu.dma_semaphore, #tpu.memory_space<semaphore_mem>>
      tpu.enqueue_dma source(%249 : memref<1x128xf32, #tpu.memory_space<any>>) target(%251 : memref<1x128xf32, #tpu.memory_space<vmem>>) target_semaphore(%253 : memref<!tpu.dma_semaphore, #tpu.memory_space<semaphore_mem>>)
      %c2_i32_177 = arith.constant 2 : i32
      %254 = arith.addi %237, %c2_i32_177 : i32
      %255 = arith.index_cast %254 : i32 to index
      %256 = memref.load %arg2[%255] : memref<32xi32, #tpu.memory_space<smem>>
      %c1_i32_178 = arith.constant 1 : i32
      %257 = tpu.memref_slice %arg4[%256, %1] : memref<64x128xf32, #tpu.memory_space<any>> -> memref<1x128xf32, #tpu.memory_space<any>>
      %c2_i32_179 = arith.constant 2 : i32
      %c0_i32_180 = arith.constant 0 : i32
      %258 = tpu.memref_slice %arg7[%22, %c1_i32_178, %c2_i32_179, %c0_i32_180] : memref<2x8x4x128xf32, #tpu.memory_space<vmem>> -> memref<1x1x1x128xf32, #tpu.memory_space<vmem>>
      %259 = tpu.memref_squeeze %258 : memref<1x1x1x128xf32, #tpu.memory_space<vmem>> -> memref<1x128xf32, #tpu.memory_space<vmem>>
      %260 = tpu.memref_slice %arg9[%22] : memref<2x!tpu.dma_semaphore, #tpu.memory_space<semaphore_mem>> -> memref<1x!tpu.dma_semaphore, #tpu.memory_space<semaphore_mem>>
      %261 = tpu.memref_squeeze %260 : memref<1x!tpu.dma_semaphore, #tpu.memory_space<semaphore_mem>> -> memref<!tpu.dma_semaphore, #tpu.memory_space<semaphore_mem>>
      tpu.enqueue_dma source(%257 : memref<1x128xf32, #tpu.memory_space<any>>) target(%259 : memref<1x128xf32, #tpu.memory_space<vmem>>) target_semaphore(%261 : memref<!tpu.dma_semaphore, #tpu.memory_space<semaphore_mem>>)
      %c3_i32_181 = arith.constant 3 : i32
      %262 = arith.addi %237, %c3_i32_181 : i32
      %263 = arith.index_cast %262 : i32 to index
      %264 = memref.load %arg2[%263] : memref<32xi32, #tpu.memory_space<smem>>
      %c1_i32_182 = arith.constant 1 : i32
      %265 = tpu.memref_slice %arg4[%264, %1] : memref<64x128xf32, #tpu.memory_space<any>> -> memref<1x128xf32, #tpu.memory_space<any>>
      %c3_i32_183 = arith.constant 3 : i32
      %c0_i32_184 = arith.constant 0 : i32
      %266 = tpu.memref_slice %arg7[%22, %c1_i32_182, %c3_i32_183, %c0_i32_184] : memref<2x8x4x128xf32, #tpu.memory_space<vmem>> -> memref<1x1x1x128xf32, #tpu.memory_space<vmem>>
      %267 = tpu.memref_squeeze %266 : memref<1x1x1x128xf32, #tpu.memory_space<vmem>> -> memref<1x128xf32, #tpu.memory_space<vmem>>
      %268 = tpu.memref_slice %arg9[%22] : memref<2x!tpu.dma_semaphore, #tpu.memory_space<semaphore_mem>> -> memref<1x!tpu.dma_semaphore, #tpu.memory_space<semaphore_mem>>
      %269 = tpu.memref_squeeze %268 : memref<1x!tpu.dma_semaphore, #tpu.memory_space<semaphore_mem>> -> memref<!tpu.dma_semaphore, #tpu.memory_space<semaphore_mem>>
      tpu.enqueue_dma source(%265 : memref<1x128xf32, #tpu.memory_space<any>>) target(%267 : memref<1x128xf32, #tpu.memory_space<vmem>>) target_semaphore(%269 : memref<!tpu.dma_semaphore, #tpu.memory_space<semaphore_mem>>)
      %c32_i32_185 = arith.constant 32 : i32
      %270 = arith.muli %201, %c32_i32_185 : i32
      %c8_i32 = arith.constant 8 : i32
      %271 = arith.addi %270, %c8_i32 : i32
      %c0_i32_186 = arith.constant 0 : i32
      %272 = arith.addi %271, %c0_i32_186 : i32
      %273 = arith.index_cast %272 : i32 to index
      %274 = memref.load %arg2[%273] : memref<32xi32, #tpu.memory_space<smem>>
      %c2_i32_187 = arith.constant 2 : i32
      %275 = tpu.memref_slice %arg4[%274, %1] : memref<64x128xf32, #tpu.memory_space<any>> -> memref<1x128xf32, #tpu.memory_space<any>>
      %c0_i32_188 = arith.constant 0 : i32
      %c0_i32_189 = arith.constant 0 : i32
      %276 = tpu.memref_slice %arg7[%22, %c2_i32_187, %c0_i32_188, %c0_i32_189] : memref<2x8x4x128xf32, #tpu.memory_space<vmem>> -> memref<1x1x1x128xf32, #tpu.memory_space<vmem>>
      %277 = tpu.memref_squeeze %276 : memref<1x1x1x128xf32, #tpu.memory_space<vmem>> -> memref<1x128xf32, #tpu.memory_space<vmem>>
      %278 = tpu.memref_slice %arg9[%22] : memref<2x!tpu.dma_semaphore, #tpu.memory_space<semaphore_mem>> -> memref<1x!tpu.dma_semaphore, #tpu.memory_space<semaphore_mem>>
      %279 = tpu.memref_squeeze %278 : memref<1x!tpu.dma_semaphore, #tpu.memory_space<semaphore_mem>> -> memref<!tpu.dma_semaphore, #tpu.memory_space<semaphore_mem>>
      tpu.enqueue_dma source(%275 : memref<1x128xf32, #tpu.memory_space<any>>) target(%277 : memref<1x128xf32, #tpu.memory_space<vmem>>) target_semaphore(%279 : memref<!tpu.dma_semaphore, #tpu.memory_space<semaphore_mem>>)
      %c1_i32_190 = arith.constant 1 : i32
      %280 = arith.addi %271, %c1_i32_190 : i32
      %281 = arith.index_cast %280 : i32 to index
      %282 = memref.load %arg2[%281] : memref<32xi32, #tpu.memory_space<smem>>
      %c2_i32_191 = arith.constant 2 : i32
      %283 = tpu.memref_slice %arg4[%282, %1] : memref<64x128xf32, #tpu.memory_space<any>> -> memref<1x128xf32, #tpu.memory_space<any>>
      %c1_i32_192 = arith.constant 1 : i32
      %c0_i32_193 = arith.constant 0 : i32
      %284 = tpu.memref_slice %arg7[%22, %c2_i32_191, %c1_i32_192, %c0_i32_193] : memref<2x8x4x128xf32, #tpu.memory_space<vmem>> -> memref<1x1x1x128xf32, #tpu.memory_space<vmem>>
      %285 = tpu.memref_squeeze %284 : memref<1x1x1x128xf32, #tpu.memory_space<vmem>> -> memref<1x128xf32, #tpu.memory_space<vmem>>
      %286 = tpu.memref_slice %arg9[%22] : memref<2x!tpu.dma_semaphore, #tpu.memory_space<semaphore_mem>> -> memref<1x!tpu.dma_semaphore, #tpu.memory_space<semaphore_mem>>
      %287 = tpu.memref_squeeze %286 : memref<1x!tpu.dma_semaphore, #tpu.memory_space<semaphore_mem>> -> memref<!tpu.dma_semaphore, #tpu.memory_space<semaphore_mem>>
      tpu.enqueue_dma source(%283 : memref<1x128xf32, #tpu.memory_space<any>>) target(%285 : memref<1x128xf32, #tpu.memory_space<vmem>>) target_semaphore(%287 : memref<!tpu.dma_semaphore, #tpu.memory_space<semaphore_mem>>)
      %c2_i32_194 = arith.constant 2 : i32
      %288 = arith.addi %271, %c2_i32_194 : i32
      %289 = arith.index_cast %288 : i32 to index
      %290 = memref.load %arg2[%289] : memref<32xi32, #tpu.memory_space<smem>>
      %c2_i32_195 = arith.constant 2 : i32
      %291 = tpu.memref_slice %arg4[%290, %1] : memref<64x128xf32, #tpu.memory_space<any>> -> memref<1x128xf32, #tpu.memory_space<any>>
      %c2_i32_196 = arith.constant 2 : i32
      %c0_i32_197 = arith.constant 0 : i32
      %292 = tpu.memref_slice %arg7[%22, %c2_i32_195, %c2_i32_196, %c0_i32_197] : memref<2x8x4x128xf32, #tpu.memory_space<vmem>> -> memref<1x1x1x128xf32, #tpu.memory_space<vmem>>
      %293 = tpu.memref_squeeze %292 : memref<1x1x1x128xf32, #tpu.memory_space<vmem>> -> memref<1x128xf32, #tpu.memory_space<vmem>>
      %294 = tpu.memref_slice %arg9[%22] : memref<2x!tpu.dma_semaphore, #tpu.memory_space<semaphore_mem>> -> memref<1x!tpu.dma_semaphore, #tpu.memory_space<semaphore_mem>>
      %295 = tpu.memref_squeeze %294 : memref<1x!tpu.dma_semaphore, #tpu.memory_space<semaphore_mem>> -> memref<!tpu.dma_semaphore, #tpu.memory_space<semaphore_mem>>
      tpu.enqueue_dma source(%291 : memref<1x128xf32, #tpu.memory_space<any>>) target(%293 : memref<1x128xf32, #tpu.memory_space<vmem>>) target_semaphore(%295 : memref<!tpu.dma_semaphore, #tpu.memory_space<semaphore_mem>>)
      %c3_i32_198 = arith.constant 3 : i32
      %296 = arith.addi %271, %c3_i32_198 : i32
      %297 = arith.index_cast %296 : i32 to index
      %298 = memref.load %arg2[%297] : memref<32xi32, #tpu.memory_space<smem>>
      %c2_i32_199 = arith.constant 2 : i32
      %299 = tpu.memref_slice %arg4[%298, %1] : memref<64x128xf32, #tpu.memory_space<any>> -> memref<1x128xf32, #tpu.memory_space<any>>
      %c3_i32_200 = arith.constant 3 : i32
      %c0_i32_201 = arith.constant 0 : i32
      %300 = tpu.memref_slice %arg7[%22, %c2_i32_199, %c3_i32_200, %c0_i32_201] : memref<2x8x4x128xf32, #tpu.memory_space<vmem>> -> memref<1x1x1x128xf32, #tpu.memory_space<vmem>>
      %301 = tpu.memref_squeeze %300 : memref<1x1x1x128xf32, #tpu.memory_space<vmem>> -> memref<1x128xf32, #tpu.memory_space<vmem>>
      %302 = tpu.memref_slice %arg9[%22] : memref<2x!tpu.dma_semaphore, #tpu.memory_space<semaphore_mem>> -> memref<1x!tpu.dma_semaphore, #tpu.memory_space<semaphore_mem>>
      %303 = tpu.memref_squeeze %302 : memref<1x!tpu.dma_semaphore, #tpu.memory_space<semaphore_mem>> -> memref<!tpu.dma_semaphore, #tpu.memory_space<semaphore_mem>>
      tpu.enqueue_dma source(%299 : memref<1x128xf32, #tpu.memory_space<any>>) target(%301 : memref<1x128xf32, #tpu.memory_space<vmem>>) target_semaphore(%303 : memref<!tpu.dma_semaphore, #tpu.memory_space<semaphore_mem>>)
      %c32_i32_202 = arith.constant 32 : i32
      %304 = arith.muli %201, %c32_i32_202 : i32
      %c12_i32 = arith.constant 12 : i32
      %305 = arith.addi %304, %c12_i32 : i32
      %c0_i32_203 = arith.constant 0 : i32
      %306 = arith.addi %305, %c0_i32_203 : i32
      %307 = arith.index_cast %306 : i32 to index
      %308 = memref.load %arg2[%307] : memref<32xi32, #tpu.memory_space<smem>>
      %c3_i32_204 = arith.constant 3 : i32
      %309 = tpu.memref_slice %arg4[%308, %1] : memref<64x128xf32, #tpu.memory_space<any>> -> memref<1x128xf32, #tpu.memory_space<any>>
      %c0_i32_205 = arith.constant 0 : i32
      %c0_i32_206 = arith.constant 0 : i32
      %310 = tpu.memref_slice %arg7[%22, %c3_i32_204, %c0_i32_205, %c0_i32_206] : memref<2x8x4x128xf32, #tpu.memory_space<vmem>> -> memref<1x1x1x128xf32, #tpu.memory_space<vmem>>
      %311 = tpu.memref_squeeze %310 : memref<1x1x1x128xf32, #tpu.memory_space<vmem>> -> memref<1x128xf32, #tpu.memory_space<vmem>>
      %312 = tpu.memref_slice %arg9[%22] : memref<2x!tpu.dma_semaphore, #tpu.memory_space<semaphore_mem>> -> memref<1x!tpu.dma_semaphore, #tpu.memory_space<semaphore_mem>>
      %313 = tpu.memref_squeeze %312 : memref<1x!tpu.dma_semaphore, #tpu.memory_space<semaphore_mem>> -> memref<!tpu.dma_semaphore, #tpu.memory_space<semaphore_mem>>
      tpu.enqueue_dma source(%309 : memref<1x128xf32, #tpu.memory_space<any>>) target(%311 : memref<1x128xf32, #tpu.memory_space<vmem>>) target_semaphore(%313 : memref<!tpu.dma_semaphore, #tpu.memory_space<semaphore_mem>>)
      %c1_i32_207 = arith.constant 1 : i32
      %314 = arith.addi %305, %c1_i32_207 : i32
      %315 = arith.index_cast %314 : i32 to index
      %316 = memref.load %arg2[%315] : memref<32xi32, #tpu.memory_space<smem>>
      %c3_i32_208 = arith.constant 3 : i32
      %317 = tpu.memref_slice %arg4[%316, %1] : memref<64x128xf32, #tpu.memory_space<any>> -> memref<1x128xf32, #tpu.memory_space<any>>
      %c1_i32_209 = arith.constant 1 : i32
      %c0_i32_210 = arith.constant 0 : i32
      %318 = tpu.memref_slice %arg7[%22, %c3_i32_208, %c1_i32_209, %c0_i32_210] : memref<2x8x4x128xf32, #tpu.memory_space<vmem>> -> memref<1x1x1x128xf32, #tpu.memory_space<vmem>>
      %319 = tpu.memref_squeeze %318 : memref<1x1x1x128xf32, #tpu.memory_space<vmem>> -> memref<1x128xf32, #tpu.memory_space<vmem>>
      %320 = tpu.memref_slice %arg9[%22] : memref<2x!tpu.dma_semaphore, #tpu.memory_space<semaphore_mem>> -> memref<1x!tpu.dma_semaphore, #tpu.memory_space<semaphore_mem>>
      %321 = tpu.memref_squeeze %320 : memref<1x!tpu.dma_semaphore, #tpu.memory_space<semaphore_mem>> -> memref<!tpu.dma_semaphore, #tpu.memory_space<semaphore_mem>>
      tpu.enqueue_dma source(%317 : memref<1x128xf32, #tpu.memory_space<any>>) target(%319 : memref<1x128xf32, #tpu.memory_space<vmem>>) target_semaphore(%321 : memref<!tpu.dma_semaphore, #tpu.memory_space<semaphore_mem>>)
      %c2_i32_211 = arith.constant 2 : i32
      %322 = arith.addi %305, %c2_i32_211 : i32
      %323 = arith.index_cast %322 : i32 to index
      %324 = memref.load %arg2[%323] : memref<32xi32, #tpu.memory_space<smem>>
      %c3_i32_212 = arith.constant 3 : i32
      %325 = tpu.memref_slice %arg4[%324, %1] : memref<64x128xf32, #tpu.memory_space<any>> -> memref<1x128xf32, #tpu.memory_space<any>>
      %c2_i32_213 = arith.constant 2 : i32
      %c0_i32_214 = arith.constant 0 : i32
      %326 = tpu.memref_slice %arg7[%22, %c3_i32_212, %c2_i32_213, %c0_i32_214] : memref<2x8x4x128xf32, #tpu.memory_space<vmem>> -> memref<1x1x1x128xf32, #tpu.memory_space<vmem>>
      %327 = tpu.memref_squeeze %326 : memref<1x1x1x128xf32, #tpu.memory_space<vmem>> -> memref<1x128xf32, #tpu.memory_space<vmem>>
      %328 = tpu.memref_slice %arg9[%22] : memref<2x!tpu.dma_semaphore, #tpu.memory_space<semaphore_mem>> -> memref<1x!tpu.dma_semaphore, #tpu.memory_space<semaphore_mem>>
      %329 = tpu.memref_squeeze %328 : memref<1x!tpu.dma_semaphore, #tpu.memory_space<semaphore_mem>> -> memref<!tpu.dma_semaphore, #tpu.memory_space<semaphore_mem>>
      tpu.enqueue_dma source(%325 : memref<1x128xf32, #tpu.memory_space<any>>) target(%327 : memref<1x128xf32, #tpu.memory_space<vmem>>) target_semaphore(%329 : memref<!tpu.dma_semaphore, #tpu.memory_space<semaphore_mem>>)
      %c3_i32_215 = arith.constant 3 : i32
      %330 = arith.addi %305, %c3_i32_215 : i32
      %331 = arith.index_cast %330 : i32 to index
      %332 = memref.load %arg2[%331] : memref<32xi32, #tpu.memory_space<smem>>
      %c3_i32_216 = arith.constant 3 : i32
      %333 = tpu.memref_slice %arg4[%332, %1] : memref<64x128xf32, #tpu.memory_space<any>> -> memref<1x128xf32, #tpu.memory_space<any>>
      %c3_i32_217 = arith.constant 3 : i32
      %c0_i32_218 = arith.constant 0 : i32
      %334 = tpu.memref_slice %arg7[%22, %c3_i32_216, %c3_i32_217, %c0_i32_218] : memref<2x8x4x128xf32, #tpu.memory_space<vmem>> -> memref<1x1x1x128xf32, #tpu.memory_space<vmem>>
      %335 = tpu.memref_squeeze %334 : memref<1x1x1x128xf32, #tpu.memory_space<vmem>> -> memref<1x128xf32, #tpu.memory_space<vmem>>
      %336 = tpu.memref_slice %arg9[%22] : memref<2x!tpu.dma_semaphore, #tpu.memory_space<semaphore_mem>> -> memref<1x!tpu.dma_semaphore, #tpu.memory_space<semaphore_mem>>
      %337 = tpu.memref_squeeze %336 : memref<1x!tpu.dma_semaphore, #tpu.memory_space<semaphore_mem>> -> memref<!tpu.dma_semaphore, #tpu.memory_space<semaphore_mem>>
      tpu.enqueue_dma source(%333 : memref<1x128xf32, #tpu.memory_space<any>>) target(%335 : memref<1x128xf32, #tpu.memory_space<vmem>>) target_semaphore(%337 : memref<!tpu.dma_semaphore, #tpu.memory_space<semaphore_mem>>)
      %c32_i32_219 = arith.constant 32 : i32
      %338 = arith.muli %201, %c32_i32_219 : i32
      %c16_i32 = arith.constant 16 : i32
      %339 = arith.addi %338, %c16_i32 : i32
      %c0_i32_220 = arith.constant 0 : i32
      %340 = arith.addi %339, %c0_i32_220 : i32
      %341 = arith.index_cast %340 : i32 to index
      %342 = memref.load %arg2[%341] : memref<32xi32, #tpu.memory_space<smem>>
      %c4_i32_221 = arith.constant 4 : i32
      %343 = tpu.memref_slice %arg4[%342, %1] : memref<64x128xf32, #tpu.memory_space<any>> -> memref<1x128xf32, #tpu.memory_space<any>>
      %c0_i32_222 = arith.constant 0 : i32
      %c0_i32_223 = arith.constant 0 : i32
      %344 = tpu.memref_slice %arg7[%22, %c4_i32_221, %c0_i32_222, %c0_i32_223] : memref<2x8x4x128xf32, #tpu.memory_space<vmem>> -> memref<1x1x1x128xf32, #tpu.memory_space<vmem>>
      %345 = tpu.memref_squeeze %344 : memref<1x1x1x128xf32, #tpu.memory_space<vmem>> -> memref<1x128xf32, #tpu.memory_space<vmem>>
      %346 = tpu.memref_slice %arg9[%22] : memref<2x!tpu.dma_semaphore, #tpu.memory_space<semaphore_mem>> -> memref<1x!tpu.dma_semaphore, #tpu.memory_space<semaphore_mem>>
      %347 = tpu.memref_squeeze %346 : memref<1x!tpu.dma_semaphore, #tpu.memory_space<semaphore_mem>> -> memref<!tpu.dma_semaphore, #tpu.memory_space<semaphore_mem>>
      tpu.enqueue_dma source(%343 : memref<1x128xf32, #tpu.memory_space<any>>) target(%345 : memref<1x128xf32, #tpu.memory_space<vmem>>) target_semaphore(%347 : memref<!tpu.dma_semaphore, #tpu.memory_space<semaphore_mem>>)
      %c1_i32_224 = arith.constant 1 : i32
      %348 = arith.addi %339, %c1_i32_224 : i32
      %349 = arith.index_cast %348 : i32 to index
      %350 = memref.load %arg2[%349] : memref<32xi32, #tpu.memory_space<smem>>
      %c4_i32_225 = arith.constant 4 : i32
      %351 = tpu.memref_slice %arg4[%350, %1] : memref<64x128xf32, #tpu.memory_space<any>> -> memref<1x128xf32, #tpu.memory_space<any>>
      %c1_i32_226 = arith.constant 1 : i32
      %c0_i32_227 = arith.constant 0 : i32
      %352 = tpu.memref_slice %arg7[%22, %c4_i32_225, %c1_i32_226, %c0_i32_227] : memref<2x8x4x128xf32, #tpu.memory_space<vmem>> -> memref<1x1x1x128xf32, #tpu.memory_space<vmem>>
      %353 = tpu.memref_squeeze %352 : memref<1x1x1x128xf32, #tpu.memory_space<vmem>> -> memref<1x128xf32, #tpu.memory_space<vmem>>
      %354 = tpu.memref_slice %arg9[%22] : memref<2x!tpu.dma_semaphore, #tpu.memory_space<semaphore_mem>> -> memref<1x!tpu.dma_semaphore, #tpu.memory_space<semaphore_mem>>
      %355 = tpu.memref_squeeze %354 : memref<1x!tpu.dma_semaphore, #tpu.memory_space<semaphore_mem>> -> memref<!tpu.dma_semaphore, #tpu.memory_space<semaphore_mem>>
      tpu.enqueue_dma source(%351 : memref<1x128xf32, #tpu.memory_space<any>>) target(%353 : memref<1x128xf32, #tpu.memory_space<vmem>>) target_semaphore(%355 : memref<!tpu.dma_semaphore, #tpu.memory_space<semaphore_mem>>)
      %c2_i32_228 = arith.constant 2 : i32
      %356 = arith.addi %339, %c2_i32_228 : i32
      %357 = arith.index_cast %356 : i32 to index
      %358 = memref.load %arg2[%357] : memref<32xi32, #tpu.memory_space<smem>>
      %c4_i32_229 = arith.constant 4 : i32
      %359 = tpu.memref_slice %arg4[%358, %1] : memref<64x128xf32, #tpu.memory_space<any>> -> memref<1x128xf32, #tpu.memory_space<any>>
      %c2_i32_230 = arith.constant 2 : i32
      %c0_i32_231 = arith.constant 0 : i32
      %360 = tpu.memref_slice %arg7[%22, %c4_i32_229, %c2_i32_230, %c0_i32_231] : memref<2x8x4x128xf32, #tpu.memory_space<vmem>> -> memref<1x1x1x128xf32, #tpu.memory_space<vmem>>
      %361 = tpu.memref_squeeze %360 : memref<1x1x1x128xf32, #tpu.memory_space<vmem>> -> memref<1x128xf32, #tpu.memory_space<vmem>>
      %362 = tpu.memref_slice %arg9[%22] : memref<2x!tpu.dma_semaphore, #tpu.memory_space<semaphore_mem>> -> memref<1x!tpu.dma_semaphore, #tpu.memory_space<semaphore_mem>>
      %363 = tpu.memref_squeeze %362 : memref<1x!tpu.dma_semaphore, #tpu.memory_space<semaphore_mem>> -> memref<!tpu.dma_semaphore, #tpu.memory_space<semaphore_mem>>
      tpu.enqueue_dma source(%359 : memref<1x128xf32, #tpu.memory_space<any>>) target(%361 : memref<1x128xf32, #tpu.memory_space<vmem>>) target_semaphore(%363 : memref<!tpu.dma_semaphore, #tpu.memory_space<semaphore_mem>>)
      %c3_i32_232 = arith.constant 3 : i32
      %364 = arith.addi %339, %c3_i32_232 : i32
      %365 = arith.index_cast %364 : i32 to index
      %366 = memref.load %arg2[%365] : memref<32xi32, #tpu.memory_space<smem>>
      %c4_i32_233 = arith.constant 4 : i32
      %367 = tpu.memref_slice %arg4[%366, %1] : memref<64x128xf32, #tpu.memory_space<any>> -> memref<1x128xf32, #tpu.memory_space<any>>
      %c3_i32_234 = arith.constant 3 : i32
      %c0_i32_235 = arith.constant 0 : i32
      %368 = tpu.memref_slice %arg7[%22, %c4_i32_233, %c3_i32_234, %c0_i32_235] : memref<2x8x4x128xf32, #tpu.memory_space<vmem>> -> memref<1x1x1x128xf32, #tpu.memory_space<vmem>>
      %369 = tpu.memref_squeeze %368 : memref<1x1x1x128xf32, #tpu.memory_space<vmem>> -> memref<1x128xf32, #tpu.memory_space<vmem>>
      %370 = tpu.memref_slice %arg9[%22] : memref<2x!tpu.dma_semaphore, #tpu.memory_space<semaphore_mem>> -> memref<1x!tpu.dma_semaphore, #tpu.memory_space<semaphore_mem>>
      %371 = tpu.memref_squeeze %370 : memref<1x!tpu.dma_semaphore, #tpu.memory_space<semaphore_mem>> -> memref<!tpu.dma_semaphore, #tpu.memory_space<semaphore_mem>>
      tpu.enqueue_dma source(%367 : memref<1x128xf32, #tpu.memory_space<any>>) target(%369 : memref<1x128xf32, #tpu.memory_space<vmem>>) target_semaphore(%371 : memref<!tpu.dma_semaphore, #tpu.memory_space<semaphore_mem>>)
      %c32_i32_236 = arith.constant 32 : i32
      %372 = arith.muli %201, %c32_i32_236 : i32
      %c20_i32 = arith.constant 20 : i32
      %373 = arith.addi %372, %c20_i32 : i32
      %c0_i32_237 = arith.constant 0 : i32
      %374 = arith.addi %373, %c0_i32_237 : i32
      %375 = arith.index_cast %374 : i32 to index
      %376 = memref.load %arg2[%375] : memref<32xi32, #tpu.memory_space<smem>>
      %c5_i32_238 = arith.constant 5 : i32
      %377 = tpu.memref_slice %arg4[%376, %1] : memref<64x128xf32, #tpu.memory_space<any>> -> memref<1x128xf32, #tpu.memory_space<any>>
      %c0_i32_239 = arith.constant 0 : i32
      %c0_i32_240 = arith.constant 0 : i32
      %378 = tpu.memref_slice %arg7[%22, %c5_i32_238, %c0_i32_239, %c0_i32_240] : memref<2x8x4x128xf32, #tpu.memory_space<vmem>> -> memref<1x1x1x128xf32, #tpu.memory_space<vmem>>
      %379 = tpu.memref_squeeze %378 : memref<1x1x1x128xf32, #tpu.memory_space<vmem>> -> memref<1x128xf32, #tpu.memory_space<vmem>>
      %380 = tpu.memref_slice %arg9[%22] : memref<2x!tpu.dma_semaphore, #tpu.memory_space<semaphore_mem>> -> memref<1x!tpu.dma_semaphore, #tpu.memory_space<semaphore_mem>>
      %381 = tpu.memref_squeeze %380 : memref<1x!tpu.dma_semaphore, #tpu.memory_space<semaphore_mem>> -> memref<!tpu.dma_semaphore, #tpu.memory_space<semaphore_mem>>
      tpu.enqueue_dma source(%377 : memref<1x128xf32, #tpu.memory_space<any>>) target(%379 : memref<1x128xf32, #tpu.memory_space<vmem>>) target_semaphore(%381 : memref<!tpu.dma_semaphore, #tpu.memory_space<semaphore_mem>>)
      %c1_i32_241 = arith.constant 1 : i32
      %382 = arith.addi %373, %c1_i32_241 : i32
      %383 = arith.index_cast %382 : i32 to index
      %384 = memref.load %arg2[%383] : memref<32xi32, #tpu.memory_space<smem>>
      %c5_i32_242 = arith.constant 5 : i32
      %385 = tpu.memref_slice %arg4[%384, %1] : memref<64x128xf32, #tpu.memory_space<any>> -> memref<1x128xf32, #tpu.memory_space<any>>
      %c1_i32_243 = arith.constant 1 : i32
      %c0_i32_244 = arith.constant 0 : i32
      %386 = tpu.memref_slice %arg7[%22, %c5_i32_242, %c1_i32_243, %c0_i32_244] : memref<2x8x4x128xf32, #tpu.memory_space<vmem>> -> memref<1x1x1x128xf32, #tpu.memory_space<vmem>>
      %387 = tpu.memref_squeeze %386 : memref<1x1x1x128xf32, #tpu.memory_space<vmem>> -> memref<1x128xf32, #tpu.memory_space<vmem>>
      %388 = tpu.memref_slice %arg9[%22] : memref<2x!tpu.dma_semaphore, #tpu.memory_space<semaphore_mem>> -> memref<1x!tpu.dma_semaphore, #tpu.memory_space<semaphore_mem>>
      %389 = tpu.memref_squeeze %388 : memref<1x!tpu.dma_semaphore, #tpu.memory_space<semaphore_mem>> -> memref<!tpu.dma_semaphore, #tpu.memory_space<semaphore_mem>>
      tpu.enqueue_dma source(%385 : memref<1x128xf32, #tpu.memory_space<any>>) target(%387 : memref<1x128xf32, #tpu.memory_space<vmem>>) target_semaphore(%389 : memref<!tpu.dma_semaphore, #tpu.memory_space<semaphore_mem>>)
      %c2_i32_245 = arith.constant 2 : i32
      %390 = arith.addi %373, %c2_i32_245 : i32
      %391 = arith.index_cast %390 : i32 to index
      %392 = memref.load %arg2[%391] : memref<32xi32, #tpu.memory_space<smem>>
      %c5_i32_246 = arith.constant 5 : i32
      %393 = tpu.memref_slice %arg4[%392, %1] : memref<64x128xf32, #tpu.memory_space<any>> -> memref<1x128xf32, #tpu.memory_space<any>>
      %c2_i32_247 = arith.constant 2 : i32
      %c0_i32_248 = arith.constant 0 : i32
      %394 = tpu.memref_slice %arg7[%22, %c5_i32_246, %c2_i32_247, %c0_i32_248] : memref<2x8x4x128xf32, #tpu.memory_space<vmem>> -> memref<1x1x1x128xf32, #tpu.memory_space<vmem>>
      %395 = tpu.memref_squeeze %394 : memref<1x1x1x128xf32, #tpu.memory_space<vmem>> -> memref<1x128xf32, #tpu.memory_space<vmem>>
      %396 = tpu.memref_slice %arg9[%22] : memref<2x!tpu.dma_semaphore, #tpu.memory_space<semaphore_mem>> -> memref<1x!tpu.dma_semaphore, #tpu.memory_space<semaphore_mem>>
      %397 = tpu.memref_squeeze %396 : memref<1x!tpu.dma_semaphore, #tpu.memory_space<semaphore_mem>> -> memref<!tpu.dma_semaphore, #tpu.memory_space<semaphore_mem>>
      tpu.enqueue_dma source(%393 : memref<1x128xf32, #tpu.memory_space<any>>) target(%395 : memref<1x128xf32, #tpu.memory_space<vmem>>) target_semaphore(%397 : memref<!tpu.dma_semaphore, #tpu.memory_space<semaphore_mem>>)
      %c3_i32_249 = arith.constant 3 : i32
      %398 = arith.addi %373, %c3_i32_249 : i32
      %399 = arith.index_cast %398 : i32 to index
      %400 = memref.load %arg2[%399] : memref<32xi32, #tpu.memory_space<smem>>
      %c5_i32_250 = arith.constant 5 : i32
      %401 = tpu.memref_slice %arg4[%400, %1] : memref<64x128xf32, #tpu.memory_space<any>> -> memref<1x128xf32, #tpu.memory_space<any>>
      %c3_i32_251 = arith.constant 3 : i32
      %c0_i32_252 = arith.constant 0 : i32
      %402 = tpu.memref_slice %arg7[%22, %c5_i32_250, %c3_i32_251, %c0_i32_252] : memref<2x8x4x128xf32, #tpu.memory_space<vmem>> -> memref<1x1x1x128xf32, #tpu.memory_space<vmem>>
      %403 = tpu.memref_squeeze %402 : memref<1x1x1x128xf32, #tpu.memory_space<vmem>> -> memref<1x128xf32, #tpu.memory_space<vmem>>
      %404 = tpu.memref_slice %arg9[%22] : memref<2x!tpu.dma_semaphore, #tpu.memory_space<semaphore_mem>> -> memref<1x!tpu.dma_semaphore, #tpu.memory_space<semaphore_mem>>
      %405 = tpu.memref_squeeze %404 : memref<1x!tpu.dma_semaphore, #tpu.memory_space<semaphore_mem>> -> memref<!tpu.dma_semaphore, #tpu.memory_space<semaphore_mem>>
      tpu.enqueue_dma source(%401 : memref<1x128xf32, #tpu.memory_space<any>>) target(%403 : memref<1x128xf32, #tpu.memory_space<vmem>>) target_semaphore(%405 : memref<!tpu.dma_semaphore, #tpu.memory_space<semaphore_mem>>)
      %c32_i32_253 = arith.constant 32 : i32
      %406 = arith.muli %201, %c32_i32_253 : i32
      %c24_i32 = arith.constant 24 : i32
      %407 = arith.addi %406, %c24_i32 : i32
      %c0_i32_254 = arith.constant 0 : i32
      %408 = arith.addi %407, %c0_i32_254 : i32
      %409 = arith.index_cast %408 : i32 to index
      %410 = memref.load %arg2[%409] : memref<32xi32, #tpu.memory_space<smem>>
      %c6_i32_255 = arith.constant 6 : i32
      %411 = tpu.memref_slice %arg4[%410, %1] : memref<64x128xf32, #tpu.memory_space<any>> -> memref<1x128xf32, #tpu.memory_space<any>>
      %c0_i32_256 = arith.constant 0 : i32
      %c0_i32_257 = arith.constant 0 : i32
      %412 = tpu.memref_slice %arg7[%22, %c6_i32_255, %c0_i32_256, %c0_i32_257] : memref<2x8x4x128xf32, #tpu.memory_space<vmem>> -> memref<1x1x1x128xf32, #tpu.memory_space<vmem>>
      %413 = tpu.memref_squeeze %412 : memref<1x1x1x128xf32, #tpu.memory_space<vmem>> -> memref<1x128xf32, #tpu.memory_space<vmem>>
      %414 = tpu.memref_slice %arg9[%22] : memref<2x!tpu.dma_semaphore, #tpu.memory_space<semaphore_mem>> -> memref<1x!tpu.dma_semaphore, #tpu.memory_space<semaphore_mem>>
      %415 = tpu.memref_squeeze %414 : memref<1x!tpu.dma_semaphore, #tpu.memory_space<semaphore_mem>> -> memref<!tpu.dma_semaphore, #tpu.memory_space<semaphore_mem>>
      tpu.enqueue_dma source(%411 : memref<1x128xf32, #tpu.memory_space<any>>) target(%413 : memref<1x128xf32, #tpu.memory_space<vmem>>) target_semaphore(%415 : memref<!tpu.dma_semaphore, #tpu.memory_space<semaphore_mem>>)
      %c1_i32_258 = arith.constant 1 : i32
      %416 = arith.addi %407, %c1_i32_258 : i32
      %417 = arith.index_cast %416 : i32 to index
      %418 = memref.load %arg2[%417] : memref<32xi32, #tpu.memory_space<smem>>
      %c6_i32_259 = arith.constant 6 : i32
      %419 = tpu.memref_slice %arg4[%418, %1] : memref<64x128xf32, #tpu.memory_space<any>> -> memref<1x128xf32, #tpu.memory_space<any>>
      %c1_i32_260 = arith.constant 1 : i32
      %c0_i32_261 = arith.constant 0 : i32
      %420 = tpu.memref_slice %arg7[%22, %c6_i32_259, %c1_i32_260, %c0_i32_261] : memref<2x8x4x128xf32, #tpu.memory_space<vmem>> -> memref<1x1x1x128xf32, #tpu.memory_space<vmem>>
      %421 = tpu.memref_squeeze %420 : memref<1x1x1x128xf32, #tpu.memory_space<vmem>> -> memref<1x128xf32, #tpu.memory_space<vmem>>
      %422 = tpu.memref_slice %arg9[%22] : memref<2x!tpu.dma_semaphore, #tpu.memory_space<semaphore_mem>> -> memref<1x!tpu.dma_semaphore, #tpu.memory_space<semaphore_mem>>
      %423 = tpu.memref_squeeze %422 : memref<1x!tpu.dma_semaphore, #tpu.memory_space<semaphore_mem>> -> memref<!tpu.dma_semaphore, #tpu.memory_space<semaphore_mem>>
      tpu.enqueue_dma source(%419 : memref<1x128xf32, #tpu.memory_space<any>>) target(%421 : memref<1x128xf32, #tpu.memory_space<vmem>>) target_semaphore(%423 : memref<!tpu.dma_semaphore, #tpu.memory_space<semaphore_mem>>)
      %c2_i32_262 = arith.constant 2 : i32
      %424 = arith.addi %407, %c2_i32_262 : i32
      %425 = arith.index_cast %424 : i32 to index
      %426 = memref.load %arg2[%425] : memref<32xi32, #tpu.memory_space<smem>>
      %c6_i32_263 = arith.constant 6 : i32
      %427 = tpu.memref_slice %arg4[%426, %1] : memref<64x128xf32, #tpu.memory_space<any>> -> memref<1x128xf32, #tpu.memory_space<any>>
      %c2_i32_264 = arith.constant 2 : i32
      %c0_i32_265 = arith.constant 0 : i32
      %428 = tpu.memref_slice %arg7[%22, %c6_i32_263, %c2_i32_264, %c0_i32_265] : memref<2x8x4x128xf32, #tpu.memory_space<vmem>> -> memref<1x1x1x128xf32, #tpu.memory_space<vmem>>
      %429 = tpu.memref_squeeze %428 : memref<1x1x1x128xf32, #tpu.memory_space<vmem>> -> memref<1x128xf32, #tpu.memory_space<vmem>>
      %430 = tpu.memref_slice %arg9[%22] : memref<2x!tpu.dma_semaphore, #tpu.memory_space<semaphore_mem>> -> memref<1x!tpu.dma_semaphore, #tpu.memory_space<semaphore_mem>>
      %431 = tpu.memref_squeeze %430 : memref<1x!tpu.dma_semaphore, #tpu.memory_space<semaphore_mem>> -> memref<!tpu.dma_semaphore, #tpu.memory_space<semaphore_mem>>
      tpu.enqueue_dma source(%427 : memref<1x128xf32, #tpu.memory_space<any>>) target(%429 : memref<1x128xf32, #tpu.memory_space<vmem>>) target_semaphore(%431 : memref<!tpu.dma_semaphore, #tpu.memory_space<semaphore_mem>>)
      %c3_i32_266 = arith.constant 3 : i32
      %432 = arith.addi %407, %c3_i32_266 : i32
      %433 = arith.index_cast %432 : i32 to index
      %434 = memref.load %arg2[%433] : memref<32xi32, #tpu.memory_space<smem>>
      %c6_i32_267 = arith.constant 6 : i32
      %435 = tpu.memref_slice %arg4[%434, %1] : memref<64x128xf32, #tpu.memory_space<any>> -> memref<1x128xf32, #tpu.memory_space<any>>
      %c3_i32_268 = arith.constant 3 : i32
      %c0_i32_269 = arith.constant 0 : i32
      %436 = tpu.memref_slice %arg7[%22, %c6_i32_267, %c3_i32_268, %c0_i32_269] : memref<2x8x4x128xf32, #tpu.memory_space<vmem>> -> memref<1x1x1x128xf32, #tpu.memory_space<vmem>>
      %437 = tpu.memref_squeeze %436 : memref<1x1x1x128xf32, #tpu.memory_space<vmem>> -> memref<1x128xf32, #tpu.memory_space<vmem>>
      %438 = tpu.memref_slice %arg9[%22] : memref<2x!tpu.dma_semaphore, #tpu.memory_space<semaphore_mem>> -> memref<1x!tpu.dma_semaphore, #tpu.memory_space<semaphore_mem>>
      %439 = tpu.memref_squeeze %438 : memref<1x!tpu.dma_semaphore, #tpu.memory_space<semaphore_mem>> -> memref<!tpu.dma_semaphore, #tpu.memory_space<semaphore_mem>>
      tpu.enqueue_dma source(%435 : memref<1x128xf32, #tpu.memory_space<any>>) target(%437 : memref<1x128xf32, #tpu.memory_space<vmem>>) target_semaphore(%439 : memref<!tpu.dma_semaphore, #tpu.memory_space<semaphore_mem>>)
      %c32_i32_270 = arith.constant 32 : i32
      %440 = arith.muli %201, %c32_i32_270 : i32
      %c28_i32 = arith.constant 28 : i32
      %441 = arith.addi %440, %c28_i32 : i32
      %c0_i32_271 = arith.constant 0 : i32
      %442 = arith.addi %441, %c0_i32_271 : i32
      %443 = arith.index_cast %442 : i32 to index
      %444 = memref.load %arg2[%443] : memref<32xi32, #tpu.memory_space<smem>>
      %c7_i32_272 = arith.constant 7 : i32
      %445 = tpu.memref_slice %arg4[%444, %1] : memref<64x128xf32, #tpu.memory_space<any>> -> memref<1x128xf32, #tpu.memory_space<any>>
      %c0_i32_273 = arith.constant 0 : i32
      %c0_i32_274 = arith.constant 0 : i32
      %446 = tpu.memref_slice %arg7[%22, %c7_i32_272, %c0_i32_273, %c0_i32_274] : memref<2x8x4x128xf32, #tpu.memory_space<vmem>> -> memref<1x1x1x128xf32, #tpu.memory_space<vmem>>
      %447 = tpu.memref_squeeze %446 : memref<1x1x1x128xf32, #tpu.memory_space<vmem>> -> memref<1x128xf32, #tpu.memory_space<vmem>>
      %448 = tpu.memref_slice %arg9[%22] : memref<2x!tpu.dma_semaphore, #tpu.memory_space<semaphore_mem>> -> memref<1x!tpu.dma_semaphore, #tpu.memory_space<semaphore_mem>>
      %449 = tpu.memref_squeeze %448 : memref<1x!tpu.dma_semaphore, #tpu.memory_space<semaphore_mem>> -> memref<!tpu.dma_semaphore, #tpu.memory_space<semaphore_mem>>
      tpu.enqueue_dma source(%445 : memref<1x128xf32, #tpu.memory_space<any>>) target(%447 : memref<1x128xf32, #tpu.memory_space<vmem>>) target_semaphore(%449 : memref<!tpu.dma_semaphore, #tpu.memory_space<semaphore_mem>>)
      %c1_i32_275 = arith.constant 1 : i32
      %450 = arith.addi %441, %c1_i32_275 : i32
      %451 = arith.index_cast %450 : i32 to index
      %452 = memref.load %arg2[%451] : memref<32xi32, #tpu.memory_space<smem>>
      %c7_i32_276 = arith.constant 7 : i32
      %453 = tpu.memref_slice %arg4[%452, %1] : memref<64x128xf32, #tpu.memory_space<any>> -> memref<1x128xf32, #tpu.memory_space<any>>
      %c1_i32_277 = arith.constant 1 : i32
      %c0_i32_278 = arith.constant 0 : i32
      %454 = tpu.memref_slice %arg7[%22, %c7_i32_276, %c1_i32_277, %c0_i32_278] : memref<2x8x4x128xf32, #tpu.memory_space<vmem>> -> memref<1x1x1x128xf32, #tpu.memory_space<vmem>>
      %455 = tpu.memref_squeeze %454 : memref<1x1x1x128xf32, #tpu.memory_space<vmem>> -> memref<1x128xf32, #tpu.memory_space<vmem>>
      %456 = tpu.memref_slice %arg9[%22] : memref<2x!tpu.dma_semaphore, #tpu.memory_space<semaphore_mem>> -> memref<1x!tpu.dma_semaphore, #tpu.memory_space<semaphore_mem>>
      %457 = tpu.memref_squeeze %456 : memref<1x!tpu.dma_semaphore, #tpu.memory_space<semaphore_mem>> -> memref<!tpu.dma_semaphore, #tpu.memory_space<semaphore_mem>>
      tpu.enqueue_dma source(%453 : memref<1x128xf32, #tpu.memory_space<any>>) target(%455 : memref<1x128xf32, #tpu.memory_space<vmem>>) target_semaphore(%457 : memref<!tpu.dma_semaphore, #tpu.memory_space<semaphore_mem>>)
      %c2_i32_279 = arith.constant 2 : i32
      %458 = arith.addi %441, %c2_i32_279 : i32
      %459 = arith.index_cast %458 : i32 to index
      %460 = memref.load %arg2[%459] : memref<32xi32, #tpu.memory_space<smem>>
      %c7_i32_280 = arith.constant 7 : i32
      %461 = tpu.memref_slice %arg4[%460, %1] : memref<64x128xf32, #tpu.memory_space<any>> -> memref<1x128xf32, #tpu.memory_space<any>>
      %c2_i32_281 = arith.constant 2 : i32
      %c0_i32_282 = arith.constant 0 : i32
      %462 = tpu.memref_slice %arg7[%22, %c7_i32_280, %c2_i32_281, %c0_i32_282] : memref<2x8x4x128xf32, #tpu.memory_space<vmem>> -> memref<1x1x1x128xf32, #tpu.memory_space<vmem>>
      %463 = tpu.memref_squeeze %462 : memref<1x1x1x128xf32, #tpu.memory_space<vmem>> -> memref<1x128xf32, #tpu.memory_space<vmem>>
      %464 = tpu.memref_slice %arg9[%22] : memref<2x!tpu.dma_semaphore, #tpu.memory_space<semaphore_mem>> -> memref<1x!tpu.dma_semaphore, #tpu.memory_space<semaphore_mem>>
      %465 = tpu.memref_squeeze %464 : memref<1x!tpu.dma_semaphore, #tpu.memory_space<semaphore_mem>> -> memref<!tpu.dma_semaphore, #tpu.memory_space<semaphore_mem>>
      tpu.enqueue_dma source(%461 : memref<1x128xf32, #tpu.memory_space<any>>) target(%463 : memref<1x128xf32, #tpu.memory_space<vmem>>) target_semaphore(%465 : memref<!tpu.dma_semaphore, #tpu.memory_space<semaphore_mem>>)
      %c3_i32_283 = arith.constant 3 : i32
      %466 = arith.addi %441, %c3_i32_283 : i32
      %467 = arith.index_cast %466 : i32 to index
      %468 = memref.load %arg2[%467] : memref<32xi32, #tpu.memory_space<smem>>
      %c7_i32_284 = arith.constant 7 : i32
      %469 = tpu.memref_slice %arg4[%468, %1] : memref<64x128xf32, #tpu.memory_space<any>> -> memref<1x128xf32, #tpu.memory_space<any>>
      %c3_i32_285 = arith.constant 3 : i32
      %c0_i32_286 = arith.constant 0 : i32
      %470 = tpu.memref_slice %arg7[%22, %c7_i32_284, %c3_i32_285, %c0_i32_286] : memref<2x8x4x128xf32, #tpu.memory_space<vmem>> -> memref<1x1x1x128xf32, #tpu.memory_space<vmem>>
      %471 = tpu.memref_squeeze %470 : memref<1x1x1x128xf32, #tpu.memory_space<vmem>> -> memref<1x128xf32, #tpu.memory_space<vmem>>
      %472 = tpu.memref_slice %arg9[%22] : memref<2x!tpu.dma_semaphore, #tpu.memory_space<semaphore_mem>> -> memref<1x!tpu.dma_semaphore, #tpu.memory_space<semaphore_mem>>
      %473 = tpu.memref_squeeze %472 : memref<1x!tpu.dma_semaphore, #tpu.memory_space<semaphore_mem>> -> memref<!tpu.dma_semaphore, #tpu.memory_space<semaphore_mem>>
      tpu.enqueue_dma source(%469 : memref<1x128xf32, #tpu.memory_space<any>>) target(%471 : memref<1x128xf32, #tpu.memory_space<vmem>>) target_semaphore(%473 : memref<!tpu.dma_semaphore, #tpu.memory_space<semaphore_mem>>)
    } else {
    }
    %c0_i32_15 = arith.constant 0 : i32
    %c0_i32_16 = arith.constant 0 : i32
    %30 = tpu.memref_slice %arg4[%c0_i32_16, %1] : memref<64x128xf32, #tpu.memory_space<any>> -> memref<1x128xf32, #tpu.memory_space<any>>
    %c0_i32_17 = arith.constant 0 : i32
    %c0_i32_18 = arith.constant 0 : i32
    %31 = tpu.memref_slice %arg7[%11, %c0_i32_15, %c0_i32_17, %c0_i32_18] : memref<2x8x4x128xf32, #tpu.memory_space<vmem>> -> memref<1x1x1x128xf32, #tpu.memory_space<vmem>>
    %32 = tpu.memref_squeeze %31 : memref<1x1x1x128xf32, #tpu.memory_space<vmem>> -> memref<1x128xf32, #tpu.memory_space<vmem>>
    %33 = tpu.memref_slice %arg9[%11] : memref<2x!tpu.dma_semaphore, #tpu.memory_space<semaphore_mem>> -> memref<1x!tpu.dma_semaphore, #tpu.memory_space<semaphore_mem>>
    %34 = tpu.memref_squeeze %33 : memref<1x!tpu.dma_semaphore, #tpu.memory_space<semaphore_mem>> -> memref<!tpu.dma_semaphore, #tpu.memory_space<semaphore_mem>>
    tpu.wait_dma2 semaphore(%34 : memref<!tpu.dma_semaphore, #tpu.memory_space<semaphore_mem>>) src(%30 : memref<1x128xf32, #tpu.memory_space<any>>) dst(%32 : memref<1x128xf32, #tpu.memory_space<vmem>>)
    %c0_i32_19 = arith.constant 0 : i32
    %c0_i32_20 = arith.constant 0 : i32
    %35 = tpu.memref_slice %arg4[%c0_i32_20, %1] : memref<64x128xf32, #tpu.memory_space<any>> -> memref<1x128xf32, #tpu.memory_space<any>>
    %c1_i32_21 = arith.constant 1 : i32
    %c0_i32_22 = arith.constant 0 : i32
    %36 = tpu.memref_slice %arg7[%11, %c0_i32_19, %c1_i32_21, %c0_i32_22] : memref<2x8x4x128xf32, #tpu.memory_space<vmem>> -> memref<1x1x1x128xf32, #tpu.memory_space<vmem>>
    %37 = tpu.memref_squeeze %36 : memref<1x1x1x128xf32, #tpu.memory_space<vmem>> -> memref<1x128xf32, #tpu.memory_space<vmem>>
    %38 = tpu.memref_slice %arg9[%11] : memref<2x!tpu.dma_semaphore, #tpu.memory_space<semaphore_mem>> -> memref<1x!tpu.dma_semaphore, #tpu.memory_space<semaphore_mem>>
    %39 = tpu.memref_squeeze %38 : memref<1x!tpu.dma_semaphore, #tpu.memory_space<semaphore_mem>> -> memref<!tpu.dma_semaphore, #tpu.memory_space<semaphore_mem>>
    tpu.wait_dma2 semaphore(%39 : memref<!tpu.dma_semaphore, #tpu.memory_space<semaphore_mem>>) src(%35 : memref<1x128xf32, #tpu.memory_space<any>>) dst(%37 : memref<1x128xf32, #tpu.memory_space<vmem>>)
    %c0_i32_23 = arith.constant 0 : i32
    %c0_i32_24 = arith.constant 0 : i32
    %40 = tpu.memref_slice %arg4[%c0_i32_24, %1] : memref<64x128xf32, #tpu.memory_space<any>> -> memref<1x128xf32, #tpu.memory_space<any>>
    %c2_i32_25 = arith.constant 2 : i32
    %c0_i32_26 = arith.constant 0 : i32
    %41 = tpu.memref_slice %arg7[%11, %c0_i32_23, %c2_i32_25, %c0_i32_26] : memref<2x8x4x128xf32, #tpu.memory_space<vmem>> -> memref<1x1x1x128xf32, #tpu.memory_space<vmem>>
    %42 = tpu.memref_squeeze %41 : memref<1x1x1x128xf32, #tpu.memory_space<vmem>> -> memref<1x128xf32, #tpu.memory_space<vmem>>
    %43 = tpu.memref_slice %arg9[%11] : memref<2x!tpu.dma_semaphore, #tpu.memory_space<semaphore_mem>> -> memref<1x!tpu.dma_semaphore, #tpu.memory_space<semaphore_mem>>
    %44 = tpu.memref_squeeze %43 : memref<1x!tpu.dma_semaphore, #tpu.memory_space<semaphore_mem>> -> memref<!tpu.dma_semaphore, #tpu.memory_space<semaphore_mem>>
    tpu.wait_dma2 semaphore(%44 : memref<!tpu.dma_semaphore, #tpu.memory_space<semaphore_mem>>) src(%40 : memref<1x128xf32, #tpu.memory_space<any>>) dst(%42 : memref<1x128xf32, #tpu.memory_space<vmem>>)
    %c0_i32_27 = arith.constant 0 : i32
    %c0_i32_28 = arith.constant 0 : i32
    %45 = tpu.memref_slice %arg4[%c0_i32_28, %1] : memref<64x128xf32, #tpu.memory_space<any>> -> memref<1x128xf32, #tpu.memory_space<any>>
    %c3_i32 = arith.constant 3 : i32
    %c0_i32_29 = arith.constant 0 : i32
    %46 = tpu.memref_slice %arg7[%11, %c0_i32_27, %c3_i32, %c0_i32_29] : memref<2x8x4x128xf32, #tpu.memory_space<vmem>> -> memref<1x1x1x128xf32, #tpu.memory_space<vmem>>
    %47 = tpu.memref_squeeze %46 : memref<1x1x1x128xf32, #tpu.memory_space<vmem>> -> memref<1x128xf32, #tpu.memory_space<vmem>>
    %48 = tpu.memref_slice %arg9[%11] : memref<2x!tpu.dma_semaphore, #tpu.memory_space<semaphore_mem>> -> memref<1x!tpu.dma_semaphore, #tpu.memory_space<semaphore_mem>>
    %49 = tpu.memref_squeeze %48 : memref<1x!tpu.dma_semaphore, #tpu.memory_space<semaphore_mem>> -> memref<!tpu.dma_semaphore, #tpu.memory_space<semaphore_mem>>
    tpu.wait_dma2 semaphore(%49 : memref<!tpu.dma_semaphore, #tpu.memory_space<semaphore_mem>>) src(%45 : memref<1x128xf32, #tpu.memory_space<any>>) dst(%47 : memref<1x128xf32, #tpu.memory_space<vmem>>)
    %c1_i32_30 = arith.constant 1 : i32
    %c0_i32_31 = arith.constant 0 : i32
    %50 = tpu.memref_slice %arg4[%c0_i32_31, %1] : memref<64x128xf32, #tpu.memory_space<any>> -> memref<1x128xf32, #tpu.memory_space<any>>
    %c0_i32_32 = arith.constant 0 : i32
    %c0_i32_33 = arith.constant 0 : i32
    %51 = tpu.memref_slice %arg7[%11, %c1_i32_30, %c0_i32_32, %c0_i32_33] : memref<2x8x4x128xf32, #tpu.memory_space<vmem>> -> memref<1x1x1x128xf32, #tpu.memory_space<vmem>>
    %52 = tpu.memref_squeeze %51 : memref<1x1x1x128xf32, #tpu.memory_space<vmem>> -> memref<1x128xf32, #tpu.memory_space<vmem>>
    %53 = tpu.memref_slice %arg9[%11] : memref<2x!tpu.dma_semaphore, #tpu.memory_space<semaphore_mem>> -> memref<1x!tpu.dma_semaphore, #tpu.memory_space<semaphore_mem>>
    %54 = tpu.memref_squeeze %53 : memref<1x!tpu.dma_semaphore, #tpu.memory_space<semaphore_mem>> -> memref<!tpu.dma_semaphore, #tpu.memory_space<semaphore_mem>>
    tpu.wait_dma2 semaphore(%54 : memref<!tpu.dma_semaphore, #tpu.memory_space<semaphore_mem>>) src(%50 : memref<1x128xf32, #tpu.memory_space<any>>) dst(%52 : memref<1x128xf32, #tpu.memory_space<vmem>>)
    %c1_i32_34 = arith.constant 1 : i32
    %c0_i32_35 = arith.constant 0 : i32
    %55 = tpu.memref_slice %arg4[%c0_i32_35, %1] : memref<64x128xf32, #tpu.memory_space<any>> -> memref<1x128xf32, #tpu.memory_space<any>>
    %c1_i32_36 = arith.constant 1 : i32
    %c0_i32_37 = arith.constant 0 : i32
    %56 = tpu.memref_slice %arg7[%11, %c1_i32_34, %c1_i32_36, %c0_i32_37] : memref<2x8x4x128xf32, #tpu.memory_space<vmem>> -> memref<1x1x1x128xf32, #tpu.memory_space<vmem>>
    %57 = tpu.memref_squeeze %56 : memref<1x1x1x128xf32, #tpu.memory_space<vmem>> -> memref<1x128xf32, #tpu.memory_space<vmem>>
    %58 = tpu.memref_slice %arg9[%11] : memref<2x!tpu.dma_semaphore, #tpu.memory_space<semaphore_mem>> -> memref<1x!tpu.dma_semaphore, #tpu.memory_space<semaphore_mem>>
    %59 = tpu.memref_squeeze %58 : memref<1x!tpu.dma_semaphore, #tpu.memory_space<semaphore_mem>> -> memref<!tpu.dma_semaphore, #tpu.memory_space<semaphore_mem>>
    tpu.wait_dma2 semaphore(%59 : memref<!tpu.dma_semaphore, #tpu.memory_space<semaphore_mem>>) src(%55 : memref<1x128xf32, #tpu.memory_space<any>>) dst(%57 : memref<1x128xf32, #tpu.memory_space<vmem>>)
    %c1_i32_38 = arith.constant 1 : i32
    %c0_i32_39 = arith.constant 0 : i32
    %60 = tpu.memref_slice %arg4[%c0_i32_39, %1] : memref<64x128xf32, #tpu.memory_space<any>> -> memref<1x128xf32, #tpu.memory_space<any>>
    %c2_i32_40 = arith.constant 2 : i32
    %c0_i32_41 = arith.constant 0 : i32
    %61 = tpu.memref_slice %arg7[%11, %c1_i32_38, %c2_i32_40, %c0_i32_41] : memref<2x8x4x128xf32, #tpu.memory_space<vmem>> -> memref<1x1x1x128xf32, #tpu.memory_space<vmem>>
    %62 = tpu.memref_squeeze %61 : memref<1x1x1x128xf32, #tpu.memory_space<vmem>> -> memref<1x128xf32, #tpu.memory_space<vmem>>
    %63 = tpu.memref_slice %arg9[%11] : memref<2x!tpu.dma_semaphore, #tpu.memory_space<semaphore_mem>> -> memref<1x!tpu.dma_semaphore, #tpu.memory_space<semaphore_mem>>
    %64 = tpu.memref_squeeze %63 : memref<1x!tpu.dma_semaphore, #tpu.memory_space<semaphore_mem>> -> memref<!tpu.dma_semaphore, #tpu.memory_space<semaphore_mem>>
    tpu.wait_dma2 semaphore(%64 : memref<!tpu.dma_semaphore, #tpu.memory_space<semaphore_mem>>) src(%60 : memref<1x128xf32, #tpu.memory_space<any>>) dst(%62 : memref<1x128xf32, #tpu.memory_space<vmem>>)
    %c1_i32_42 = arith.constant 1 : i32
    %c0_i32_43 = arith.constant 0 : i32
    %65 = tpu.memref_slice %arg4[%c0_i32_43, %1] : memref<64x128xf32, #tpu.memory_space<any>> -> memref<1x128xf32, #tpu.memory_space<any>>
    %c3_i32_44 = arith.constant 3 : i32
    %c0_i32_45 = arith.constant 0 : i32
    %66 = tpu.memref_slice %arg7[%11, %c1_i32_42, %c3_i32_44, %c0_i32_45] : memref<2x8x4x128xf32, #tpu.memory_space<vmem>> -> memref<1x1x1x128xf32, #tpu.memory_space<vmem>>
    %67 = tpu.memref_squeeze %66 : memref<1x1x1x128xf32, #tpu.memory_space<vmem>> -> memref<1x128xf32, #tpu.memory_space<vmem>>
    %68 = tpu.memref_slice %arg9[%11] : memref<2x!tpu.dma_semaphore, #tpu.memory_space<semaphore_mem>> -> memref<1x!tpu.dma_semaphore, #tpu.memory_space<semaphore_mem>>
    %69 = tpu.memref_squeeze %68 : memref<1x!tpu.dma_semaphore, #tpu.memory_space<semaphore_mem>> -> memref<!tpu.dma_semaphore, #tpu.memory_space<semaphore_mem>>
    tpu.wait_dma2 semaphore(%69 : memref<!tpu.dma_semaphore, #tpu.memory_space<semaphore_mem>>) src(%65 : memref<1x128xf32, #tpu.memory_space<any>>) dst(%67 : memref<1x128xf32, #tpu.memory_space<vmem>>)
    %c2_i32_46 = arith.constant 2 : i32
    %c0_i32_47 = arith.constant 0 : i32
    %70 = tpu.memref_slice %arg4[%c0_i32_47, %1] : memref<64x128xf32, #tpu.memory_space<any>> -> memref<1x128xf32, #tpu.memory_space<any>>
    %c0_i32_48 = arith.constant 0 : i32
    %c0_i32_49 = arith.constant 0 : i32
    %71 = tpu.memref_slice %arg7[%11, %c2_i32_46, %c0_i32_48, %c0_i32_49] : memref<2x8x4x128xf32, #tpu.memory_space<vmem>> -> memref<1x1x1x128xf32, #tpu.memory_space<vmem>>
    %72 = tpu.memref_squeeze %71 : memref<1x1x1x128xf32, #tpu.memory_space<vmem>> -> memref<1x128xf32, #tpu.memory_space<vmem>>
    %73 = tpu.memref_slice %arg9[%11] : memref<2x!tpu.dma_semaphore, #tpu.memory_space<semaphore_mem>> -> memref<1x!tpu.dma_semaphore, #tpu.memory_space<semaphore_mem>>
    %74 = tpu.memref_squeeze %73 : memref<1x!tpu.dma_semaphore, #tpu.memory_space<semaphore_mem>> -> memref<!tpu.dma_semaphore, #tpu.memory_space<semaphore_mem>>
    tpu.wait_dma2 semaphore(%74 : memref<!tpu.dma_semaphore, #tpu.memory_space<semaphore_mem>>) src(%70 : memref<1x128xf32, #tpu.memory_space<any>>) dst(%72 : memref<1x128xf32, #tpu.memory_space<vmem>>)
    %c2_i32_50 = arith.constant 2 : i32
    %c0_i32_51 = arith.constant 0 : i32
    %75 = tpu.memref_slice %arg4[%c0_i32_51, %1] : memref<64x128xf32, #tpu.memory_space<any>> -> memref<1x128xf32, #tpu.memory_space<any>>
    %c1_i32_52 = arith.constant 1 : i32
    %c0_i32_53 = arith.constant 0 : i32
    %76 = tpu.memref_slice %arg7[%11, %c2_i32_50, %c1_i32_52, %c0_i32_53] : memref<2x8x4x128xf32, #tpu.memory_space<vmem>> -> memref<1x1x1x128xf32, #tpu.memory_space<vmem>>
    %77 = tpu.memref_squeeze %76 : memref<1x1x1x128xf32, #tpu.memory_space<vmem>> -> memref<1x128xf32, #tpu.memory_space<vmem>>
    %78 = tpu.memref_slice %arg9[%11] : memref<2x!tpu.dma_semaphore, #tpu.memory_space<semaphore_mem>> -> memref<1x!tpu.dma_semaphore, #tpu.memory_space<semaphore_mem>>
    %79 = tpu.memref_squeeze %78 : memref<1x!tpu.dma_semaphore, #tpu.memory_space<semaphore_mem>> -> memref<!tpu.dma_semaphore, #tpu.memory_space<semaphore_mem>>
    tpu.wait_dma2 semaphore(%79 : memref<!tpu.dma_semaphore, #tpu.memory_space<semaphore_mem>>) src(%75 : memref<1x128xf32, #tpu.memory_space<any>>) dst(%77 : memref<1x128xf32, #tpu.memory_space<vmem>>)
    %c2_i32_54 = arith.constant 2 : i32
    %c0_i32_55 = arith.constant 0 : i32
    %80 = tpu.memref_slice %arg4[%c0_i32_55, %1] : memref<64x128xf32, #tpu.memory_space<any>> -> memref<1x128xf32, #tpu.memory_space<any>>
    %c2_i32_56 = arith.constant 2 : i32
    %c0_i32_57 = arith.constant 0 : i32
    %81 = tpu.memref_slice %arg7[%11, %c2_i32_54, %c2_i32_56, %c0_i32_57] : memref<2x8x4x128xf32, #tpu.memory_space<vmem>> -> memref<1x1x1x128xf32, #tpu.memory_space<vmem>>
    %82 = tpu.memref_squeeze %81 : memref<1x1x1x128xf32, #tpu.memory_space<vmem>> -> memref<1x128xf32, #tpu.memory_space<vmem>>
    %83 = tpu.memref_slice %arg9[%11] : memref<2x!tpu.dma_semaphore, #tpu.memory_space<semaphore_mem>> -> memref<1x!tpu.dma_semaphore, #tpu.memory_space<semaphore_mem>>
    %84 = tpu.memref_squeeze %83 : memref<1x!tpu.dma_semaphore, #tpu.memory_space<semaphore_mem>> -> memref<!tpu.dma_semaphore, #tpu.memory_space<semaphore_mem>>
    tpu.wait_dma2 semaphore(%84 : memref<!tpu.dma_semaphore, #tpu.memory_space<semaphore_mem>>) src(%80 : memref<1x128xf32, #tpu.memory_space<any>>) dst(%82 : memref<1x128xf32, #tpu.memory_space<vmem>>)
    %c2_i32_58 = arith.constant 2 : i32
    %c0_i32_59 = arith.constant 0 : i32
    %85 = tpu.memref_slice %arg4[%c0_i32_59, %1] : memref<64x128xf32, #tpu.memory_space<any>> -> memref<1x128xf32, #tpu.memory_space<any>>
    %c3_i32_60 = arith.constant 3 : i32
    %c0_i32_61 = arith.constant 0 : i32
    %86 = tpu.memref_slice %arg7[%11, %c2_i32_58, %c3_i32_60, %c0_i32_61] : memref<2x8x4x128xf32, #tpu.memory_space<vmem>> -> memref<1x1x1x128xf32, #tpu.memory_space<vmem>>
    %87 = tpu.memref_squeeze %86 : memref<1x1x1x128xf32, #tpu.memory_space<vmem>> -> memref<1x128xf32, #tpu.memory_space<vmem>>
    %88 = tpu.memref_slice %arg9[%11] : memref<2x!tpu.dma_semaphore, #tpu.memory_space<semaphore_mem>> -> memref<1x!tpu.dma_semaphore, #tpu.memory_space<semaphore_mem>>
    %89 = tpu.memref_squeeze %88 : memref<1x!tpu.dma_semaphore, #tpu.memory_space<semaphore_mem>> -> memref<!tpu.dma_semaphore, #tpu.memory_space<semaphore_mem>>
    tpu.wait_dma2 semaphore(%89 : memref<!tpu.dma_semaphore, #tpu.memory_space<semaphore_mem>>) src(%85 : memref<1x128xf32, #tpu.memory_space<any>>) dst(%87 : memref<1x128xf32, #tpu.memory_space<vmem>>)
    %c3_i32_62 = arith.constant 3 : i32
    %c0_i32_63 = arith.constant 0 : i32
    %90 = tpu.memref_slice %arg4[%c0_i32_63, %1] : memref<64x128xf32, #tpu.memory_space<any>> -> memref<1x128xf32, #tpu.memory_space<any>>
    %c0_i32_64 = arith.constant 0 : i32
    %c0_i32_65 = arith.constant 0 : i32
    %91 = tpu.memref_slice %arg7[%11, %c3_i32_62, %c0_i32_64, %c0_i32_65] : memref<2x8x4x128xf32, #tpu.memory_space<vmem>> -> memref<1x1x1x128xf32, #tpu.memory_space<vmem>>
    %92 = tpu.memref_squeeze %91 : memref<1x1x1x128xf32, #tpu.memory_space<vmem>> -> memref<1x128xf32, #tpu.memory_space<vmem>>
    %93 = tpu.memref_slice %arg9[%11] : memref<2x!tpu.dma_semaphore, #tpu.memory_space<semaphore_mem>> -> memref<1x!tpu.dma_semaphore, #tpu.memory_space<semaphore_mem>>
    %94 = tpu.memref_squeeze %93 : memref<1x!tpu.dma_semaphore, #tpu.memory_space<semaphore_mem>> -> memref<!tpu.dma_semaphore, #tpu.memory_space<semaphore_mem>>
    tpu.wait_dma2 semaphore(%94 : memref<!tpu.dma_semaphore, #tpu.memory_space<semaphore_mem>>) src(%90 : memref<1x128xf32, #tpu.memory_space<any>>) dst(%92 : memref<1x128xf32, #tpu.memory_space<vmem>>)
    %c3_i32_66 = arith.constant 3 : i32
    %c0_i32_67 = arith.constant 0 : i32
    %95 = tpu.memref_slice %arg4[%c0_i32_67, %1] : memref<64x128xf32, #tpu.memory_space<any>> -> memref<1x128xf32, #tpu.memory_space<any>>
    %c1_i32_68 = arith.constant 1 : i32
    %c0_i32_69 = arith.constant 0 : i32
    %96 = tpu.memref_slice %arg7[%11, %c3_i32_66, %c1_i32_68, %c0_i32_69] : memref<2x8x4x128xf32, #tpu.memory_space<vmem>> -> memref<1x1x1x128xf32, #tpu.memory_space<vmem>>
    %97 = tpu.memref_squeeze %96 : memref<1x1x1x128xf32, #tpu.memory_space<vmem>> -> memref<1x128xf32, #tpu.memory_space<vmem>>
    %98 = tpu.memref_slice %arg9[%11] : memref<2x!tpu.dma_semaphore, #tpu.memory_space<semaphore_mem>> -> memref<1x!tpu.dma_semaphore, #tpu.memory_space<semaphore_mem>>
    %99 = tpu.memref_squeeze %98 : memref<1x!tpu.dma_semaphore, #tpu.memory_space<semaphore_mem>> -> memref<!tpu.dma_semaphore, #tpu.memory_space<semaphore_mem>>
    tpu.wait_dma2 semaphore(%99 : memref<!tpu.dma_semaphore, #tpu.memory_space<semaphore_mem>>) src(%95 : memref<1x128xf32, #tpu.memory_space<any>>) dst(%97 : memref<1x128xf32, #tpu.memory_space<vmem>>)
    %c3_i32_70 = arith.constant 3 : i32
    %c0_i32_71 = arith.constant 0 : i32
    %100 = tpu.memref_slice %arg4[%c0_i32_71, %1] : memref<64x128xf32, #tpu.memory_space<any>> -> memref<1x128xf32, #tpu.memory_space<any>>
    %c2_i32_72 = arith.constant 2 : i32
    %c0_i32_73 = arith.constant 0 : i32
    %101 = tpu.memref_slice %arg7[%11, %c3_i32_70, %c2_i32_72, %c0_i32_73] : memref<2x8x4x128xf32, #tpu.memory_space<vmem>> -> memref<1x1x1x128xf32, #tpu.memory_space<vmem>>
    %102 = tpu.memref_squeeze %101 : memref<1x1x1x128xf32, #tpu.memory_space<vmem>> -> memref<1x128xf32, #tpu.memory_space<vmem>>
    %103 = tpu.memref_slice %arg9[%11] : memref<2x!tpu.dma_semaphore, #tpu.memory_space<semaphore_mem>> -> memref<1x!tpu.dma_semaphore, #tpu.memory_space<semaphore_mem>>
    %104 = tpu.memref_squeeze %103 : memref<1x!tpu.dma_semaphore, #tpu.memory_space<semaphore_mem>> -> memref<!tpu.dma_semaphore, #tpu.memory_space<semaphore_mem>>
    tpu.wait_dma2 semaphore(%104 : memref<!tpu.dma_semaphore, #tpu.memory_space<semaphore_mem>>) src(%100 : memref<1x128xf32, #tpu.memory_space<any>>) dst(%102 : memref<1x128xf32, #tpu.memory_space<vmem>>)
    %c3_i32_74 = arith.constant 3 : i32
    %c0_i32_75 = arith.constant 0 : i32
    %105 = tpu.memref_slice %arg4[%c0_i32_75, %1] : memref<64x128xf32, #tpu.memory_space<any>> -> memref<1x128xf32, #tpu.memory_space<any>>
    %c3_i32_76 = arith.constant 3 : i32
    %c0_i32_77 = arith.constant 0 : i32
    %106 = tpu.memref_slice %arg7[%11, %c3_i32_74, %c3_i32_76, %c0_i32_77] : memref<2x8x4x128xf32, #tpu.memory_space<vmem>> -> memref<1x1x1x128xf32, #tpu.memory_space<vmem>>
    %107 = tpu.memref_squeeze %106 : memref<1x1x1x128xf32, #tpu.memory_space<vmem>> -> memref<1x128xf32, #tpu.memory_space<vmem>>
    %108 = tpu.memref_slice %arg9[%11] : memref<2x!tpu.dma_semaphore, #tpu.memory_space<semaphore_mem>> -> memref<1x!tpu.dma_semaphore, #tpu.memory_space<semaphore_mem>>
    %109 = tpu.memref_squeeze %108 : memref<1x!tpu.dma_semaphore, #tpu.memory_space<semaphore_mem>> -> memref<!tpu.dma_semaphore, #tpu.memory_space<semaphore_mem>>
    tpu.wait_dma2 semaphore(%109 : memref<!tpu.dma_semaphore, #tpu.memory_space<semaphore_mem>>) src(%105 : memref<1x128xf32, #tpu.memory_space<any>>) dst(%107 : memref<1x128xf32, #tpu.memory_space<vmem>>)
    %c4_i32 = arith.constant 4 : i32
    %c0_i32_78 = arith.constant 0 : i32
    %110 = tpu.memref_slice %arg4[%c0_i32_78, %1] : memref<64x128xf32, #tpu.memory_space<any>> -> memref<1x128xf32, #tpu.memory_space<any>>
    %c0_i32_79 = arith.constant 0 : i32
    %c0_i32_80 = arith.constant 0 : i32
    %111 = tpu.memref_slice %arg7[%11, %c4_i32, %c0_i32_79, %c0_i32_80] : memref<2x8x4x128xf32, #tpu.memory_space<vmem>> -> memref<1x1x1x128xf32, #tpu.memory_space<vmem>>
    %112 = tpu.memref_squeeze %111 : memref<1x1x1x128xf32, #tpu.memory_space<vmem>> -> memref<1x128xf32, #tpu.memory_space<vmem>>
    %113 = tpu.memref_slice %arg9[%11] : memref<2x!tpu.dma_semaphore, #tpu.memory_space<semaphore_mem>> -> memref<1x!tpu.dma_semaphore, #tpu.memory_space<semaphore_mem>>
    %114 = tpu.memref_squeeze %113 : memref<1x!tpu.dma_semaphore, #tpu.memory_space<semaphore_mem>> -> memref<!tpu.dma_semaphore, #tpu.memory_space<semaphore_mem>>
    tpu.wait_dma2 semaphore(%114 : memref<!tpu.dma_semaphore, #tpu.memory_space<semaphore_mem>>) src(%110 : memref<1x128xf32, #tpu.memory_space<any>>) dst(%112 : memref<1x128xf32, #tpu.memory_space<vmem>>)
    %c4_i32_81 = arith.constant 4 : i32
    %c0_i32_82 = arith.constant 0 : i32
    %115 = tpu.memref_slice %arg4[%c0_i32_82, %1] : memref<64x128xf32, #tpu.memory_space<any>> -> memref<1x128xf32, #tpu.memory_space<any>>
    %c1_i32_83 = arith.constant 1 : i32
    %c0_i32_84 = arith.constant 0 : i32
    %116 = tpu.memref_slice %arg7[%11, %c4_i32_81, %c1_i32_83, %c0_i32_84] : memref<2x8x4x128xf32, #tpu.memory_space<vmem>> -> memref<1x1x1x128xf32, #tpu.memory_space<vmem>>
    %117 = tpu.memref_squeeze %116 : memref<1x1x1x128xf32, #tpu.memory_space<vmem>> -> memref<1x128xf32, #tpu.memory_space<vmem>>
    %118 = tpu.memref_slice %arg9[%11] : memref<2x!tpu.dma_semaphore, #tpu.memory_space<semaphore_mem>> -> memref<1x!tpu.dma_semaphore, #tpu.memory_space<semaphore_mem>>
    %119 = tpu.memref_squeeze %118 : memref<1x!tpu.dma_semaphore, #tpu.memory_space<semaphore_mem>> -> memref<!tpu.dma_semaphore, #tpu.memory_space<semaphore_mem>>
    tpu.wait_dma2 semaphore(%119 : memref<!tpu.dma_semaphore, #tpu.memory_space<semaphore_mem>>) src(%115 : memref<1x128xf32, #tpu.memory_space<any>>) dst(%117 : memref<1x128xf32, #tpu.memory_space<vmem>>)
    %c4_i32_85 = arith.constant 4 : i32
    %c0_i32_86 = arith.constant 0 : i32
    %120 = tpu.memref_slice %arg4[%c0_i32_86, %1] : memref<64x128xf32, #tpu.memory_space<any>> -> memref<1x128xf32, #tpu.memory_space<any>>
    %c2_i32_87 = arith.constant 2 : i32
    %c0_i32_88 = arith.constant 0 : i32
    %121 = tpu.memref_slice %arg7[%11, %c4_i32_85, %c2_i32_87, %c0_i32_88] : memref<2x8x4x128xf32, #tpu.memory_space<vmem>> -> memref<1x1x1x128xf32, #tpu.memory_space<vmem>>
    %122 = tpu.memref_squeeze %121 : memref<1x1x1x128xf32, #tpu.memory_space<vmem>> -> memref<1x128xf32, #tpu.memory_space<vmem>>
    %123 = tpu.memref_slice %arg9[%11] : memref<2x!tpu.dma_semaphore, #tpu.memory_space<semaphore_mem>> -> memref<1x!tpu.dma_semaphore, #tpu.memory_space<semaphore_mem>>
    %124 = tpu.memref_squeeze %123 : memref<1x!tpu.dma_semaphore, #tpu.memory_space<semaphore_mem>> -> memref<!tpu.dma_semaphore, #tpu.memory_space<semaphore_mem>>
    tpu.wait_dma2 semaphore(%124 : memref<!tpu.dma_semaphore, #tpu.memory_space<semaphore_mem>>) src(%120 : memref<1x128xf32, #tpu.memory_space<any>>) dst(%122 : memref<1x128xf32, #tpu.memory_space<vmem>>)
    %c4_i32_89 = arith.constant 4 : i32
    %c0_i32_90 = arith.constant 0 : i32
    %125 = tpu.memref_slice %arg4[%c0_i32_90, %1] : memref<64x128xf32, #tpu.memory_space<any>> -> memref<1x128xf32, #tpu.memory_space<any>>
    %c3_i32_91 = arith.constant 3 : i32
    %c0_i32_92 = arith.constant 0 : i32
    %126 = tpu.memref_slice %arg7[%11, %c4_i32_89, %c3_i32_91, %c0_i32_92] : memref<2x8x4x128xf32, #tpu.memory_space<vmem>> -> memref<1x1x1x128xf32, #tpu.memory_space<vmem>>
    %127 = tpu.memref_squeeze %126 : memref<1x1x1x128xf32, #tpu.memory_space<vmem>> -> memref<1x128xf32, #tpu.memory_space<vmem>>
    %128 = tpu.memref_slice %arg9[%11] : memref<2x!tpu.dma_semaphore, #tpu.memory_space<semaphore_mem>> -> memref<1x!tpu.dma_semaphore, #tpu.memory_space<semaphore_mem>>
    %129 = tpu.memref_squeeze %128 : memref<1x!tpu.dma_semaphore, #tpu.memory_space<semaphore_mem>> -> memref<!tpu.dma_semaphore, #tpu.memory_space<semaphore_mem>>
    tpu.wait_dma2 semaphore(%129 : memref<!tpu.dma_semaphore, #tpu.memory_space<semaphore_mem>>) src(%125 : memref<1x128xf32, #tpu.memory_space<any>>) dst(%127 : memref<1x128xf32, #tpu.memory_space<vmem>>)
    %c5_i32 = arith.constant 5 : i32
    %c0_i32_93 = arith.constant 0 : i32
    %130 = tpu.memref_slice %arg4[%c0_i32_93, %1] : memref<64x128xf32, #tpu.memory_space<any>> -> memref<1x128xf32, #tpu.memory_space<any>>
    %c0_i32_94 = arith.constant 0 : i32
    %c0_i32_95 = arith.constant 0 : i32
    %131 = tpu.memref_slice %arg7[%11, %c5_i32, %c0_i32_94, %c0_i32_95] : memref<2x8x4x128xf32, #tpu.memory_space<vmem>> -> memref<1x1x1x128xf32, #tpu.memory_space<vmem>>
    %132 = tpu.memref_squeeze %131 : memref<1x1x1x128xf32, #tpu.memory_space<vmem>> -> memref<1x128xf32, #tpu.memory_space<vmem>>
    %133 = tpu.memref_slice %arg9[%11] : memref<2x!tpu.dma_semaphore, #tpu.memory_space<semaphore_mem>> -> memref<1x!tpu.dma_semaphore, #tpu.memory_space<semaphore_mem>>
    %134 = tpu.memref_squeeze %133 : memref<1x!tpu.dma_semaphore, #tpu.memory_space<semaphore_mem>> -> memref<!tpu.dma_semaphore, #tpu.memory_space<semaphore_mem>>
    tpu.wait_dma2 semaphore(%134 : memref<!tpu.dma_semaphore, #tpu.memory_space<semaphore_mem>>) src(%130 : memref<1x128xf32, #tpu.memory_space<any>>) dst(%132 : memref<1x128xf32, #tpu.memory_space<vmem>>)
    %c5_i32_96 = arith.constant 5 : i32
    %c0_i32_97 = arith.constant 0 : i32
    %135 = tpu.memref_slice %arg4[%c0_i32_97, %1] : memref<64x128xf32, #tpu.memory_space<any>> -> memref<1x128xf32, #tpu.memory_space<any>>
    %c1_i32_98 = arith.constant 1 : i32
    %c0_i32_99 = arith.constant 0 : i32
    %136 = tpu.memref_slice %arg7[%11, %c5_i32_96, %c1_i32_98, %c0_i32_99] : memref<2x8x4x128xf32, #tpu.memory_space<vmem>> -> memref<1x1x1x128xf32, #tpu.memory_space<vmem>>
    %137 = tpu.memref_squeeze %136 : memref<1x1x1x128xf32, #tpu.memory_space<vmem>> -> memref<1x128xf32, #tpu.memory_space<vmem>>
    %138 = tpu.memref_slice %arg9[%11] : memref<2x!tpu.dma_semaphore, #tpu.memory_space<semaphore_mem>> -> memref<1x!tpu.dma_semaphore, #tpu.memory_space<semaphore_mem>>
    %139 = tpu.memref_squeeze %138 : memref<1x!tpu.dma_semaphore, #tpu.memory_space<semaphore_mem>> -> memref<!tpu.dma_semaphore, #tpu.memory_space<semaphore_mem>>
    tpu.wait_dma2 semaphore(%139 : memref<!tpu.dma_semaphore, #tpu.memory_space<semaphore_mem>>) src(%135 : memref<1x128xf32, #tpu.memory_space<any>>) dst(%137 : memref<1x128xf32, #tpu.memory_space<vmem>>)
    %c5_i32_100 = arith.constant 5 : i32
    %c0_i32_101 = arith.constant 0 : i32
    %140 = tpu.memref_slice %arg4[%c0_i32_101, %1] : memref<64x128xf32, #tpu.memory_space<any>> -> memref<1x128xf32, #tpu.memory_space<any>>
    %c2_i32_102 = arith.constant 2 : i32
    %c0_i32_103 = arith.constant 0 : i32
    %141 = tpu.memref_slice %arg7[%11, %c5_i32_100, %c2_i32_102, %c0_i32_103] : memref<2x8x4x128xf32, #tpu.memory_space<vmem>> -> memref<1x1x1x128xf32, #tpu.memory_space<vmem>>
    %142 = tpu.memref_squeeze %141 : memref<1x1x1x128xf32, #tpu.memory_space<vmem>> -> memref<1x128xf32, #tpu.memory_space<vmem>>
    %143 = tpu.memref_slice %arg9[%11] : memref<2x!tpu.dma_semaphore, #tpu.memory_space<semaphore_mem>> -> memref<1x!tpu.dma_semaphore, #tpu.memory_space<semaphore_mem>>
    %144 = tpu.memref_squeeze %143 : memref<1x!tpu.dma_semaphore, #tpu.memory_space<semaphore_mem>> -> memref<!tpu.dma_semaphore, #tpu.memory_space<semaphore_mem>>
    tpu.wait_dma2 semaphore(%144 : memref<!tpu.dma_semaphore, #tpu.memory_space<semaphore_mem>>) src(%140 : memref<1x128xf32, #tpu.memory_space<any>>) dst(%142 : memref<1x128xf32, #tpu.memory_space<vmem>>)
    %c5_i32_104 = arith.constant 5 : i32
    %c0_i32_105 = arith.constant 0 : i32
    %145 = tpu.memref_slice %arg4[%c0_i32_105, %1] : memref<64x128xf32, #tpu.memory_space<any>> -> memref<1x128xf32, #tpu.memory_space<any>>
    %c3_i32_106 = arith.constant 3 : i32
    %c0_i32_107 = arith.constant 0 : i32
    %146 = tpu.memref_slice %arg7[%11, %c5_i32_104, %c3_i32_106, %c0_i32_107] : memref<2x8x4x128xf32, #tpu.memory_space<vmem>> -> memref<1x1x1x128xf32, #tpu.memory_space<vmem>>
    %147 = tpu.memref_squeeze %146 : memref<1x1x1x128xf32, #tpu.memory_space<vmem>> -> memref<1x128xf32, #tpu.memory_space<vmem>>
    %148 = tpu.memref_slice %arg9[%11] : memref<2x!tpu.dma_semaphore, #tpu.memory_space<semaphore_mem>> -> memref<1x!tpu.dma_semaphore, #tpu.memory_space<semaphore_mem>>
    %149 = tpu.memref_squeeze %148 : memref<1x!tpu.dma_semaphore, #tpu.memory_space<semaphore_mem>> -> memref<!tpu.dma_semaphore, #tpu.memory_space<semaphore_mem>>
    tpu.wait_dma2 semaphore(%149 : memref<!tpu.dma_semaphore, #tpu.memory_space<semaphore_mem>>) src(%145 : memref<1x128xf32, #tpu.memory_space<any>>) dst(%147 : memref<1x128xf32, #tpu.memory_space<vmem>>)
    %c6_i32 = arith.constant 6 : i32
    %c0_i32_108 = arith.constant 0 : i32
    %150 = tpu.memref_slice %arg4[%c0_i32_108, %1] : memref<64x128xf32, #tpu.memory_space<any>> -> memref<1x128xf32, #tpu.memory_space<any>>
    %c0_i32_109 = arith.constant 0 : i32
    %c0_i32_110 = arith.constant 0 : i32
    %151 = tpu.memref_slice %arg7[%11, %c6_i32, %c0_i32_109, %c0_i32_110] : memref<2x8x4x128xf32, #tpu.memory_space<vmem>> -> memref<1x1x1x128xf32, #tpu.memory_space<vmem>>
    %152 = tpu.memref_squeeze %151 : memref<1x1x1x128xf32, #tpu.memory_space<vmem>> -> memref<1x128xf32, #tpu.memory_space<vmem>>
    %153 = tpu.memref_slice %arg9[%11] : memref<2x!tpu.dma_semaphore, #tpu.memory_space<semaphore_mem>> -> memref<1x!tpu.dma_semaphore, #tpu.memory_space<semaphore_mem>>
    %154 = tpu.memref_squeeze %153 : memref<1x!tpu.dma_semaphore, #tpu.memory_space<semaphore_mem>> -> memref<!tpu.dma_semaphore, #tpu.memory_space<semaphore_mem>>
    tpu.wait_dma2 semaphore(%154 : memref<!tpu.dma_semaphore, #tpu.memory_space<semaphore_mem>>) src(%150 : memref<1x128xf32, #tpu.memory_space<any>>) dst(%152 : memref<1x128xf32, #tpu.memory_space<vmem>>)
    %c6_i32_111 = arith.constant 6 : i32
    %c0_i32_112 = arith.constant 0 : i32
    %155 = tpu.memref_slice %arg4[%c0_i32_112, %1] : memref<64x128xf32, #tpu.memory_space<any>> -> memref<1x128xf32, #tpu.memory_space<any>>
    %c1_i32_113 = arith.constant 1 : i32
    %c0_i32_114 = arith.constant 0 : i32
    %156 = tpu.memref_slice %arg7[%11, %c6_i32_111, %c1_i32_113, %c0_i32_114] : memref<2x8x4x128xf32, #tpu.memory_space<vmem>> -> memref<1x1x1x128xf32, #tpu.memory_space<vmem>>
    %157 = tpu.memref_squeeze %156 : memref<1x1x1x128xf32, #tpu.memory_space<vmem>> -> memref<1x128xf32, #tpu.memory_space<vmem>>
    %158 = tpu.memref_slice %arg9[%11] : memref<2x!tpu.dma_semaphore, #tpu.memory_space<semaphore_mem>> -> memref<1x!tpu.dma_semaphore, #tpu.memory_space<semaphore_mem>>
    %159 = tpu.memref_squeeze %158 : memref<1x!tpu.dma_semaphore, #tpu.memory_space<semaphore_mem>> -> memref<!tpu.dma_semaphore, #tpu.memory_space<semaphore_mem>>
    tpu.wait_dma2 semaphore(%159 : memref<!tpu.dma_semaphore, #tpu.memory_space<semaphore_mem>>) src(%155 : memref<1x128xf32, #tpu.memory_space<any>>) dst(%157 : memref<1x128xf32, #tpu.memory_space<vmem>>)
    %c6_i32_115 = arith.constant 6 : i32
    %c0_i32_116 = arith.constant 0 : i32
    %160 = tpu.memref_slice %arg4[%c0_i32_116, %1] : memref<64x128xf32, #tpu.memory_space<any>> -> memref<1x128xf32, #tpu.memory_space<any>>
    %c2_i32_117 = arith.constant 2 : i32
    %c0_i32_118 = arith.constant 0 : i32
    %161 = tpu.memref_slice %arg7[%11, %c6_i32_115, %c2_i32_117, %c0_i32_118] : memref<2x8x4x128xf32, #tpu.memory_space<vmem>> -> memref<1x1x1x128xf32, #tpu.memory_space<vmem>>
    %162 = tpu.memref_squeeze %161 : memref<1x1x1x128xf32, #tpu.memory_space<vmem>> -> memref<1x128xf32, #tpu.memory_space<vmem>>
    %163 = tpu.memref_slice %arg9[%11] : memref<2x!tpu.dma_semaphore, #tpu.memory_space<semaphore_mem>> -> memref<1x!tpu.dma_semaphore, #tpu.memory_space<semaphore_mem>>
    %164 = tpu.memref_squeeze %163 : memref<1x!tpu.dma_semaphore, #tpu.memory_space<semaphore_mem>> -> memref<!tpu.dma_semaphore, #tpu.memory_space<semaphore_mem>>
    tpu.wait_dma2 semaphore(%164 : memref<!tpu.dma_semaphore, #tpu.memory_space<semaphore_mem>>) src(%160 : memref<1x128xf32, #tpu.memory_space<any>>) dst(%162 : memref<1x128xf32, #tpu.memory_space<vmem>>)
    %c6_i32_119 = arith.constant 6 : i32
    %c0_i32_120 = arith.constant 0 : i32
    %165 = tpu.memref_slice %arg4[%c0_i32_120, %1] : memref<64x128xf32, #tpu.memory_space<any>> -> memref<1x128xf32, #tpu.memory_space<any>>
    %c3_i32_121 = arith.constant 3 : i32
    %c0_i32_122 = arith.constant 0 : i32
    %166 = tpu.memref_slice %arg7[%11, %c6_i32_119, %c3_i32_121, %c0_i32_122] : memref<2x8x4x128xf32, #tpu.memory_space<vmem>> -> memref<1x1x1x128xf32, #tpu.memory_space<vmem>>
    %167 = tpu.memref_squeeze %166 : memref<1x1x1x128xf32, #tpu.memory_space<vmem>> -> memref<1x128xf32, #tpu.memory_space<vmem>>
    %168 = tpu.memref_slice %arg9[%11] : memref<2x!tpu.dma_semaphore, #tpu.memory_space<semaphore_mem>> -> memref<1x!tpu.dma_semaphore, #tpu.memory_space<semaphore_mem>>
    %169 = tpu.memref_squeeze %168 : memref<1x!tpu.dma_semaphore, #tpu.memory_space<semaphore_mem>> -> memref<!tpu.dma_semaphore, #tpu.memory_space<semaphore_mem>>
    tpu.wait_dma2 semaphore(%169 : memref<!tpu.dma_semaphore, #tpu.memory_space<semaphore_mem>>) src(%165 : memref<1x128xf32, #tpu.memory_space<any>>) dst(%167 : memref<1x128xf32, #tpu.memory_space<vmem>>)
    %c7_i32 = arith.constant 7 : i32
    %c0_i32_123 = arith.constant 0 : i32
    %170 = tpu.memref_slice %arg4[%c0_i32_123, %1] : memref<64x128xf32, #tpu.memory_space<any>> -> memref<1x128xf32, #tpu.memory_space<any>>
    %c0_i32_124 = arith.constant 0 : i32
    %c0_i32_125 = arith.constant 0 : i32
    %171 = tpu.memref_slice %arg7[%11, %c7_i32, %c0_i32_124, %c0_i32_125] : memref<2x8x4x128xf32, #tpu.memory_space<vmem>> -> memref<1x1x1x128xf32, #tpu.memory_space<vmem>>
    %172 = tpu.memref_squeeze %171 : memref<1x1x1x128xf32, #tpu.memory_space<vmem>> -> memref<1x128xf32, #tpu.memory_space<vmem>>
    %173 = tpu.memref_slice %arg9[%11] : memref<2x!tpu.dma_semaphore, #tpu.memory_space<semaphore_mem>> -> memref<1x!tpu.dma_semaphore, #tpu.memory_space<semaphore_mem>>
    %174 = tpu.memref_squeeze %173 : memref<1x!tpu.dma_semaphore, #tpu.memory_space<semaphore_mem>> -> memref<!tpu.dma_semaphore, #tpu.memory_space<semaphore_mem>>
    tpu.wait_dma2 semaphore(%174 : memref<!tpu.dma_semaphore, #tpu.memory_space<semaphore_mem>>) src(%170 : memref<1x128xf32, #tpu.memory_space<any>>) dst(%172 : memref<1x128xf32, #tpu.memory_space<vmem>>)
    %c7_i32_126 = arith.constant 7 : i32
    %c0_i32_127 = arith.constant 0 : i32
    %175 = tpu.memref_slice %arg4[%c0_i32_127, %1] : memref<64x128xf32, #tpu.memory_space<any>> -> memref<1x128xf32, #tpu.memory_space<any>>
    %c1_i32_128 = arith.constant 1 : i32
    %c0_i32_129 = arith.constant 0 : i32
    %176 = tpu.memref_slice %arg7[%11, %c7_i32_126, %c1_i32_128, %c0_i32_129] : memref<2x8x4x128xf32, #tpu.memory_space<vmem>> -> memref<1x1x1x128xf32, #tpu.memory_space<vmem>>
    %177 = tpu.memref_squeeze %176 : memref<1x1x1x128xf32, #tpu.memory_space<vmem>> -> memref<1x128xf32, #tpu.memory_space<vmem>>
    %178 = tpu.memref_slice %arg9[%11] : memref<2x!tpu.dma_semaphore, #tpu.memory_space<semaphore_mem>> -> memref<1x!tpu.dma_semaphore, #tpu.memory_space<semaphore_mem>>
    %179 = tpu.memref_squeeze %178 : memref<1x!tpu.dma_semaphore, #tpu.memory_space<semaphore_mem>> -> memref<!tpu.dma_semaphore, #tpu.memory_space<semaphore_mem>>
    tpu.wait_dma2 semaphore(%179 : memref<!tpu.dma_semaphore, #tpu.memory_space<semaphore_mem>>) src(%175 : memref<1x128xf32, #tpu.memory_space<any>>) dst(%177 : memref<1x128xf32, #tpu.memory_space<vmem>>)
    %c7_i32_130 = arith.constant 7 : i32
    %c0_i32_131 = arith.constant 0 : i32
    %180 = tpu.memref_slice %arg4[%c0_i32_131, %1] : memref<64x128xf32, #tpu.memory_space<any>> -> memref<1x128xf32, #tpu.memory_space<any>>
    %c2_i32_132 = arith.constant 2 : i32
    %c0_i32_133 = arith.constant 0 : i32
    %181 = tpu.memref_slice %arg7[%11, %c7_i32_130, %c2_i32_132, %c0_i32_133] : memref<2x8x4x128xf32, #tpu.memory_space<vmem>> -> memref<1x1x1x128xf32, #tpu.memory_space<vmem>>
    %182 = tpu.memref_squeeze %181 : memref<1x1x1x128xf32, #tpu.memory_space<vmem>> -> memref<1x128xf32, #tpu.memory_space<vmem>>
    %183 = tpu.memref_slice %arg9[%11] : memref<2x!tpu.dma_semaphore, #tpu.memory_space<semaphore_mem>> -> memref<1x!tpu.dma_semaphore, #tpu.memory_space<semaphore_mem>>
    %184 = tpu.memref_squeeze %183 : memref<1x!tpu.dma_semaphore, #tpu.memory_space<semaphore_mem>> -> memref<!tpu.dma_semaphore, #tpu.memory_space<semaphore_mem>>
    tpu.wait_dma2 semaphore(%184 : memref<!tpu.dma_semaphore, #tpu.memory_space<semaphore_mem>>) src(%180 : memref<1x128xf32, #tpu.memory_space<any>>) dst(%182 : memref<1x128xf32, #tpu.memory_space<vmem>>)
    %c7_i32_134 = arith.constant 7 : i32
    %c0_i32_135 = arith.constant 0 : i32
    %185 = tpu.memref_slice %arg4[%c0_i32_135, %1] : memref<64x128xf32, #tpu.memory_space<any>> -> memref<1x128xf32, #tpu.memory_space<any>>
    %c3_i32_136 = arith.constant 3 : i32
    %c0_i32_137 = arith.constant 0 : i32
    %186 = tpu.memref_slice %arg7[%11, %c7_i32_134, %c3_i32_136, %c0_i32_137] : memref<2x8x4x128xf32, #tpu.memory_space<vmem>> -> memref<1x1x1x128xf32, #tpu.memory_space<vmem>>
    %187 = tpu.memref_squeeze %186 : memref<1x1x1x128xf32, #tpu.memory_space<vmem>> -> memref<1x128xf32, #tpu.memory_space<vmem>>
    %188 = tpu.memref_slice %arg9[%11] : memref<2x!tpu.dma_semaphore, #tpu.memory_space<semaphore_mem>> -> memref<1x!tpu.dma_semaphore, #tpu.memory_space<semaphore_mem>>
    %189 = tpu.memref_squeeze %188 : memref<1x!tpu.dma_semaphore, #tpu.memory_space<semaphore_mem>> -> memref<!tpu.dma_semaphore, #tpu.memory_space<semaphore_mem>>
    tpu.wait_dma2 semaphore(%189 : memref<!tpu.dma_semaphore, #tpu.memory_space<semaphore_mem>>) src(%185 : memref<1x128xf32, #tpu.memory_space<any>>) dst(%187 : memref<1x128xf32, #tpu.memory_space<vmem>>)
    %190 = arith.index_cast %11 : i32 to index
    %c0 = arith.constant 0 : index
    %c0_138 = arith.constant 0 : index
    %c0_139 = arith.constant 0 : index
    %191 = vector.load %arg7[%190, %c0, %c0_138, %c0_139] : memref<2x8x4x128xf32, #tpu.memory_space<vmem>>, vector<1x8x4x128xf32>
    %192 = vector.shape_cast %191 : vector<1x8x4x128xf32> to vector<8x4x128xf32>
    %c0_140 = arith.constant 0 : index
    %c0_141 = arith.constant 0 : index
    %c0_142 = arith.constant 0 : index
    %193 = vector.load %arg5[%c0_140, %c0_141, %c0_142] : memref<8x4x128xf32, #tpu.memory_space<vmem>>, vector<8x4x128xf32>
    tpu.vector_store %arg5[%c0_140, %c0_141, %c0_142], %192 {strides = array<i32>} : memref<8x4x128xf32, #tpu.memory_space<vmem>>, vector<8x4x128xf32>,
    %c0_143 = arith.constant 0 : index
    %c0_144 = arith.constant 0 : index
    %194 = vector.load %arg8[%c0_143, %c0_144] : memref<4x128xf32, #tpu.memory_space<vmem>>, vector<4x128xf32>
    %cst = arith.constant dense<0.000000e+00> : vector<4x128xf32>
    %195 = vector.multi_reduction <add>, %192, %cst [0] : vector<8x4x128xf32> to vector<4x128xf32>
    %196 = arith.addf %194, %195 : vector<4x128xf32>
    %c0_145 = arith.constant 0 : index
    %c0_146 = arith.constant 0 : index
    %197 = vector.load %arg8[%c0_145, %c0_146] : memref<4x128xf32, #tpu.memory_space<vmem>>, vector<4x128xf32>
    tpu.vector_store %arg8[%c0_145, %c0_146], %196 {strides = array<i32>} : memref<4x128xf32, #tpu.memory_space<vmem>>, vector<4x128xf32>,
    %c0_i32_147 = arith.constant 0 : i32
    %198 = arith.cmpi eq, %arg1, %c0_i32_147 : i32
    %199 = arith.extui %198 : i1 to i32
    %c0_i32_148 = arith.constant 0 : i32
    %200 = arith.cmpi ne, %199, %c0_i32_148 : i32
    scf.if %200 {
      %c0_149 = arith.constant 0 : index
      %c0_150 = arith.constant 0 : index
      %201 = vector.load %arg8[%c0_149, %c0_150] : memref<4x128xf32, #tpu.memory_space<vmem>>, vector<4x128xf32>
      %c0_151 = arith.constant 0 : index
      %c0_152 = arith.constant 0 : index
      %202 = vector.load %arg3[%c0_151, %c0_152] : memref<4x1xf32, #tpu.memory_space<vmem>>, vector<4x1xf32>
      %203 = vector.broadcast %202 : vector<4x1xf32> to vector<4x128xf32>
      %204 = arith.mulf %201, %203 : vector<4x128xf32>
      %c0_153 = arith.constant 0 : index
      %c0_154 = arith.constant 0 : index
      %205 = vector.load %arg6[%c0_153, %c0_154] : memref<4x128xf32, #tpu.memory_space<vmem>>, vector<4x128xf32>
      tpu.vector_store %arg6[%c0_153, %c0_154], %204 {strides = array<i32>} : memref<4x128xf32, #tpu.memory_space<vmem>>, vector<4x128xf32>,
    } else {
    }
    return
  }
  func.func @transform_0(%arg0: i32, %arg1: i32, %arg2: memref<32xi32, #tpu.memory_space<smem>>) -> (i32, i32) {
    %c0_i32 = arith.constant 0 : i32
    %c0_i32_0 = arith.constant 0 : i32
    %c0_i32_1 = arith.constant 0 : i32
    return %c0_i32, %c0_i32_0 : i32, i32
  }
  func.func @transform_2(%arg0: i32, %arg1: i32, %arg2: memref<32xi32, #tpu.memory_space<smem>>) -> (i32, i32, i32) {
    %c0_i32 = arith.constant 0 : i32
    %c0_i32_0 = arith.constant 0 : i32
    return %arg1, %c0_i32, %arg0 : i32, i32, i32
  }
  func.func @transform_3(%arg0: i32, %arg1: i32, %arg2: memref<32xi32, #tpu.memory_space<smem>>) -> (i32, i32) {
    %c0_i32 = arith.constant 0 : i32
    %c0_i32_0 = arith.constant 0 : i32
    return %c0_i32, %arg0 : i32, i32
  }
}

</mosaic_0001>

<bundles_post_ra>
// kernel: tpu_custom_call.1
= control target key start
LH: loop header
LB: loop body
LE: loop exit
PB: predicated region body
PF: predicated region fallthrough
CT: control target
= control target key end

     0   :  { %s3207_s0 = inlined_call_operand.vmem [shape: s32[32], index: 0, kind: input, shape index: {}]   ;;  %s3208_s1 = inlined_call_operand.vmem [shape: f32[4,1], index: 1, kind: input, shape index: {}]   ;;  %s3209_s2 = inlined_call_operand.hbm [shape: f32[64,128], index: 2, kind: input, shape index: {}]   ;;  %s3210_s3 = inlined_call_operand.hbm [shape: f32[8,4,128], index: 3, kind: output, shape index: {0}]   ;;  %s3211_s4 = inlined_call_operand.hbm [shape: f32[4,128], index: 4, kind: output, shape index: {1}]  }
   0x1   :  { %s10_s17 = sshll.u32 %s3207_s0, 4  ;;  %s11_s17 = int_to_ptr.vmem [resolvable:$true] %s10_s17 }
   0x2   :  { %s1761_s18 = scalar_lea.vmem %s11_s17, 16  ;;  %p1766_p1 = scmp.lt.s32.totalorder %s11_s17, %s11_s17 }
   0x3   :  { %p1762_p0 = scmp.ne.s32.totalorder %s11_s17, %s1761_s18  ;;  %p1767_p2 = scmp.lt.s32.totalorder %s1761_s18, %s1761_s18 }
   0x5   :  { %p1768_p3 = por %p1767_p2, %p1766_p1 }
   0x7   :  { %p1769_p4 = pnand %p1768_p3, %p1762_p0 }
   0x9   :  { %1772 = shalt.err (!%p1769_p4)  }
   0xa   :  { %s2593_s19 = smov [#allocation6]  }
   0xb   :  { %13 = dma.vmem_to_smem %s11_s17, 16, %s2593_s19, [#allocation5] }
   0xc   :  { %2585 = dma.done.wait [#allocation5], 16 }
   0xd   :  { %2586 = vsyncadd [#allocation5], 4294967280 }
   0xe   :  { %15 = sfence }
   0xf   :  { %16 = vsyncpa [#allocation8], 0 }
  0x10   :  { %17 = vsyncpa [#allocation10], 0  ;;  %s46_s20 = sld [smem:[#allocation6]]  ;;  %s2594_s21 = smov [#allocation2]   ;;  %v2595_v0 = vmov 0.0  }
  0x11   :  { %s59_s22 = sshll.u32 %s2594_s21, 4  ;;  %s2660_s23 = sld [smem:[#allocation6 + $0x1]]  ;;  %559 = vst [vmem:[#allocation3] sm:$0xf] %v2595_v0  ;;  %s2662_s22 = int_to_ptr.vmem [resolvable:$true] %s59_s22 }
  0x12   :  { %s2596_s0 = smov [#allocation2 + $0x1]   ;;  %s2664_s25 = sld [smem:[#allocation6 + $0x2]] }
  0x13   :  { %s75_s24 = sshll.u32 %s2596_s0, 4  ;;  %s2597_s26 = smov [#allocation2 + $0x2]   ;;  %s2666_s24 = int_to_ptr.vmem [resolvable:$true] %s75_s24 }
  0x14   :  { %s91_s27 = sshll.u32 %s2597_s26, 4  ;;  %s2668_s28 = sld [smem:[#allocation6 + $0x3]]  ;;  %s2670_s27 = int_to_ptr.vmem [resolvable:$true] %s91_s27 }
  0x15   :  { %s2679_s11 = scalar_lea.hbm %s3209_s2, 1024 }
  0x16   :  { %s1592_s29 = sshll.u32 %s46_s20, 4 }
  0x17   :  { %s51_s6 = scalar_lea.hbm %s3209_s2, %s1592_s29  ;;  %s1594_s7 = sshll.u32 %s2660_s23, 4 }
  0x18   :  { %s1773_s8 = scalar_lea.hbm %s51_s6, 16  ;;  %p1776_p6 = scmp.lt.u32.totalorder %s51_s6, %s3209_s2 }
  0x19   :  { %p1774_p5 = scmp.ne.s32.totalorder %s51_s6, %s1773_s8  ;;  %p1777_p7 = scmp.lt.u32.totalorder %s2679_s11, %s1773_s8 }
  0x1a   :  { %p1779_p9 = scmp.lt.u32.totalorder %s1773_s8, %s51_s6 }
  0x1b   :  { %p1778_p8 = por %p1777_p7, %p1776_p6 }
  0x1d   :  { %p1780_p10 = por %p1779_p9, %p1778_p8 }
  0x1f   :  { %p1781_p11 = pnand %p1780_p10, %p1774_p5 }
  0x21   :  { %1784 = shalt.err (!%p1781_p11)  }
  0x22   :  { %s1785_s14 = scalar_lea.vmem %s2662_s22, 16  ;;  %s2688_s15 = scalar_lea.vmem %s2662_s22, 1024 }
  0x23   :  { %p1786_p12 = scmp.ne.s32.totalorder %s2662_s22, %s1785_s14  ;;  %p1790_p13 = scmp.lt.s32.totalorder %s2662_s22, %s2662_s22 }
  0x24   :  { %p1791_p0 = scmp.lt.s32.totalorder %s2688_s15, %s1785_s14 }
  0x26   :  { %p1792_p1 = por %p1791_p0, %p1790_p13 }
  0x28   :  { %p1793_p2 = pnand %p1792_p1, %p1786_p12 }
  0x2a   :  { %1796 = shalt.err (!%p1793_p2)  }
  0x2b   :  { %62 = dma.hbm_to_vmem [thread:$0]  %s51_s6, 16, %s2662_s22, [#allocation4] }
  0x2c   :  { %s66_s18 = scalar_lea.hbm %s3209_s2, %s1594_s7  ;;  %s1596_s19 = sshll.u32 %s2664_s25, 4 }
  0x2d   :  { %s1797_s20 = scalar_lea.hbm %s66_s18, 16  ;;  %p1800_p4 = scmp.lt.u32.totalorder %s66_s18, %s3209_s2 }
  0x2e   :  { %p1798_p3 = scmp.ne.s32.totalorder %s66_s18, %s1797_s20  ;;  %p1801_p5 = scmp.lt.u32.totalorder %s2679_s11, %s1797_s20 }
  0x2f   :  { %p1803_p7 = scmp.lt.u32.totalorder %s1797_s20, %s66_s18 }
  0x30   :  { %p1802_p6 = por %p1801_p5, %p1800_p4 }
  0x32   :  { %p1804_p8 = por %p1803_p7, %p1802_p6 }
  0x34   :  { %p1805_p9 = pnand %p1804_p8, %p1798_p3 }
  0x36   :  { %1808 = shalt.err (!%p1805_p9)  }
  0x37   :  { %s1809_s0 = scalar_lea.vmem %s2666_s24, 16  ;;  %p1814_p11 = scmp.lt.s32.totalorder %s2666_s24, %s2662_s22 }
  0x38   :  { %p1810_p10 = scmp.ne.s32.totalorder %s2666_s24, %s1809_s0  ;;  %p1815_p12 = scmp.lt.s32.totalorder %s2688_s15, %s1809_s0 }
  0x3a   :  { %p1816_p13 = por %p1815_p12, %p1814_p11 }
  0x3c   :  { %p1817_p0 = pnand %p1816_p13, %p1810_p10 }
  0x3e   :  { %1820 = shalt.err (!%p1817_p0)  }
  0x3f   :  { %78 = dma.hbm_to_vmem [thread:$0]  %s66_s18, 16, %s2666_s24, [#allocation4] }
  0x40   :  { %s82_s29 = scalar_lea.hbm %s3209_s2, %s1596_s19  ;;  %s1598_s30 = sshll.u32 %s2668_s28, 4 }
  0x41   :  { %s1821_s5 = scalar_lea.hbm %s82_s29, 16  ;;  %p1824_p2 = scmp.lt.u32.totalorder %s82_s29, %s3209_s2 }
  0x42   :  { %p1822_p1 = scmp.ne.s32.totalorder %s82_s29, %s1821_s5  ;;  %p1825_p3 = scmp.lt.u32.totalorder %s2679_s11, %s1821_s5 }
  0x43   :  { %p1827_p5 = scmp.lt.u32.totalorder %s1821_s5, %s82_s29 }
  0x44   :  { %p1826_p4 = por %p1825_p3, %p1824_p2 }
  0x46   :  { %p1828_p6 = por %p1827_p5, %p1826_p4 }
  0x48   :  { %p1829_p7 = pnand %p1828_p6, %p1822_p1 }
  0x4a   :  { %1832 = shalt.err (!%p1829_p7)  }
  0x4b   :  { %s1833_s24 = scalar_lea.vmem %s2670_s27, 16  ;;  %p1838_p9 = scmp.lt.s32.totalorder %s2670_s27, %s2662_s22 }
  0x4c   :  { %p1834_p8 = scmp.ne.s32.totalorder %s2670_s27, %s1833_s24  ;;  %p1839_p10 = scmp.lt.s32.totalorder %s2688_s15, %s1833_s24 }
  0x4e   :  { %p1840_p11 = por %p1839_p10, %p1838_p9 }
  0x50   :  { %p1841_p12 = pnand %p1840_p11, %p1834_p8 }
  0x52   :  { %1844 = shalt.err (!%p1841_p12)  }
  0x53   :  { %94 = dma.hbm_to_vmem [thread:$0]  %s82_s29, 16, %s2670_s27, [#allocation4] }
  0x54   :  { %s98_s9 = scalar_lea.hbm %s3209_s2, %s1598_s30  ;;  %s2598_s10 = smov [#allocation2 + $0x3]  }
  0x55   :  { %s107_s12 = sshll.u32 %s2598_s10, 4  ;;  %s2725_s13 = sld [smem:[#allocation6 + $0x4]]  ;;  %s108_s12 = int_to_ptr.vmem [resolvable:$true] %s107_s12 }
  0x56   :  { %s1845_s14 = scalar_lea.hbm %s98_s9, 16  ;;  %p1848_p0 = scmp.lt.u32.totalorder %s98_s9, %s3209_s2 }
  0x57   :  { %p1846_p13 = scmp.ne.s32.totalorder %s98_s9, %s1845_s14  ;;  %p1849_p1 = scmp.lt.u32.totalorder %s2679_s11, %s1845_s14 }
  0x58   :  { %p1851_p3 = scmp.lt.u32.totalorder %s1845_s14, %s98_s9 }
  0x59   :  { %p1850_p2 = por %p1849_p1, %p1848_p0 }
  0x5b   :  { %p1852_p4 = por %p1851_p3, %p1850_p2 }
  0x5d   :  { %p1853_p5 = pnand %p1852_p4, %p1846_p13 }
  0x5f   :  { %1856 = shalt.err (!%p1853_p5)  }
  0x60   :  { %s1857_s27 = scalar_lea.vmem %s108_s12, 16  ;;  %p1862_p7 = scmp.lt.s32.totalorder %s108_s12, %s2662_s22 }
  0x61   :  { %p1858_p6 = scmp.ne.s32.totalorder %s108_s12, %s1857_s27  ;;  %p1863_p8 = scmp.lt.s32.totalorder %s2688_s15, %s1857_s27 }
  0x63   :  { %p1864_p9 = por %p1863_p8, %p1862_p7 }
  0x65   :  { %p1865_p10 = pnand %p1864_p9, %p1858_p6 }
  0x67   :  { %1868 = shalt.err (!%p1865_p10)  }
  0x68   :  { %110 = dma.hbm_to_vmem [thread:$0]  %s98_s9, 16, %s108_s12, [#allocation4] }
  0x69   :  { %s2599_s18 = smov [#allocation2 + $0x4]   ;;  %s2733_s20 = sld [smem:[#allocation6 + $0x5]] }
  0x6a   :  { %s123_s19 = sshll.u32 %s2599_s18, 4  ;;  %s2600_s21 = smov [#allocation2 + $0x5]   ;;  %s124_s19 = int_to_ptr.vmem [resolvable:$true] %s123_s19 }
  0x6b   :  { %s139_s23 = sshll.u32 %s2600_s21, 4  ;;  %s2735_s0 = sld [smem:[#allocation6 + $0x6]]  ;;  %s2738_s23 = int_to_ptr.vmem [resolvable:$true] %s139_s23 }
  0x6c   :  { %s1600_s25 = sshll.u32 %s2725_s13, 4 }
  0x6d   :  { %s114_s30 = scalar_lea.hbm %s3209_s2, %s1600_s25 }
  0x6e   :  { %s1869_s5 = scalar_lea.hbm %s114_s30, 16  ;;  %p1872_p12 = scmp.lt.u32.totalorder %s114_s30, %s3209_s2 }
  0x6f   :  { %p1870_p11 = scmp.ne.s32.totalorder %s114_s30, %s1869_s5  ;;  %p1873_p13 = scmp.lt.u32.totalorder %s2679_s11, %s1869_s5 }
  0x70   :  { %p1875_p1 = scmp.lt.u32.totalorder %s1869_s5, %s114_s30 }
  0x71   :  { %p1874_p0 = por %p1873_p13, %p1872_p12 }
  0x73   :  { %p1876_p2 = por %p1875_p1, %p1874_p0 }
  0x75   :  { %p1877_p3 = pnand %p1876_p2, %p1870_p11 }
  0x77   :  { %1880 = shalt.err (!%p1877_p3)  }
  0x78   :  { %s1881_s24 = scalar_lea.vmem %s124_s19, 16  ;;  %p1886_p5 = scmp.lt.s32.totalorder %s124_s19, %s2662_s22 }
  0x79   :  { %p1882_p4 = scmp.ne.s32.totalorder %s124_s19, %s1881_s24  ;;  %p1887_p6 = scmp.lt.s32.totalorder %s2688_s15, %s1881_s24 }
  0x7b   :  { %p1888_p7 = por %p1887_p6, %p1886_p5 }
  0x7d   :  { %p1889_p8 = pnand %p1888_p7, %p1882_p4 }
  0x7f   :  { %1892 = shalt.err (!%p1889_p8)  }
  0x80   :  { %126 = dma.hbm_to_vmem [thread:$0]  %s114_s30, 16, %s124_s19, [#allocation4] }
  0x81   :  { %s1602_s28 = sshll.u32 %s2733_s20, 4  ;;  %s2601_s8 = smov [#allocation2 + $0x6]  }
  0x82   :  { %s155_s9 = sshll.u32 %s2601_s8, 4  ;;  %s130_s13 = scalar_lea.hbm %s3209_s2, %s1602_s28  ;;  %s2753_s9 = int_to_ptr.vmem [resolvable:$true] %s155_s9 }
  0x83   :  { %s1893_s14 = scalar_lea.hbm %s130_s13, 16  ;;  %p1896_p10 = scmp.lt.u32.totalorder %s130_s13, %s3209_s2 }
  0x84   :  { %p1894_p9 = scmp.ne.s32.totalorder %s130_s13, %s1893_s14  ;;  %p1897_p11 = scmp.lt.u32.totalorder %s2679_s11, %s1893_s14 }
  0x85   :  { %p1899_p13 = scmp.lt.u32.totalorder %s1893_s14, %s130_s13 }
  0x86   :  { %p1898_p12 = por %p1897_p11, %p1896_p10 }
  0x88   :  { %p1900_p0 = por %p1899_p13, %p1898_p12 }
  0x8a   :  { %p1901_p1 = pnand %p1900_p0, %p1894_p9 }
  0x8c   :  { %1904 = shalt.err (!%p1901_p1)  }
  0x8d   :  { %s1905_s27 = scalar_lea.vmem %s2738_s23, 16  ;;  %p1910_p3 = scmp.lt.s32.totalorder %s2738_s23, %s2662_s22 }
  0x8e   :  { %p1906_p2 = scmp.ne.s32.totalorder %s2738_s23, %s1905_s27  ;;  %p1911_p4 = scmp.lt.s32.totalorder %s2688_s15, %s1905_s27 }
  0x90   :  { %p1912_p5 = por %p1911_p4, %p1910_p3 }
  0x92   :  { %p1913_p6 = pnand %p1912_p5, %p1906_p2 }
  0x94   :  { %1916 = shalt.err (!%p1913_p6)  }
  0x95   :  { %142 = dma.hbm_to_vmem [thread:$0]  %s130_s13, 16, %s2738_s23, [#allocation4] }
  0x96   :  { %s1604_s18 = sshll.u32 %s2735_s0, 4  ;;  %s2766_s19 = sld [smem:[#allocation6 + $0x7]] }
  0x97   :  { %s146_s25 = scalar_lea.hbm %s3209_s2, %s1604_s18 }
  0x98   :  { %s1917_s26 = scalar_lea.hbm %s146_s25, 16  ;;  %p1920_p8 = scmp.lt.u32.totalorder %s146_s25, %s3209_s2 }
  0x99   :  { %p1918_p7 = scmp.ne.s32.totalorder %s146_s25, %s1917_s26  ;;  %p1921_p9 = scmp.lt.u32.totalorder %s2679_s11, %s1917_s26 }
  0x9a   :  { %p1923_p11 = scmp.lt.u32.totalorder %s1917_s26, %s146_s25 }
  0x9b   :  { %p1922_p10 = por %p1921_p9, %p1920_p8 }
  0x9d   :  { %p1924_p12 = por %p1923_p11, %p1922_p10 }
  0x9f   :  { %p1925_p13 = pnand %p1924_p12, %p1918_p7 }
  0xa1   :  { %1928 = shalt.err (!%p1925_p13)  }
  0xa2   :  { %s1929_s23 = scalar_lea.vmem %s2753_s9, 16  ;;  %p1934_p1 = scmp.lt.s32.totalorder %s2753_s9, %s2662_s22 }
  0xa3   :  { %p1930_p0 = scmp.ne.s32.totalorder %s2753_s9, %s1929_s23  ;;  %p1935_p2 = scmp.lt.s32.totalorder %s2688_s15, %s1929_s23 }
  0xa5   :  { %p1936_p3 = por %p1935_p2, %p1934_p1 }
  0xa7   :  { %p1937_p4 = pnand %p1936_p3, %p1930_p0 }
  0xa9   :  { %1940 = shalt.err (!%p1937_p4)  }
  0xaa   :  { %158 = dma.hbm_to_vmem [thread:$0]  %s146_s25, 16, %s2753_s9, [#allocation4] }
  0xab   :  { %s2602_s0 = smov [#allocation2 + $0x7]   ;;  %s2781_s6 = sld [smem:[#allocation6 + $0x8]] }
  0xac   :  { %s171_s5 = sshll.u32 %s2602_s0, 4  ;;  %s2603_s7 = smov [#allocation2 + $0x8]   ;;  %s172_s5 = int_to_ptr.vmem [resolvable:$true] %s171_s5 }
  0xad   :  { %s187_s24 = sshll.u32 %s2603_s7, 4  ;;  %s2783_s28 = sld [smem:[#allocation6 + $0x9]]  ;;  %s2786_s24 = int_to_ptr.vmem [resolvable:$true] %s187_s24 }
  0xae   :  { %s1606_s8 = sshll.u32 %s2766_s19, 4 }
  0xaf   :  { %s162_s13 = scalar_lea.hbm %s3209_s2, %s1606_s8 }
  0xb0   :  { %s1941_s14 = scalar_lea.hbm %s162_s13, 16  ;;  %p1944_p6 = scmp.lt.u32.totalorder %s162_s13, %s3209_s2 }
  0xb1   :  { %p1942_p5 = scmp.ne.s32.totalorder %s162_s13, %s1941_s14  ;;  %p1945_p7 = scmp.lt.u32.totalorder %s2679_s11, %s1941_s14 }
  0xb2   :  { %p1947_p9 = scmp.lt.u32.totalorder %s1941_s14, %s162_s13 }
  0xb3   :  { %p1946_p8 = por %p1945_p7, %p1944_p6 }
  0xb5   :  { %p1948_p10 = por %p1947_p9, %p1946_p8 }
  0xb7   :  { %p1949_p11 = pnand %p1948_p10, %p1942_p5 }
  0xb9   :  { %1952 = shalt.err (!%p1949_p11)  }
  0xba   :  { %s1953_s17 = scalar_lea.vmem %s172_s5, 16  ;;  %p1958_p13 = scmp.lt.s32.totalorder %s172_s5, %s2662_s22 }
  0xbb   :  { %p1954_p12 = scmp.ne.s32.totalorder %s172_s5, %s1953_s17  ;;  %p1959_p0 = scmp.lt.s32.totalorder %s2688_s15, %s1953_s17 }
  0xbd   :  { %p1960_p1 = por %p1959_p0, %p1958_p13 }
  0xbf   :  { %p1961_p2 = pnand %p1960_p1, %p1954_p12 }
  0xc1   :  { %1964 = shalt.err (!%p1961_p2)  }
  0xc2   :  { %174 = dma.hbm_to_vmem [thread:$0]  %s162_s13, 16, %s172_s5, [#allocation4] }
  0xc3   :  { %s1608_s27 = sshll.u32 %s2781_s6, 4  ;;  %s2604_s18 = smov [#allocation2 + $0x9]  }
  0xc4   :  { %s203_s19 = sshll.u32 %s2604_s18, 4  ;;  %s178_s25 = scalar_lea.hbm %s3209_s2, %s1608_s27  ;;  %s2801_s19 = int_to_ptr.vmem [resolvable:$true] %s203_s19 }
  0xc5   :  { %s1965_s26 = scalar_lea.hbm %s178_s25, 16  ;;  %p1968_p4 = scmp.lt.u32.totalorder %s178_s25, %s3209_s2 }
  0xc6   :  { %p1966_p3 = scmp.ne.s32.totalorder %s178_s25, %s1965_s26  ;;  %p1969_p5 = scmp.lt.u32.totalorder %s2679_s11, %s1965_s26 }
  0xc7   :  { %p1971_p7 = scmp.lt.u32.totalorder %s1965_s26, %s178_s25 }
  0xc8   :  { %p1970_p6 = por %p1969_p5, %p1968_p4 }
  0xca   :  { %p1972_p8 = por %p1971_p7, %p1970_p6 }
  0xcc   :  { %p1973_p9 = pnand %p1972_p8, %p1966_p3 }
  0xce   :  { %1976 = shalt.err (!%p1973_p9)  }
  0xcf   :  { %s1977_s23 = scalar_lea.vmem %s2786_s24, 16  ;;  %p1982_p11 = scmp.lt.s32.totalorder %s2786_s24, %s2662_s22 }
  0xd0   :  { %p1978_p10 = scmp.ne.s32.totalorder %s2786_s24, %s1977_s23  ;;  %p1983_p12 = scmp.lt.s32.totalorder %s2688_s15, %s1977_s23 }
  0xd2   :  { %p1984_p13 = por %p1983_p12, %p1982_p11 }
  0xd4   :  { %p1985_p0 = pnand %p1984_p13, %p1978_p10 }
  0xd6   :  { %1988 = shalt.err (!%p1985_p0)  }
  0xd7   :  { %190 = dma.hbm_to_vmem [thread:$0]  %s178_s25, 16, %s2786_s24, [#allocation4] }
  0xd8   :  { %s1610_s0 = sshll.u32 %s2783_s28, 4  ;;  %s2814_s5 = sld [smem:[#allocation6 + $0xa]] }
  0xd9   :  { %s194_s8 = scalar_lea.hbm %s3209_s2, %s1610_s0 }
  0xda   :  { %s1989_s10 = scalar_lea.hbm %s194_s8, 16  ;;  %p1992_p2 = scmp.lt.u32.totalorder %s194_s8, %s3209_s2 }
  0xdb   :  { %p1990_p1 = scmp.ne.s32.totalorder %s194_s8, %s1989_s10  ;;  %p1993_p3 = scmp.lt.u32.totalorder %s2679_s11, %s1989_s10 }
  0xdc   :  { %p1995_p5 = scmp.lt.u32.totalorder %s1989_s10, %s194_s8 }
  0xdd   :  { %p1994_p4 = por %p1993_p3, %p1992_p2 }
  0xdf   :  { %p1996_p6 = por %p1995_p5, %p1994_p4 }
  0xe1   :  { %p1997_p7 = pnand %p1996_p6, %p1990_p1 }
  0xe3   :  { %2000 = shalt.err (!%p1997_p7)  }
  0xe4   :  { %s2001_s24 = scalar_lea.vmem %s2801_s19, 16  ;;  %p2006_p9 = scmp.lt.s32.totalorder %s2801_s19, %s2662_s22 }
  0xe5   :  { %p2002_p8 = scmp.ne.s32.totalorder %s2801_s19, %s2001_s24  ;;  %p2007_p10 = scmp.lt.s32.totalorder %s2688_s15, %s2001_s24 }
  0xe7   :  { %p2008_p11 = por %p2007_p10, %p2006_p9 }
  0xe9   :  { %p2009_p12 = pnand %p2008_p11, %p2002_p8 }
  0xeb   :  { %2012 = shalt.err (!%p2009_p12)  }
  0xec   :  { %206 = dma.hbm_to_vmem [thread:$0]  %s194_s8, 16, %s2801_s19, [#allocation4] }
  0xed   :  { %s2605_s28 = smov [#allocation2 + $0xa]   ;;  %s2829_s16 = sld [smem:[#allocation6 + $0xb]] }
  0xee   :  { %s219_s14 = sshll.u32 %s2605_s28, 4  ;;  %s2606_s9 = smov [#allocation2 + $0xb]   ;;  %s220_s14 = int_to_ptr.vmem [resolvable:$true] %s219_s14 }
  0xef   :  { %s235_s17 = sshll.u32 %s2606_s9, 4  ;;  %s2831_s27 = sld [smem:[#allocation6 + $0xc]]  ;;  %s2834_s17 = int_to_ptr.vmem [resolvable:$true] %s235_s17 }
  0xf0   :  { %s1612_s18 = sshll.u32 %s2814_s5, 4 }
  0xf1   :  { %s210_s25 = scalar_lea.hbm %s3209_s2, %s1612_s18 }
  0xf2   :  { %s2013_s26 = scalar_lea.hbm %s210_s25, 16  ;;  %p2016_p0 = scmp.lt.u32.totalorder %s210_s25, %s3209_s2 }
  0xf3   :  { %p2014_p13 = scmp.ne.s32.totalorder %s210_s25, %s2013_s26  ;;  %p2017_p1 = scmp.lt.u32.totalorder %s2679_s11, %s2013_s26 }
  0xf4   :  { %p2019_p3 = scmp.lt.u32.totalorder %s2013_s26, %s210_s25 }
  0xf5   :  { %p2018_p2 = por %p2017_p1, %p2016_p0 }
  0xf7   :  { %p2020_p4 = por %p2019_p3, %p2018_p2 }
  0xf9   :  { %p2021_p5 = pnand %p2020_p4, %p2014_p13 }
  0xfb   :  { %2024 = shalt.err (!%p2021_p5)  }
  0xfc   :  { %s2025_s30 = scalar_lea.vmem %s220_s14, 16  ;;  %p2030_p7 = scmp.lt.s32.totalorder %s220_s14, %s2662_s22 }
  0xfd   :  { %p2026_p6 = scmp.ne.s32.totalorder %s220_s14, %s2025_s30  ;;  %p2031_p8 = scmp.lt.s32.totalorder %s2688_s15, %s2025_s30 }
  0xff   :  { %p2032_p9 = por %p2031_p8, %p2030_p7 }
 0x101   :  { %p2033_p10 = pnand %p2032_p9, %p2026_p6 }
 0x103   :  { %2036 = shalt.err (!%p2033_p10)  }
 0x104   :  { %222 = dma.hbm_to_vmem [thread:$0]  %s210_s25, 16, %s220_s14, [#allocation4] }
 0x105   :  { %s1614_s23 = sshll.u32 %s2829_s16, 4  ;;  %s2607_s0 = smov [#allocation2 + $0xc]  }
 0x106   :  { %s251_s5 = sshll.u32 %s2607_s0, 4  ;;  %s226_s8 = scalar_lea.hbm %s3209_s2, %s1614_s23  ;;  %s2849_s5 = int_to_ptr.vmem [resolvable:$true] %s251_s5 }
 0x107   :  { %s2037_s10 = scalar_lea.hbm %s226_s8, 16  ;;  %p2040_p12 = scmp.lt.u32.totalorder %s226_s8, %s3209_s2 }
 0x108   :  { %p2038_p11 = scmp.ne.s32.totalorder %s226_s8, %s2037_s10  ;;  %p2041_p13 = scmp.lt.u32.totalorder %s2679_s11, %s2037_s10 }
 0x109   :  { %p2043_p1 = scmp.lt.u32.totalorder %s2037_s10, %s226_s8 }
 0x10a   :  { %p2042_p0 = por %p2041_p13, %p2040_p12 }
 0x10c   :  { %p2044_p2 = por %p2043_p1, %p2042_p0 }
 0x10e   :  { %p2045_p3 = pnand %p2044_p2, %p2038_p11 }
 0x110   :  { %2048 = shalt.err (!%p2045_p3)  }
 0x111   :  { %s2049_s24 = scalar_lea.vmem %s2834_s17, 16  ;;  %p2054_p5 = scmp.lt.s32.totalorder %s2834_s17, %s2662_s22 }
 0x112   :  { %p2050_p4 = scmp.ne.s32.totalorder %s2834_s17, %s2049_s24  ;;  %p2055_p6 = scmp.lt.s32.totalorder %s2688_s15, %s2049_s24 }
 0x114   :  { %p2056_p7 = por %p2055_p6, %p2054_p5 }
 0x116   :  { %p2057_p8 = pnand %p2056_p7, %p2050_p4 }
 0x118   :  { %2060 = shalt.err (!%p2057_p8)  }
 0x119   :  { %238 = dma.hbm_to_vmem [thread:$0]  %s226_s8, 16, %s2834_s17, [#allocation4] }
 0x11a   :  { %s1616_s28 = sshll.u32 %s2831_s27, 4  ;;  %s2862_s14 = sld [smem:[#allocation6 + $0xd]] }
 0x11b   :  { %s242_s18 = scalar_lea.hbm %s3209_s2, %s1616_s28 }
 0x11c   :  { %s2061_s20 = scalar_lea.hbm %s242_s18, 16  ;;  %p2064_p10 = scmp.lt.u32.totalorder %s242_s18, %s3209_s2 }
 0x11d   :  { %p2062_p9 = scmp.ne.s32.totalorder %s242_s18, %s2061_s20  ;;  %p2065_p11 = scmp.lt.u32.totalorder %s2679_s11, %s2061_s20 }
 0x11e   :  { %p2067_p13 = scmp.lt.u32.totalorder %s2061_s20, %s242_s18 }
 0x11f   :  { %p2066_p12 = por %p2065_p11, %p2064_p10 }
 0x121   :  { %p2068_p0 = por %p2067_p13, %p2066_p12 }
 0x123   :  { %p2069_p1 = pnand %p2068_p0, %p2062_p9 }
 0x125   :  { %2072 = shalt.err (!%p2069_p1)  }
 0x126   :  { %s2073_s17 = scalar_lea.vmem %s2849_s5, 16  ;;  %p2078_p3 = scmp.lt.s32.totalorder %s2849_s5, %s2662_s22 }
 0x127   :  { %p2074_p2 = scmp.ne.s32.totalorder %s2849_s5, %s2073_s17  ;;  %p2079_p4 = scmp.lt.s32.totalorder %s2688_s15, %s2073_s17 }
 0x129   :  { %p2080_p5 = por %p2079_p4, %p2078_p3 }
 0x12b   :  { %p2081_p6 = pnand %p2080_p5, %p2074_p2 }
 0x12d   :  { %2084 = shalt.err (!%p2081_p6)  }
 0x12e   :  { %254 = dma.hbm_to_vmem [thread:$0]  %s242_s18, 16, %s2849_s5, [#allocation4] }
 0x12f   :  { %s2608_s27 = smov [#allocation2 + $0xd]   ;;  %s2877_s29 = sld [smem:[#allocation6 + $0xe]] }
 0x130   :  { %s267_s26 = sshll.u32 %s2608_s27, 4  ;;  %s2609_s19 = smov [#allocation2 + $0xe]   ;;  %s268_s26 = int_to_ptr.vmem [resolvable:$true] %s267_s26 }
 0x131   :  { %s283_s30 = sshll.u32 %s2609_s19, 4  ;;  %s2879_s23 = sld [smem:[#allocation6 + $0xf]]  ;;  %s2882_s30 = int_to_ptr.vmem [resolvable:$true] %s283_s30 }
 0x132   :  { %s1618_s0 = sshll.u32 %s2862_s14, 4 }
 0x133   :  { %s258_s8 = scalar_lea.hbm %s3209_s2, %s1618_s0 }
 0x134   :  { %s2085_s10 = scalar_lea.hbm %s258_s8, 16  ;;  %p2088_p8 = scmp.lt.u32.totalorder %s258_s8, %s3209_s2 }
 0x135   :  { %p2086_p7 = scmp.ne.s32.totalorder %s258_s8, %s2085_s10  ;;  %p2089_p9 = scmp.lt.u32.totalorder %s2679_s11, %s2085_s10 }
 0x136   :  { %p2091_p11 = scmp.lt.u32.totalorder %s2085_s10, %s258_s8 }
 0x137   :  { %p2090_p10 = por %p2089_p9, %p2088_p8 }
 0x139   :  { %p2092_p12 = por %p2091_p11, %p2090_p10 }
 0x13b   :  { %p2093_p13 = pnand %p2092_p12, %p2086_p7 }
 0x13d   :  { %2096 = shalt.err (!%p2093_p13)  }
 0x13e   :  { %s2097_s13 = scalar_lea.vmem %s268_s26, 16  ;;  %p2102_p1 = scmp.lt.s32.totalorder %s268_s26, %s2662_s22 }
 0x13f   :  { %p2098_p0 = scmp.ne.s32.totalorder %s268_s26, %s2097_s13  ;;  %p2103_p2 = scmp.lt.s32.totalorder %s2688_s15, %s2097_s13 }
 0x141   :  { %p2104_p3 = por %p2103_p2, %p2102_p1 }
 0x143   :  { %p2105_p4 = pnand %p2104_p3, %p2098_p0 }
 0x145   :  { %2108 = shalt.err (!%p2105_p4)  }
 0x146   :  { %270 = dma.hbm_to_vmem [thread:$0]  %s258_s8, 16, %s268_s26, [#allocation4] }
 0x147   :  { %s1620_s24 = sshll.u32 %s2877_s29, 4  ;;  %s2610_s28 = smov [#allocation2 + $0xf]  }
 0x148   :  { %s299_s14 = sshll.u32 %s2610_s28, 4  ;;  %s274_s18 = scalar_lea.hbm %s3209_s2, %s1620_s24  ;;  %s2897_s14 = int_to_ptr.vmem [resolvable:$true] %s299_s14 }
 0x149   :  { %s2109_s20 = scalar_lea.hbm %s274_s18, 16  ;;  %p2112_p6 = scmp.lt.u32.totalorder %s274_s18, %s3209_s2 }
 0x14a   :  { %p2110_p5 = scmp.ne.s32.totalorder %s274_s18, %s2109_s20  ;;  %p2113_p7 = scmp.lt.u32.totalorder %s2679_s11, %s2109_s20 }
 0x14b   :  { %p2115_p9 = scmp.lt.u32.totalorder %s2109_s20, %s274_s18 }
 0x14c   :  { %p2114_p8 = por %p2113_p7, %p2112_p6 }
 0x14e   :  { %p2116_p10 = por %p2115_p9, %p2114_p8 }
 0x150   :  { %p2117_p11 = pnand %p2116_p10, %p2110_p5 }
 0x152   :  { %2120 = shalt.err (!%p2117_p11)  }
 0x153   :  { %s2121_s17 = scalar_lea.vmem %s2882_s30, 16  ;;  %p2126_p13 = scmp.lt.s32.totalorder %s2882_s30, %s2662_s22 }
 0x154   :  { %p2122_p12 = scmp.ne.s32.totalorder %s2882_s30, %s2121_s17  ;;  %p2127_p0 = scmp.lt.s32.totalorder %s2688_s15, %s2121_s17 }
 0x156   :  { %p2128_p1 = por %p2127_p0, %p2126_p13 }
 0x158   :  { %p2129_p2 = pnand %p2128_p1, %p2122_p12 }
 0x15a   :  { %2132 = shalt.err (!%p2129_p2)  }
 0x15b   :  { %286 = dma.hbm_to_vmem [thread:$0]  %s274_s18, 16, %s2882_s30, [#allocation4] }
 0x15c   :  { %s1622_s27 = sshll.u32 %s2879_s23, 4  ;;  %s2910_s26 = sld [smem:[#allocation6 + $0x10]] }
 0x15d   :  { %s290_s0 = scalar_lea.hbm %s3209_s2, %s1622_s27 }
 0x15e   :  { %s2133_s6 = scalar_lea.hbm %s290_s0, 16  ;;  %p2136_p4 = scmp.lt.u32.totalorder %s290_s0, %s3209_s2 }
 0x15f   :  { %p2134_p3 = scmp.ne.s32.totalorder %s290_s0, %s2133_s6  ;;  %p2137_p5 = scmp.lt.u32.totalorder %s2679_s11, %s2133_s6 }
 0x160   :  { %p2139_p7 = scmp.lt.u32.totalorder %s2133_s6, %s290_s0 }
 0x161   :  { %p2138_p6 = por %p2137_p5, %p2136_p4 }
 0x163   :  { %p2140_p8 = por %p2139_p7, %p2138_p6 }
 0x165   :  { %p2141_p9 = pnand %p2140_p8, %p2134_p3 }
 0x167   :  { %2144 = shalt.err (!%p2141_p9)  }
 0x168   :  { %s2145_s30 = scalar_lea.vmem %s2897_s14, 16  ;;  %p2150_p11 = scmp.lt.s32.totalorder %s2897_s14, %s2662_s22 }
 0x169   :  { %p2146_p10 = scmp.ne.s32.totalorder %s2897_s14, %s2145_s30  ;;  %p2151_p12 = scmp.lt.s32.totalorder %s2688_s15, %s2145_s30 }
 0x16b   :  { %p2152_p13 = por %p2151_p12, %p2150_p11 }
 0x16d   :  { %p2153_p0 = pnand %p2152_p13, %p2146_p10 }
 0x16f   :  { %2156 = shalt.err (!%p2153_p0)  }
 0x170   :  { %302 = dma.hbm_to_vmem [thread:$0]  %s290_s0, 16, %s2897_s14, [#allocation4] }
 0x171   :  { %s2611_s23 = smov [#allocation2 + $0x10]   ;;  %s2925_s12 = sld [smem:[#allocation6 + $0x11]] }
 0x172   :  { %s315_s10 = sshll.u32 %s2611_s23, 4  ;;  %s2612_s5 = smov [#allocation2 + $0x11]   ;;  %s316_s10 = int_to_ptr.vmem [resolvable:$true] %s315_s10 }
 0x173   :  { %s331_s13 = sshll.u32 %s2612_s5, 4  ;;  %s2927_s24 = sld [smem:[#allocation6 + $0x12]]  ;;  %s2930_s13 = int_to_ptr.vmem [resolvable:$true] %s331_s13 }
 0x174   :  { %s1624_s28 = sshll.u32 %s2910_s26, 4 }
 0x175   :  { %s306_s18 = scalar_lea.hbm %s3209_s2, %s1624_s28 }
 0x176   :  { %s2157_s20 = scalar_lea.hbm %s306_s18, 16  ;;  %p2160_p2 = scmp.lt.u32.totalorder %s306_s18, %s3209_s2 }
 0x177   :  { %p2158_p1 = scmp.ne.s32.totalorder %s306_s18, %s2157_s20  ;;  %p2161_p3 = scmp.lt.u32.totalorder %s2679_s11, %s2157_s20 }
 0x178   :  { %p2163_p5 = scmp.lt.u32.totalorder %s2157_s20, %s306_s18 }
 0x179   :  { %p2162_p4 = por %p2161_p3, %p2160_p2 }
 0x17b   :  { %p2164_p6 = por %p2163_p5, %p2162_p4 }
 0x17d   :  { %p2165_p7 = pnand %p2164_p6, %p2158_p1 }
 0x17f   :  { %2168 = shalt.err (!%p2165_p7)  }
 0x180   :  { %s2169_s25 = scalar_lea.vmem %s316_s10, 16  ;;  %p2174_p9 = scmp.lt.s32.totalorder %s316_s10, %s2662_s22 }
 0x181   :  { %p2170_p8 = scmp.ne.s32.totalorder %s316_s10, %s2169_s25  ;;  %p2175_p10 = scmp.lt.s32.totalorder %s2688_s15, %s2169_s25 }
 0x183   :  { %p2176_p11 = por %p2175_p10, %p2174_p9 }
 0x185   :  { %p2177_p12 = pnand %p2176_p11, %p2170_p8 }
 0x187   :  { %2180 = shalt.err (!%p2177_p12)  }
 0x188   :  { %318 = dma.hbm_to_vmem [thread:$0]  %s306_s18, 16, %s316_s10, [#allocation4] }
 0x189   :  { %s1626_s17 = sshll.u32 %s2925_s12, 4  ;;  %s2613_s27 = smov [#allocation2 + $0x12]  }
 0x18a   :  { %s347_s26 = sshll.u32 %s2613_s27, 4  ;;  %s322_s0 = scalar_lea.hbm %s3209_s2, %s1626_s17  ;;  %s2945_s26 = int_to_ptr.vmem [resolvable:$true] %s347_s26 }
 0x18b   :  { %s2181_s6 = scalar_lea.hbm %s322_s0, 16  ;;  %p2184_p0 = scmp.lt.u32.totalorder %s322_s0, %s3209_s2 }
 0x18c   :  { %p2182_p13 = scmp.ne.s32.totalorder %s322_s0, %s2181_s6  ;;  %p2185_p1 = scmp.lt.u32.totalorder %s2679_s11, %s2181_s6 }
 0x18d   :  { %p2187_p3 = scmp.lt.u32.totalorder %s2181_s6, %s322_s0 }
 0x18e   :  { %p2186_p2 = por %p2185_p1, %p2184_p0 }
 0x190   :  { %p2188_p4 = por %p2187_p3, %p2186_p2 }
 0x192   :  { %p2189_p5 = pnand %p2188_p4, %p2182_p13 }
 0x194   :  { %2192 = shalt.err (!%p2189_p5)  }
 0x195   :  { %s2193_s30 = scalar_lea.vmem %s2930_s13, 16  ;;  %p2198_p7 = scmp.lt.s32.totalorder %s2930_s13, %s2662_s22 }
 0x196   :  { %p2194_p6 = scmp.ne.s32.totalorder %s2930_s13, %s2193_s30  ;;  %p2199_p8 = scmp.lt.s32.totalorder %s2688_s15, %s2193_s30 }
 0x198   :  { %p2200_p9 = por %p2199_p8, %p2198_p7 }
 0x19a   :  { %p2201_p10 = pnand %p2200_p9, %p2194_p6 }
 0x19c   :  { %2204 = shalt.err (!%p2201_p10)  }
 0x19d   :  { %334 = dma.hbm_to_vmem [thread:$0]  %s322_s0, 16, %s2930_s13, [#allocation4] }
 0x19e   :  { %s1628_s23 = sshll.u32 %s2927_s24, 4  ;;  %s2958_s10 = sld [smem:[#allocation6 + $0x13]] }
 0x19f   :  { %s338_s28 = scalar_lea.hbm %s3209_s2, %s1628_s23 }
 0x1a0   :  { %s2205_s16 = scalar_lea.hbm %s338_s28, 16  ;;  %p2208_p12 = scmp.lt.u32.totalorder %s338_s28, %s3209_s2 }
 0x1a1   :  { %p2206_p11 = scmp.ne.s32.totalorder %s338_s28, %s2205_s16  ;;  %p2209_p13 = scmp.lt.u32.totalorder %s2679_s11, %s2205_s16 }
 0x1a2   :  { %p2211_p1 = scmp.lt.u32.totalorder %s2205_s16, %s338_s28 }
 0x1a3   :  { %p2210_p0 = por %p2209_p13, %p2208_p12 }
 0x1a5   :  { %p2212_p2 = por %p2211_p1, %p2210_p0 }
 0x1a7   :  { %p2213_p3 = pnand %p2212_p2, %p2206_p11 }
 0x1a9   :  { %2216 = shalt.err (!%p2213_p3)  }
 0x1aa   :  { %s2217_s13 = scalar_lea.vmem %s2945_s26, 16  ;;  %p2222_p5 = scmp.lt.s32.totalorder %s2945_s26, %s2662_s22 }
 0x1ab   :  { %p2218_p4 = scmp.ne.s32.totalorder %s2945_s26, %s2217_s13  ;;  %p2223_p6 = scmp.lt.s32.totalorder %s2688_s15, %s2217_s13 }
 0x1ad   :  { %p2224_p7 = por %p2223_p6, %p2222_p5 }
 0x1af   :  { %p2225_p8 = pnand %p2224_p7, %p2218_p4 }
 0x1b1   :  { %2228 = shalt.err (!%p2225_p8)  }
 0x1b2   :  { %350 = dma.hbm_to_vmem [thread:$0]  %s338_s28, 16, %s2945_s26, [#allocation4] }
 0x1b3   :  { %s2614_s24 = smov [#allocation2 + $0x13]   ;;  %s2973_s21 = sld [smem:[#allocation6 + $0x14]] }
 0x1b4   :  { %s363_s20 = sshll.u32 %s2614_s24, 4  ;;  %s2615_s14 = smov [#allocation2 + $0x14]   ;;  %s364_s20 = int_to_ptr.vmem [resolvable:$true] %s363_s20 }
 0x1b5   :  { %s379_s25 = sshll.u32 %s2615_s14, 4  ;;  %s2975_s17 = sld [smem:[#allocation6 + $0x15]]  ;;  %s2978_s25 = int_to_ptr.vmem [resolvable:$true] %s379_s25 }
 0x1b6   :  { %s1630_s27 = sshll.u32 %s2958_s10, 4 }
 0x1b7   :  { %s354_s0 = scalar_lea.hbm %s3209_s2, %s1630_s27 }
 0x1b8   :  { %s2229_s6 = scalar_lea.hbm %s354_s0, 16  ;;  %p2232_p10 = scmp.lt.u32.totalorder %s354_s0, %s3209_s2 }
 0x1b9   :  { %p2230_p9 = scmp.ne.s32.totalorder %s354_s0, %s2229_s6  ;;  %p2233_p11 = scmp.lt.u32.totalorder %s2679_s11, %s2229_s6 }
 0x1ba   :  { %p2235_p13 = scmp.lt.u32.totalorder %s2229_s6, %s354_s0 }
 0x1bb   :  { %p2234_p12 = por %p2233_p11, %p2232_p10 }
 0x1bd   :  { %p2236_p0 = por %p2235_p13, %p2234_p12 }
 0x1bf   :  { %p2237_p1 = pnand %p2236_p0, %p2230_p9 }
 0x1c1   :  { %2240 = shalt.err (!%p2237_p1)  }
 0x1c2   :  { %s2241_s8 = scalar_lea.vmem %s364_s20, 16  ;;  %p2246_p3 = scmp.lt.s32.totalorder %s364_s20, %s2662_s22 }
 0x1c3   :  { %p2242_p2 = scmp.ne.s32.totalorder %s364_s20, %s2241_s8  ;;  %p2247_p4 = scmp.lt.s32.totalorder %s2688_s15, %s2241_s8 }
 0x1c5   :  { %p2248_p5 = por %p2247_p4, %p2246_p3 }
 0x1c7   :  { %p2249_p6 = pnand %p2248_p5, %p2242_p2 }
 0x1c9   :  { %2252 = shalt.err (!%p2249_p6)  }
 0x1ca   :  { %366 = dma.hbm_to_vmem [thread:$0]  %s354_s0, 16, %s364_s20, [#allocation4] }
 0x1cb   :  { %s1632_s30 = sshll.u32 %s2973_s21, 4  ;;  %s2616_s23 = smov [#allocation2 + $0x15]  }
 0x1cc   :  { %s395_s10 = sshll.u32 %s2616_s23, 4  ;;  %s370_s28 = scalar_lea.hbm %s3209_s2, %s1632_s30  ;;  %s2993_s10 = int_to_ptr.vmem [resolvable:$true] %s395_s10 }
 0x1cd   :  { %s2253_s16 = scalar_lea.hbm %s370_s28, 16  ;;  %p2256_p8 = scmp.lt.u32.totalorder %s370_s28, %s3209_s2 }
 0x1ce   :  { %p2254_p7 = scmp.ne.s32.totalorder %s370_s28, %s2253_s16  ;;  %p2257_p9 = scmp.lt.u32.totalorder %s2679_s11, %s2253_s16 }
 0x1cf   :  { %p2259_p11 = scmp.lt.u32.totalorder %s2253_s16, %s370_s28 }
 0x1d0   :  { %p2258_p10 = por %p2257_p9, %p2256_p8 }
 0x1d2   :  { %p2260_p12 = por %p2259_p11, %p2258_p10 }
 0x1d4   :  { %p2261_p13 = pnand %p2260_p12, %p2254_p7 }
 0x1d6   :  { %2264 = shalt.err (!%p2261_p13)  }
 0x1d7   :  { %s2265_s13 = scalar_lea.vmem %s2978_s25, 16  ;;  %p2270_p1 = scmp.lt.s32.totalorder %s2978_s25, %s2662_s22 }
 0x1d8   :  { %p2266_p0 = scmp.ne.s32.totalorder %s2978_s25, %s2265_s13  ;;  %p2271_p2 = scmp.lt.s32.totalorder %s2688_s15, %s2265_s13 }
 0x1da   :  { %p2272_p3 = por %p2271_p2, %p2270_p1 }
 0x1dc   :  { %p2273_p4 = pnand %p2272_p3, %p2266_p0 }
 0x1de   :  { %2276 = shalt.err (!%p2273_p4)  }
 0x1df   :  { %382 = dma.hbm_to_vmem [thread:$0]  %s370_s28, 16, %s2978_s25, [#allocation4] }
 0x1e0   :  { %s1634_s24 = sshll.u32 %s2975_s17, 4  ;;  %s3006_s20 = sld [smem:[#allocation6 + $0x16]] }
 0x1e1   :  { %s386_s27 = scalar_lea.hbm %s3209_s2, %s1634_s24 }
 0x1e2   :  { %s2277_s29 = scalar_lea.hbm %s386_s27, 16  ;;  %p2280_p6 = scmp.lt.u32.totalorder %s386_s27, %s3209_s2 }
 0x1e3   :  { %p2278_p5 = scmp.ne.s32.totalorder %s386_s27, %s2277_s29  ;;  %p2281_p7 = scmp.lt.u32.totalorder %s2679_s11, %s2277_s29 }
 0x1e4   :  { %p2283_p9 = scmp.lt.u32.totalorder %s2277_s29, %s386_s27 }
 0x1e5   :  { %p2282_p8 = por %p2281_p7, %p2280_p6 }
 0x1e7   :  { %p2284_p10 = por %p2283_p9, %p2282_p8 }
 0x1e9   :  { %p2285_p11 = pnand %p2284_p10, %p2278_p5 }
 0x1eb   :  { %2288 = shalt.err (!%p2285_p11)  }
 0x1ec   :  { %s2289_s25 = scalar_lea.vmem %s2993_s10, 16  ;;  %p2294_p13 = scmp.lt.s32.totalorder %s2993_s10, %s2662_s22 }
 0x1ed   :  { %p2290_p12 = scmp.ne.s32.totalorder %s2993_s10, %s2289_s25  ;;  %p2295_p0 = scmp.lt.s32.totalorder %s2688_s15, %s2289_s25 }
 0x1ef   :  { %p2296_p1 = por %p2295_p0, %p2294_p13 }
 0x1f1   :  { %p2297_p2 = pnand %p2296_p1, %p2290_p12 }
 0x1f3   :  { %2300 = shalt.err (!%p2297_p2)  }
 0x1f4   :  { %398 = dma.hbm_to_vmem [thread:$0]  %s386_s27, 16, %s2993_s10, [#allocation4] }
 0x1f5   :  { %s2617_s17 = smov [#allocation2 + $0x16]   ;;  %s3021_s7 = sld [smem:[#allocation6 + $0x17]] }
 0x1f6   :  { %s411_s6 = sshll.u32 %s2617_s17, 4  ;;  %s2618_s26 = smov [#allocation2 + $0x17]   ;;  %s412_s6 = int_to_ptr.vmem [resolvable:$true] %s411_s6 }
 0x1f7   :  { %s427_s8 = sshll.u32 %s2618_s26, 4  ;;  %s3023_s30 = sld [smem:[#allocation6 + $0x18]]  ;;  %s3026_s8 = int_to_ptr.vmem [resolvable:$true] %s427_s8 }
 0x1f8   :  { %s1636_s23 = sshll.u32 %s3006_s20, 4 }
 0x1f9   :  { %s402_s28 = scalar_lea.hbm %s3209_s2, %s1636_s23 }
 0x1fa   :  { %s2301_s16 = scalar_lea.hbm %s402_s28, 16  ;;  %p2304_p4 = scmp.lt.u32.totalorder %s402_s28, %s3209_s2 }
 0x1fb   :  { %p2302_p3 = scmp.ne.s32.totalorder %s402_s28, %s2301_s16  ;;  %p2305_p5 = scmp.lt.u32.totalorder %s2679_s11, %s2301_s16 }
 0x1fc   :  { %p2307_p7 = scmp.lt.u32.totalorder %s2301_s16, %s402_s28 }
 0x1fd   :  { %p2306_p6 = por %p2305_p5, %p2304_p4 }
 0x1ff   :  { %p2308_p8 = por %p2307_p7, %p2306_p6 }
 0x201   :  { %p2309_p9 = pnand %p2308_p8, %p2302_p3 }
 0x203   :  { %2312 = shalt.err (!%p2309_p9)  }
 0x204   :  { %s2313_s18 = scalar_lea.vmem %s412_s6, 16  ;;  %p2318_p11 = scmp.lt.s32.totalorder %s412_s6, %s2662_s22 }
 0x205   :  { %p2314_p10 = scmp.ne.s32.totalorder %s412_s6, %s2313_s18  ;;  %p2319_p12 = scmp.lt.s32.totalorder %s2688_s15, %s2313_s18 }
 0x207   :  { %p2320_p13 = por %p2319_p12, %p2318_p11 }
 0x209   :  { %p2321_p0 = pnand %p2320_p13, %p2314_p10 }
 0x20b   :  { %2324 = shalt.err (!%p2321_p0)  }
 0x20c   :  { %414 = dma.hbm_to_vmem [thread:$0]  %s402_s28, 16, %s412_s6, [#allocation4] }
 0x20d   :  { %s1638_s13 = sshll.u32 %s3021_s7, 4  ;;  %s2619_s24 = smov [#allocation2 + $0x18]  }
 0x20e   :  { %s443_s20 = sshll.u32 %s2619_s24, 4  ;;  %s418_s27 = scalar_lea.hbm %s3209_s2, %s1638_s13  ;;  %s3041_s20 = int_to_ptr.vmem [resolvable:$true] %s443_s20 }
 0x20f   :  { %s2325_s29 = scalar_lea.hbm %s418_s27, 16  ;;  %p2328_p2 = scmp.lt.u32.totalorder %s418_s27, %s3209_s2 }
 0x210   :  { %p2326_p1 = scmp.ne.s32.totalorder %s418_s27, %s2325_s29  ;;  %p2329_p3 = scmp.lt.u32.totalorder %s2679_s11, %s2325_s29 }
 0x211   :  { %p2331_p5 = scmp.lt.u32.totalorder %s2325_s29, %s418_s27 }
 0x212   :  { %p2330_p4 = por %p2329_p3, %p2328_p2 }
 0x214   :  { %p2332_p6 = por %p2331_p5, %p2330_p4 }
 0x216   :  { %p2333_p7 = pnand %p2332_p6, %p2326_p1 }
 0x218   :  { %2336 = shalt.err (!%p2333_p7)  }
 0x219   :  { %s2337_s25 = scalar_lea.vmem %s3026_s8, 16  ;;  %p2342_p9 = scmp.lt.s32.totalorder %s3026_s8, %s2662_s22 }
 0x21a   :  { %p2338_p8 = scmp.ne.s32.totalorder %s3026_s8, %s2337_s25  ;;  %p2343_p10 = scmp.lt.s32.totalorder %s2688_s15, %s2337_s25 }
 0x21c   :  { %p2344_p11 = por %p2343_p10, %p2342_p9 }
 0x21e   :  { %p2345_p12 = pnand %p2344_p11, %p2338_p8 }
 0x220   :  { %2348 = shalt.err (!%p2345_p12)  }
 0x221   :  { %430 = dma.hbm_to_vmem [thread:$0]  %s418_s27, 16, %s3026_s8, [#allocation4] }
 0x222   :  { %s1640_s17 = sshll.u32 %s3023_s30, 4  ;;  %s3054_s6 = sld [smem:[#allocation6 + $0x19]] }
 0x223   :  { %s434_s23 = scalar_lea.hbm %s3209_s2, %s1640_s17 }
 0x224   :  { %s2349_s12 = scalar_lea.hbm %s434_s23, 16  ;;  %p2352_p0 = scmp.lt.u32.totalorder %s434_s23, %s3209_s2 }
 0x225   :  { %p2350_p13 = scmp.ne.s32.totalorder %s434_s23, %s2349_s12  ;;  %p2353_p1 = scmp.lt.u32.totalorder %s2679_s11, %s2349_s12 }
 0x226   :  { %p2355_p3 = scmp.lt.u32.totalorder %s2349_s12, %s434_s23 }
 0x227   :  { %p2354_p2 = por %p2353_p1, %p2352_p0 }
 0x229   :  { %p2356_p4 = por %p2355_p3, %p2354_p2 }
 0x22b   :  { %p2357_p5 = pnand %p2356_p4, %p2350_p13 }
 0x22d   :  { %2360 = shalt.err (!%p2357_p5)  }
 0x22e   :  { %s2361_s8 = scalar_lea.vmem %s3041_s20, 16  ;;  %p2366_p7 = scmp.lt.s32.totalorder %s3041_s20, %s2662_s22 }
 0x22f   :  { %p2362_p6 = scmp.ne.s32.totalorder %s3041_s20, %s2361_s8  ;;  %p2367_p8 = scmp.lt.s32.totalorder %s2688_s15, %s2361_s8 }
 0x231   :  { %p2368_p9 = por %p2367_p8, %p2366_p7 }
 0x233   :  { %p2369_p10 = pnand %p2368_p9, %p2362_p6 }
 0x235   :  { %2372 = shalt.err (!%p2369_p10)  }
 0x236   :  { %446 = dma.hbm_to_vmem [thread:$0]  %s434_s23, 16, %s3041_s20, [#allocation4] }
 0x237   :  { %s2620_s30 = smov [#allocation2 + $0x19]   ;;  %s3069_s9 = sld [smem:[#allocation6 + $0x1a]] }
 0x238   :  { %s459_s16 = sshll.u32 %s2620_s30, 4  ;;  %s2621_s10 = smov [#allocation2 + $0x1a]   ;;  %s460_s16 = int_to_ptr.vmem [resolvable:$true] %s459_s16 }
 0x239   :  { %s475_s18 = sshll.u32 %s2621_s10, 4  ;;  %s3071_s13 = sld [smem:[#allocation6 + $0x1b]]  ;;  %s3074_s18 = int_to_ptr.vmem [resolvable:$true] %s475_s18 }
 0x23a   :  { %s1642_s24 = sshll.u32 %s3054_s6, 4 }
 0x23b   :  { %s450_s27 = scalar_lea.hbm %s3209_s2, %s1642_s24 }
 0x23c   :  { %s2373_s29 = scalar_lea.hbm %s450_s27, 16  ;;  %p2376_p12 = scmp.lt.u32.totalorder %s450_s27, %s3209_s2 }
 0x23d   :  { %p2374_p11 = scmp.ne.s32.totalorder %s450_s27, %s2373_s29  ;;  %p2377_p13 = scmp.lt.u32.totalorder %s2679_s11, %s2373_s29 }
 0x23e   :  { %p2379_p1 = scmp.lt.u32.totalorder %s2373_s29, %s450_s27 }
 0x23f   :  { %p2378_p0 = por %p2377_p13, %p2376_p12 }
 0x241   :  { %p2380_p2 = por %p2379_p1, %p2378_p0 }
 0x243   :  { %p2381_p3 = pnand %p2380_p2, %p2374_p11 }
 0x245   :  { %2384 = shalt.err (!%p2381_p3)  }
 0x246   :  { %s2385_s0 = scalar_lea.vmem %s460_s16, 16  ;;  %p2390_p5 = scmp.lt.s32.totalorder %s460_s16, %s2662_s22 }
 0x247   :  { %p2386_p4 = scmp.ne.s32.totalorder %s460_s16, %s2385_s0  ;;  %p2391_p6 = scmp.lt.s32.totalorder %s2688_s15, %s2385_s0 }
 0x249   :  { %p2392_p7 = por %p2391_p6, %p2390_p5 }
 0x24b   :  { %p2393_p8 = pnand %p2392_p7, %p2386_p4 }
 0x24d   :  { %2396 = shalt.err (!%p2393_p8)  }
 0x24e   :  { %462 = dma.hbm_to_vmem [thread:$0]  %s450_s27, 16, %s460_s16, [#allocation4] }
 0x24f   :  { %s1644_s25 = sshll.u32 %s3069_s9, 4  ;;  %s2622_s17 = smov [#allocation2 + $0x1b]  }
 0x250   :  { %s491_s6 = sshll.u32 %s2622_s17, 4  ;;  %s466_s23 = scalar_lea.hbm %s3209_s2, %s1644_s25  ;;  %s3089_s6 = int_to_ptr.vmem [resolvable:$true] %s491_s6 }
 0x251   :  { %s2397_s12 = scalar_lea.hbm %s466_s23, 16  ;;  %p2400_p10 = scmp.lt.u32.totalorder %s466_s23, %s3209_s2 }
 0x252   :  { %p2398_p9 = scmp.ne.s32.totalorder %s466_s23, %s2397_s12  ;;  %p2401_p11 = scmp.lt.u32.totalorder %s2679_s11, %s2397_s12 }
 0x253   :  { %p2403_p13 = scmp.lt.u32.totalorder %s2397_s12, %s466_s23 }
 0x254   :  { %p2402_p12 = por %p2401_p11, %p2400_p10 }
 0x256   :  { %p2404_p0 = por %p2403_p13, %p2402_p12 }
 0x258   :  { %p2405_p1 = pnand %p2404_p0, %p2398_p9 }
 0x25a   :  { %2408 = shalt.err (!%p2405_p1)  }
 0x25b   :  { %s2409_s8 = scalar_lea.vmem %s3074_s18, 16  ;;  %p2414_p3 = scmp.lt.s32.totalorder %s3074_s18, %s2662_s22 }
 0x25c   :  { %p2410_p2 = scmp.ne.s32.totalorder %s3074_s18, %s2409_s8  ;;  %p2415_p4 = scmp.lt.s32.totalorder %s2688_s15, %s2409_s8 }
 0x25e   :  { %p2416_p5 = por %p2415_p4, %p2414_p3 }
 0x260   :  { %p2417_p6 = pnand %p2416_p5, %p2410_p2 }
 0x262   :  { %2420 = shalt.err (!%p2417_p6)  }
 0x263   :  { %478 = dma.hbm_to_vmem [thread:$0]  %s466_s23, 16, %s3074_s18, [#allocation4] }
 0x264   :  { %s1646_s30 = sshll.u32 %s3071_s13, 4  ;;  %s3102_s16 = sld [smem:[#allocation6 + $0x1c]] }
 0x265   :  { %s482_s24 = scalar_lea.hbm %s3209_s2, %s1646_s30 }
 0x266   :  { %s2421_s21 = scalar_lea.hbm %s482_s24, 16  ;;  %p2424_p8 = scmp.lt.u32.totalorder %s482_s24, %s3209_s2 }
 0x267   :  { %p2422_p7 = scmp.ne.s32.totalorder %s482_s24, %s2421_s21  ;;  %p2425_p9 = scmp.lt.u32.totalorder %s2679_s11, %s2421_s21 }
 0x268   :  { %p2427_p11 = scmp.lt.u32.totalorder %s2421_s21, %s482_s24 }
 0x269   :  { %p2426_p10 = por %p2425_p9, %p2424_p8 }
 0x26b   :  { %p2428_p12 = por %p2427_p11, %p2426_p10 }
 0x26d   :  { %p2429_p13 = pnand %p2428_p12, %p2422_p7 }
 0x26f   :  { %2432 = shalt.err (!%p2429_p13)  }
 0x270   :  { %s2433_s18 = scalar_lea.vmem %s3089_s6, 16  ;;  %p2438_p1 = scmp.lt.s32.totalorder %s3089_s6, %s2662_s22 }
 0x271   :  { %p2434_p0 = scmp.ne.s32.totalorder %s3089_s6, %s2433_s18  ;;  %p2439_p2 = scmp.lt.s32.totalorder %s2688_s15, %s2433_s18 }
 0x273   :  { %p2440_p3 = por %p2439_p2, %p2438_p1 }
 0x275   :  { %p2441_p4 = pnand %p2440_p3, %p2434_p0 }
 0x277   :  { %2444 = shalt.err (!%p2441_p4)  }
 0x278   :  { %494 = dma.hbm_to_vmem [thread:$0]  %s482_s24, 16, %s3089_s6, [#allocation4] }
 0x279   :  { %s2623_s13 = smov [#allocation2 + $0x1c]   ;;  %s3117_s19 = sld [smem:[#allocation6 + $0x1d]] }
 0x27a   :  { %s507_s29 = sshll.u32 %s2623_s13, 4  ;;  %s2624_s20 = smov [#allocation2 + $0x1d]   ;;  %s508_s29 = int_to_ptr.vmem [resolvable:$true] %s507_s29 }
 0x27b   :  { %s523_s0 = sshll.u32 %s2624_s20, 4  ;;  %s3119_s25 = sld [smem:[#allocation6 + $0x1e]]  ;;  %s3122_s0 = int_to_ptr.vmem [resolvable:$true] %s523_s0 }
 0x27c   :  { %s1648_s17 = sshll.u32 %s3102_s16, 4 }
 0x27d   :  { %s498_s23 = scalar_lea.hbm %s3209_s2, %s1648_s17 }
 0x27e   :  { %s2445_s12 = scalar_lea.hbm %s498_s23, 16  ;;  %p2448_p6 = scmp.lt.u32.totalorder %s498_s23, %s3209_s2 }
 0x27f   :  { %p2446_p5 = scmp.ne.s32.totalorder %s498_s23, %s2445_s12  ;;  %p2449_p7 = scmp.lt.u32.totalorder %s2679_s11, %s2445_s12 }
 0x280   :  { %p2451_p9 = scmp.lt.u32.totalorder %s2445_s12, %s498_s23 }
 0x281   :  { %p2450_p8 = por %p2449_p7, %p2448_p6 }
 0x283   :  { %p2452_p10 = por %p2451_p9, %p2450_p8 }
 0x285   :  { %p2453_p11 = pnand %p2452_p10, %p2446_p5 }
 0x287   :  { %2456 = shalt.err (!%p2453_p11)  }
 0x288   :  { %s2457_s28 = scalar_lea.vmem %s508_s29, 16  ;;  %p2462_p13 = scmp.lt.s32.totalorder %s508_s29, %s2662_s22 }
 0x289   :  { %p2458_p12 = scmp.ne.s32.totalorder %s508_s29, %s2457_s28  ;;  %p2463_p0 = scmp.lt.s32.totalorder %s2688_s15, %s2457_s28 }
 0x28b   :  { %p2464_p1 = por %p2463_p0, %p2462_p13 }
 0x28d   :  { %p2465_p2 = pnand %p2464_p1, %p2458_p12 }
 0x28f   :  { %2468 = shalt.err (!%p2465_p2)  }
 0x290   :  { %510 = dma.hbm_to_vmem [thread:$0]  %s498_s23, 16, %s508_s29, [#allocation4] }
 0x291   :  { %s1650_s8 = sshll.u32 %s3117_s19, 4  ;;  %s2625_s30 = smov [#allocation2 + $0x1e]  }
 0x292   :  { %s539_s16 = sshll.u32 %s2625_s30, 4  ;;  %s514_s24 = scalar_lea.hbm %s3209_s2, %s1650_s8  ;;  %s3137_s16 = int_to_ptr.vmem [resolvable:$true] %s539_s16 }
 0x293   :  { %s2469_s21 = scalar_lea.hbm %s514_s24, 16  ;;  %p2472_p4 = scmp.lt.u32.totalorder %s514_s24, %s3209_s2 }
 0x294   :  { %p2470_p3 = scmp.ne.s32.totalorder %s514_s24, %s2469_s21  ;;  %p2473_p5 = scmp.lt.u32.totalorder %s2679_s11, %s2469_s21 }
 0x295   :  { %p2475_p7 = scmp.lt.u32.totalorder %s2469_s21, %s514_s24 }
 0x296   :  { %p2474_p6 = por %p2473_p5, %p2472_p4 }
 0x298   :  { %p2476_p8 = por %p2475_p7, %p2474_p6 }
 0x29a   :  { %p2477_p9 = pnand %p2476_p8, %p2470_p3 }
 0x29c   :  { %2480 = shalt.err (!%p2477_p9)  }
 0x29d   :  { %s2481_s18 = scalar_lea.vmem %s3122_s0, 16  ;;  %p2486_p11 = scmp.lt.s32.totalorder %s3122_s0, %s2662_s22 }
 0x29e   :  { %p2482_p10 = scmp.ne.s32.totalorder %s3122_s0, %s2481_s18  ;;  %p2487_p12 = scmp.lt.s32.totalorder %s2688_s15, %s2481_s18 }
 0x2a0   :  { %p2488_p13 = por %p2487_p12, %p2486_p11 }
 0x2a2   :  { %p2489_p0 = pnand %p2488_p13, %p2482_p10 }
 0x2a4   :  { %2492 = shalt.err (!%p2489_p0)  }
 0x2a5   :  { %526 = dma.hbm_to_vmem [thread:$0]  %s514_s24, 16, %s3122_s0, [#allocation4] }
 0x2a6   :  { %s1652_s13 = sshll.u32 %s3119_s25, 4  ;;  %s1653_s29 = sld [smem:[#allocation6 + $0x1f]] }
 0x2a7   :  { %s530_s17 = scalar_lea.hbm %s3209_s2, %s1652_s13 }
 0x2a8   :  { %s2493_s7 = scalar_lea.hbm %s530_s17, 16  ;;  %p2496_p2 = scmp.lt.u32.totalorder %s530_s17, %s3209_s2 }
 0x2a9   :  { %p2494_p1 = scmp.ne.s32.totalorder %s530_s17, %s2493_s7  ;;  %p2497_p3 = scmp.lt.u32.totalorder %s2679_s11, %s2493_s7 }
 0x2aa   :  { %p2499_p5 = scmp.lt.u32.totalorder %s2493_s7, %s530_s17 }
 0x2ab   :  { %p2498_p4 = por %p2497_p3, %p2496_p2 }
 0x2ad   :  { %p2500_p6 = por %p2499_p5, %p2498_p4 }
 0x2af   :  { %p2501_p7 = pnand %p2500_p6, %p2494_p1 }
 0x2b1   :  { %2504 = shalt.err (!%p2501_p7)  }
 0x2b2   :  { %s2505_s0 = scalar_lea.vmem %s3137_s16, 16  ;;  %p2510_p9 = scmp.lt.s32.totalorder %s3137_s16, %s2662_s22 }
 0x2b3   :  { %p2506_p8 = scmp.ne.s32.totalorder %s3137_s16, %s2505_s0  ;;  %p2511_p10 = scmp.lt.s32.totalorder %s2688_s15, %s2505_s0 }
 0x2b5   :  { %p2512_p11 = por %p2511_p10, %p2510_p9 }
 0x2b7   :  { %p2513_p12 = pnand %p2512_p11, %p2506_p8 }
 0x2b9   :  { %2516 = shalt.err (!%p2513_p12)  }
 0x2ba   :  { %542 = dma.hbm_to_vmem [thread:$0]  %s530_s17, 16, %s3137_s16, [#allocation4] }
 0x2bb   :  { %s2626_s25 = smov [#allocation2 + $0x1f]   ;;  %s1654_s5 = sshll.u32 %s1653_s29, 4 }
 0x2bc   :  { %s555_s12 = sshll.u32 %s2626_s25, 4  ;;  %s546_s8 = scalar_lea.hbm %s3209_s2, %s1654_s5  ;;  %s556_s12 = int_to_ptr.vmem [resolvable:$true] %s555_s12 }
 0x2bd   :  { %s2517_s30 = scalar_lea.hbm %s546_s8, 16  ;;  %p2520_p0 = scmp.lt.u32.totalorder %s546_s8, %s3209_s2 }
 0x2be   :  { %p2518_p13 = scmp.ne.s32.totalorder %s546_s8, %s2517_s30  ;;  %p2521_p1 = scmp.lt.u32.totalorder %s2679_s11, %s2517_s30 }
 0x2bf   :  { %p2523_p3 = scmp.lt.u32.totalorder %s2517_s30, %s546_s8 }
 0x2c0   :  { %p2522_p2 = por %p2521_p1, %p2520_p0 }
 0x2c2   :  { %p2524_p4 = por %p2523_p3, %p2522_p2 }
 0x2c4   :  { %p2525_p5 = pnand %p2524_p4, %p2518_p13 }
 0x2c6   :  { %2528 = shalt.err (!%p2525_p5)  }
 0x2c7   :  { %s2529_s16 = scalar_lea.vmem %s556_s12, 16  ;;  %p2534_p7 = scmp.lt.s32.totalorder %s556_s12, %s2662_s22 }
 0x2c8   :  { %p2530_p6 = scmp.ne.s32.totalorder %s556_s12, %s2529_s16  ;;  %p2535_p8 = scmp.lt.s32.totalorder %s2688_s15, %s2529_s16 }
 0x2ca   :  { %p2536_p9 = por %p2535_p8, %p2534_p7 }
 0x2cc   :  { %p2537_p10 = pnand %p2536_p9, %p2530_p6 }
 0x2ce   :  { %2540 = shalt.err (!%p2537_p10)  }
 0x2cf   :  { %558 = dma.hbm_to_vmem [thread:$0]  %s546_s8, 16, %s556_s12, [#allocation4] }
 0x2d0   :  { %2587 = dma.done.wait [#allocation4], 512 }
 0x2d1   :  { %2588 = vsyncadd [#allocation4], 4294966784  ;;  %v2627_v1 = vmov 0   ;;  %vm1228_vm0 = vcmask 1043456   ;;  %v1250_v2 = vld [vmem:[%s3208_s1] sm:$0xf] }
 0x2d2   :  { %1760 = vset.pattern.permute.xlu0 %v2627_v1  ;;  %v1211_v3 = vld [vmem:[#allocation2] sm:$0xf]  ;;  %v1212_v4 = vld [vmem:[#allocation2 + $0x4] sm:$0xf]  ;;  %v1213_v5 = vld [vmem:[#allocation2 + $0x8] sm:$0xf] }
 0x2d3   :  { %1253 = vperm.xlu0 %1760, %v1250_v2   ;;  %v1214_v6 = vld [vmem:[#allocation2 + $0xc] sm:$0xf]  ;;  %v1215_v7 = vld [vmem:[#allocation2 + $0x10] sm:$0xf]  ;;  %1219 = vst [vmem:[#allocation7] sm:$0xf] %v1211_v3 }
 0x2d4   :  { %1220 = vst [vmem:[#allocation7 + $0x4] sm:$0xf] %v1212_v4  ;;  %v1216_v8 = vld [vmem:[#allocation2 + $0x14] sm:$0xf]  ;;  %v1217_v9 = vld [vmem:[#allocation2 + $0x18] sm:$0xf] }
 0x2d5   :  { %v1218_v10 = vld [vmem:[#allocation2 + $0x1c] sm:$0xf]  ;;  %1221 = vst [vmem:[#allocation7 + $0x8] sm:$0xf] %v1213_v5  ;;  %1222 = vst [vmem:[#allocation7 + $0xc] sm:$0xf] %v1214_v6 }
 0x2d6   :  { %1223 = vst [vmem:[#allocation7 + $0x10] sm:$0xf] %v1215_v7  ;;  %v1229_v11 = vsel %vm1228_vm0, %v1211_v3, 0.0  ;;  %v1230_v12 = vsel %vm1228_vm0, %v1212_v4, 0.0  ;;  %v1232_v13 = vsel %vm1228_vm0, %v1213_v5, 0.0  ;;  %v1234_v15 = vsel %vm1228_vm0, %v1214_v6, 0.0 }
 0x2d7   :  { %1224 = vst [vmem:[#allocation7 + $0x14] sm:$0xf] %v1216_v8  ;;  %1225 = vst [vmem:[#allocation7 + $0x18] sm:$0xf] %v1217_v9  ;;  %v1231_v14 = vadd.f32 %v1230_v12, %v1229_v11  ;;  %s2628_s1 = smov [#allocation7]   ;;  %v1236_v17 = vsel %vm1228_vm0, %v1215_v7, 0.0 }
 0x2d8   :  { %1226 = vst [vmem:[#allocation7 + $0x1c] sm:$0xf] %v1218_v10  ;;  %s1263_s22 = sshll.u32 %s2628_s1, 4  ;;  %s1264_s22 = int_to_ptr.vmem [resolvable:$true] %s1263_s22 }
 0x2d9   :  { %v1233_v16 = vadd.f32 %v1232_v13, %v1231_v14  ;;  %s2541_s15 = scalar_lea.vmem %s1264_s22, 512  ;;  %p2546_p12 = scmp.lt.s32.totalorder %s1264_s22, %s1264_s22 }
 0x2da   :  { %p2542_p11 = scmp.ne.s32.totalorder %s1264_s22, %s2541_s15  ;;  %p2547_p13 = scmp.lt.s32.totalorder %s2541_s15, %s2541_s15 }
 0x2dc   :  { %p2548_p0 = por %p2547_p13, %p2546_p12 }
 0x2de   :  { %p2549_p1 = pnand %p2548_p0, %p2542_p11 }
 0x2e0   :  { %2552 = shalt.err (!%p2549_p1)
}
 0x2e1   :  { %s2553_s14 = scalar_lea.hbm %s3210_s3, 512 }
 0x2e2   :  { %p2554_p2 = scmp.ne.s32.totalorder %s3210_s3, %s2553_s14  ;;  %p2557_p3 = scmp.lt.u32.totalorder %s2553_s14, %s3210_s3 }
 0x2e4   :  { %p2559_p4 = pnand %p2557_p3, %p2554_p2 }
 0x2e6   :  { %2562 = shalt.err (!%p2559_p4)
}
 0x2e7   :  { %s2629_s19 = smov 64   ;;  %s2630_s20 = smov 4   ;;  %v1235_v18 = vadd.f32 %v1234_v15, %v1233_v16  ;;  %v1238_v19 = vsel %vm1228_vm0, %v1216_v8, 0.0  ;;  %v1240_v21 = vsel %vm1228_vm0, %v1217_v9, 0.0  ;;  %v1242_v23 = vsel %vm1228_vm0, %v1218_v10, 0.0 }
 0x2e8   :  { %1269 = dma.vmem_to_hbm [thread:$0]  %s1264_s22, 512, %s3210_s3, [#allocation8], %s2629_s19, %s2629_s19, %s2630_s20   ;;  %v1227_v25 = vld [vmem:[#allocation3] sm:$0xf] }
 0x2e9   :  { %v1237_v20 = vadd.f32 %v1236_v17, %v1235_v18  ;;  %s2631_s26 = smov [#allocation9]  }
 0x2ea   :  { %s1276_s23 = sshll.u32 %s2631_s26, 4  ;;  %s1277_s23 = int_to_ptr.vmem [resolvable:$true] %s1276_s23 }
 0x2eb   :  { %v1239_v22 = vadd.f32 %v1238_v19, %v1237_v20  ;;  %s2563_s3 = scalar_lea.vmem %s1277_s23, 64  ;;  %p2568_p6 = scmp.lt.s32.totalorder %s1277_s23, %s1277_s23 }
 0x2ec   :  { %p2564_p5 = scmp.ne.s32.totalorder %s1277_s23, %s2563_s3  ;;  %p2569_p7 = scmp.lt.s32.totalorder %s2563_s3, %s2563_s3 }
 0x2ed   :  { %v1241_v24 = vadd.f32 %v1240_v21, %v1239_v22 }
 0x2ee   :  { %p2570_p8 = por %p2569_p7, %p2568_p6 }
 0x2ef   :  { %v1243_v26 = vadd.f32 %v1242_v23, %v1241_v24 }
 0x2f0   :  { %p2571_p9 = pnand %p2570_p8, %p2564_p5 }
 0x2f1   :  { %v1244_v27 = vadd.f32 %v1243_v26, %v1227_v25 }
 0x2f3   :  { %1245 = vst [vmem:[#allocation3] sm:$0xf] %v1244_v27 }
 0x2fa   :  { %v1249_v28 = vld [vmem:[#allocation3] sm:$0xf] }
 0x352   :  { %v1254_v29 = vpop.permute.xlu0 %1253 }
 0x353   :  { %v1256_v30 = vmul.f32 %v1254_v29, %v1249_v28 }
 0x355   :  { %1257 = vst [vmem:[#allocation9] sm:$0xf] %v1256_v30 }
 0x356   :  { %2574 = shalt.err (!%p2571_p9)
}
 0x357   :  { %s2575_s12 = scalar_lea.hbm %s3211_s4, 64 }
 0x358   :  { %p2576_p10 = scmp.ne.s32.totalorder %s3211_s4, %s2575_s12  ;;  %p2579_p11 = scmp.lt.u32.totalorder %s2575_s12, %s3211_s4 }
 0x35a   :  { %p2581_p12 = pnand %p2579_p11, %p2576_p10 }
 0x35c   :  { %2584 = shalt.err (!%p2581_p12)
}
 0x35d   :  { %1279 = dma.vmem_to_hbm [thread:$0]  %s1277_s23, 64, %s3211_s4, [#allocation10]  }
 0x35e   :  { %2589 = dma.done.wait [#allocation8], 512  }
 0x35f   :  { %2590 = vsyncadd [#allocation8], 4294966784 }
 0x360   :  { %2591 = dma.done.wait [#allocation10], 64  }
 0x361   :  { %2592 = vsyncadd [#allocation10], 4294967232 }
 0x362   :  { %1286 = vsyncpa [#allocation8], 1 }
 0x363   :  { %1287 = vsyncpa [#allocation10], 1 }
 0x364   :  { %1288 = vsyncmov [#allocation4] }
 0x367   :  { %s1289_s10 = vpop.sfrf %1288 }
 0x368   :  { %p1719_p13 = scmp.ne.s32.totalorder %s1289_s10, 0 }
 0x36a   :  { %1293 = shalt.err (%p1719_p13)  }
 0x36b   :  { %1295 = vsyncmov [#allocation4 + $0x1] }
 0x36e   :  { %s1296_s16 = vpop.sfrf %1295 }
 0x36f   :  { %p1720_p0 = scmp.ne.s32.totalorder %s1296_s16, 0 }
 0x371   :  { %1300 = shalt.err (%p1720_p0)  }

</bundles_post_ra>
